<compile_context>
chip_gen: v6e
topology: v6e:2x2x1
jax: 0.10.0
libtpu: 0.0.40
codegen_flags: <defaults>
</compile_context>

<pallas_src>
import functools

import jax
import jax.numpy as jnp
from jax import lax
from jax.experimental import pallas as pl
from jax.experimental.pallas import tpu as pltpu

# Model hyper-parameters (Dual_LSTM(input_size=30, output_size=8,
# hidden_size=32, num_layers=3)).
IN1 = 26                  # features fed to lstm_1
IN2 = 4                   # features fed to lstm_2
INPUT_SIZE = IN1 + IN2    # 30
HIDDEN = 32
NUM_LAYERS = 3
OUTPUT_SIZE = 8
BN_EPS = 1e-5

H2 = 2 * HIDDEN           # packed hidden width  [h_branch1 | h_branch2] = 64
GATES = 4 * H2            # packed gate width    [f|i|o|g] x 2 branches  = 256

# MXU operand dtype.  float32 matches the PyTorch reference numerics;
# switching to jnp.bfloat16 (accumulation stays f32 via
# preferred_element_type) halves MXU passes and weight traffic -- biggest
# relative win on v5e -- at a small numeric deviation from the reference.
MXU_DTYPE = jnp.float32

_VMEM = pl.BlockSpec(memory_space=pltpu.MemorySpace.VMEM)


def _mm(a, b):
    """MXU matmul with f32 accumulation."""
    return jnp.dot(a.astype(MXU_DTYPE), b.astype(MXU_DTYPE),
                   preferred_element_type=jnp.float32)


def _cell(gates, c_prev):
    """Packed (both-branch) LSTM cell update from pre-activation gates.

    Lane order is [f1 f2 | i1 i2 | o1 o2 | g1 g2]:
      * one sigmoid over the full (B, 8H) tensor covers f/i/o -> fewer
        serialized EUP round trips than four sliced activation calls,
      * only the g chunk needs tanh,
      * f and o sit at offset 0 of their 128-lane group, aligned with c and
        tanh(c_new), so at most one cross-lane realignment per step.
    """
    sig = jax.nn.sigmoid(gates)
    f_g = sig[:, 0 * H2:1 * H2]
    i_g = sig[:, 1 * H2:2 * H2]
    o_g = sig[:, 2 * H2:3 * H2]
    g_g = jnp.tanh(gates[:, 3 * H2:4 * H2])
    c_new = f_g * c_prev + i_g * g_g
    h_new = o_g * jnp.tanh(c_new)
    return h_new, c_new


# ----------------------------------------------------------------------------
# Fused kernel
# ----------------------------------------------------------------------------
def dual_lstm_kernel(x_ref,
                     w0i_ref, w0h_ref, b0_ref,
                     w1i_ref, w1h_ref, b1_ref,
                     w2i_ref, w2h_ref, b2_ref,
                     wl_ref, bl_ref,
                     o_ref,
                     gx_scr,
                     *, batch, seq_len):
    """Whole Dual_LSTM forward in one kernel.

    x_ref  : (B*T, F)   batch-major flattened input (row = b*T + t)
    w*i    : (D, 8H)    packed block-diagonal input->gate weights
    w*h    : (2H, 8H)   packed block-diagonal hidden->gate weights
    b*     : (1, 8H)    packed b_ih + b_hh, lane order [f1 f2 i1 i2 o1 o2 g1 g2]
    wl/bl  : (2H, OUT), (1, OUT)   final linear
    o_ref  : (B, OUT)
    gx_scr : (B*T, 8H)  VMEM scratch, hoisted layer-0 input projection
    """
    # ---- BatchNorm1d: train mode, batch statistics, gamma=1, beta=0 --------
    x = x_ref[...].astype(jnp.float32)                           # (B*T, F)
    mean = jnp.mean(x, axis=0, keepdims=True)                    # per feature
    var = jnp.mean(jnp.square(x - mean), axis=0, keepdims=True)  # biased
    xn = (x - mean) * lax.rsqrt(var + BN_EPS)

    # ---- layer-0 input projection: one MXU matmul, off the serial chain ----
    gx_scr[...] = _mm(xn, w0i_ref[...]) + b0_ref[...]

    # Hoisted bias broadcasts for layers 1/2 (layer-0 bias lives in gx_scr);
    # broadcasting inside the unrolled loop would be re-emitted every step.
    b1b = jnp.broadcast_to(b1_ref[...], (batch, GATES))
    b2b = jnp.broadcast_to(b2_ref[...], (batch, GATES))

    def gx_at(t):
        # Rows {b*T + t} of the precomputed projection as a (B, 8H) value.
        # Tiny static-offset loads, NOT on the recurrent dependency chain.
        rows = [gx_scr[pl.ds(b * seq_len + t, 1), :] for b in range(batch)]
        return rows[0] if batch == 1 else jnp.concatenate(rows, axis=0)

    # Recurrent state lives in vregs only: packed as (B, 2H) = [branch1|branch2].
    zeros = jnp.zeros((batch, H2), jnp.float32)
    h0 = c0 = h1 = c1 = h2 = c2 = zeros

    # ---- wavefront over (layer, time) diagonals -----------------------------
    # At diagonal d, layer l runs timestep t = d - l.  Every gate matmul below
    # only reads state produced at diagonal d-1 (the carried h*/c* values), so
    # the up-to-five dots of one diagonal are independent and pipeline in the
    # MXU; the serial chain is T + L - 1 dependent steps instead of L*T.
    for d in range(seq_len + NUM_LAYERS - 1):
        h0n, c0n, h1n, c1n, h2n, c2n = h0, c0, h1, c1, h2, c2

        if d < seq_len:                              # layer 0 at t = d
            g0 = gx_at(d) + _mm(h0, w0h_ref[...])
            h0n, c0n = _cell(g0, c0)

        if 1 <= d <= seq_len:                        # layer 1 at t = d-1
            # input is layer-0 output at t = d-1 == carried h0
            g1 = _mm(h0, w1i_ref[...]) + _mm(h1, w1h_ref[...]) + b1b
            h1n, c1n = _cell(g1, c1)

        if 2 <= d:                                   # layer 2 at t = d-2
            # input is layer-1 output at t = d-2 == carried h1
            g2 = _mm(h1, w2i_ref[...]) + _mm(h2, w2h_ref[...]) + b2b
            h2n, c2n = _cell(g2, c2)

        h0, c0, h1, c1, h2, c2 = h0n, c0n, h1n, c1n, h2n, c2n

    # h2 == [h1_last | h2_last] == concat(out_1[:, -1], out_2[:, -1]).
    o_ref[...] = (_mm(h2, wl_ref[...]) + bl_ref[...]).astype(o_ref.dtype)


# ----------------------------------------------------------------------------
# Wrapper
# ----------------------------------------------------------------------------
def dual_lstm_forward(x, packed):
    """x: (B, T, INPUT_SIZE) float32 -> (B, OUTPUT_SIZE) float32."""
    batch, seq_len, feat = x.shape
    # Free bitcast (no transpose kernel): kernel consumes batch-major rows.
    x2d = x.reshape(batch * seq_len, feat)
    kernel = functools.partial(dual_lstm_kernel, batch=batch, seq_len=seq_len)
    return pl.pallas_call(
        kernel,
        out_shape=jax.ShapeDtypeStruct((batch, OUTPUT_SIZE), jnp.float32),
        in_specs=[_VMEM] * (1 + len(packed)),
        out_specs=_VMEM,
        scratch_shapes=[
            pltpu.VMEM((batch * seq_len, GATES), jnp.float32),  # layer-0 gx
        ],
    )(x2d, *packed)


# ----------------------------------------------------------------------------
# Deterministic parameter init (PyTorch layout) + block-diagonal packing
# ----------------------------------------------------------------------------
# PyTorch LSTM weights are gate-ordered [i, f, g, o]; we re-pack into
# [f, i, o, g] (see _cell) -- pure relabeling, numerics unchanged.
_GATE_ORDER = (1, 0, 3, 2)


def _uniform(key, shape, bound):
    return jax.random.uniform(key, shape, jnp.float32, -bound, bound)


def _init_branch(key, in_size, hidden, num_layers):
    """PyTorch-layout LSTM params: w_ih (4H, D), w_hh (4H, H), b (4H,)."""
    bound = 1.0 / (hidden ** 0.5)
    layers = []
    for layer_idx in range(num_layers):
        d_in = in_size if layer_idx == 0 else hidden
        key, k1, k2, k3, k4 = jax.random.split(key, 5)
        layers.append({
            "w_ih": _uniform(k1, (4 * hidden, d_in), bound),
            "w_hh": _uniform(k2, (4 * hidden, hidden), bound),
            "b": (_uniform(k3, (4 * hidden,), bound)
                  + _uniform(k4, (4 * hidden,), bound)),   # b_ih + b_hh
        })
    return layers, key


def _pack_block(w1_t, w2_t, hidden):
    """Pack (D1, 4H) and (D2, 4H) branch weights into one (D1+D2, 8H) block.

    Lane layout of the 8H axis: gate-major in order [f, i, o, g], branch-1
    then branch-2 per gate, matching the packed hidden state [h1 | h2].
    Off-diagonal (cross-branch) blocks are zero so the branches stay exact.
    """
    d1, d2 = w1_t.shape[0], w2_t.shape[0]
    cols = []
    for g in _GATE_ORDER:
        blk1 = w1_t[:, g * hidden:(g + 1) * hidden]
        blk2 = w2_t[:, g * hidden:(g + 1) * hidden]
        top = jnp.concatenate([blk1, jnp.zeros((d1, hidden), jnp.float32)], 1)
        bot = jnp.concatenate([jnp.zeros((d2, hidden), jnp.float32), blk2], 1)
        cols.append(jnp.concatenate([top, bot], axis=0))
    return jnp.concatenate(cols, axis=1)


def _pack_bias(b1, b2, hidden):
    parts = []
    for g in _GATE_ORDER:
        parts.append(b1[g * hidden:(g + 1) * hidden])
        parts.append(b2[g * hidden:(g + 1) * hidden])
    return jnp.concatenate(parts).reshape(1, 8 * hidden)


def init_packed_params(key):
    lstm1, key = _init_branch(key, IN1, HIDDEN, NUM_LAYERS)
    lstm2, key = _init_branch(key, IN2, HIDDEN, NUM_LAYERS)
    packed = []
    for l1, l2 in zip(lstm1, lstm2):
        packed.append(_pack_block(l1["w_ih"].T, l2["w_ih"].T, HIDDEN))
        packed.append(_pack_block(l1["w_hh"].T, l2["w_hh"].T, HIDDEN))
        packed.append(_pack_bias(l1["b"], l2["b"], HIDDEN))
    key, kw, kb = jax.random.split(key, 3)
    lin_bound = 1.0 / ((2 * HIDDEN) ** 0.5)
    packed.append(_uniform(kw, (2 * HIDDEN, OUTPUT_SIZE), lin_bound))  # W^T
    packed.append(_uniform(kb, (1, OUTPUT_SIZE), lin_bound))
    return tuple(packed)


# ----------------------------------------------------------------------------
if __name__ == "__main__":
    root_key = jax.random.PRNGKey(0)
    param_key, x_key = jax.random.split(root_key)

    packed_params = init_packed_params(param_key)

    B, T = 2, 8
    x = jax.random.normal(x_key, (B, T, INPUT_SIZE), dtype=jnp.float32)

    out = jax.jit(dual_lstm_forward)(x, packed_params)
    out = jax.block_until_ready(out)

    assert out.shape == (B, OUTPUT_SIZE), out.shape
    assert jnp.all(jnp.isfinite(out))
    print("KERNEL_OK")
</pallas_src>

<mosaic_0001>
module attributes {stable_mosaic.version = 11 : i64} {
  func.func @dual_lstm_kernel(%arg0: memref<16x30xf32, #tpu.memory_space<vmem>>, %arg1: memref<30x256xf32, #tpu.memory_space<vmem>>, %arg2: memref<64x256xf32, #tpu.memory_space<vmem>>, %arg3: memref<1x256xf32, #tpu.memory_space<vmem>>, %arg4: memref<64x256xf32, #tpu.memory_space<vmem>>, %arg5: memref<64x256xf32, #tpu.memory_space<vmem>>, %arg6: memref<1x256xf32, #tpu.memory_space<vmem>>, %arg7: memref<64x256xf32, #tpu.memory_space<vmem>>, %arg8: memref<64x256xf32, #tpu.memory_space<vmem>>, %arg9: memref<1x256xf32, #tpu.memory_space<vmem>>, %arg10: memref<64x8xf32, #tpu.memory_space<vmem>>, %arg11: memref<1x8xf32, #tpu.memory_space<vmem>>, %arg12: memref<2x8xf32, #tpu.memory_space<vmem>>, %arg13: memref<16x256xf32, #tpu.memory_space<vmem>>) attributes {dimension_semantics = [], scalar_prefetch = 0 : i64, scratch_operands = 1 : i64, tpu.core_type = #tpu.core_type<tc>} {
    %c0 = arith.constant 0 : index
    %c0_0 = arith.constant 0 : index
    %0 = vector.load %arg0[%c0, %c0_0] : memref<16x30xf32, #tpu.memory_space<vmem>>, vector<16x30xf32>
    %cst = arith.constant dense<0.000000e+00> : vector<30xf32>
    %1 = vector.multi_reduction <add>, %0, %cst [0] : vector<16x30xf32> to vector<30xf32>
    %2 = vector.shape_cast %1 : vector<30xf32> to vector<1x30xf32>
    %cst_1 = arith.constant 1.600000e+01 : f32
    %3 = vector.broadcast %cst_1 : f32 to vector<1x30xf32>
    %4 = arith.divf %2, %3 : vector<1x30xf32>
    %5 = vector.broadcast %4 : vector<1x30xf32> to vector<16x30xf32>
    %6 = arith.subf %0, %5 : vector<16x30xf32>
    %7 = arith.mulf %6, %6 : vector<16x30xf32>
    %cst_2 = arith.constant dense<0.000000e+00> : vector<30xf32>
    %8 = vector.multi_reduction <add>, %7, %cst_2 [0] : vector<16x30xf32> to vector<30xf32>
    %9 = vector.shape_cast %8 : vector<30xf32> to vector<1x30xf32>
    %cst_3 = arith.constant 1.600000e+01 : f32
    %10 = vector.broadcast %cst_3 : f32 to vector<1x30xf32>
    %11 = arith.divf %9, %10 : vector<1x30xf32>
    %12 = vector.broadcast %4 : vector<1x30xf32> to vector<16x30xf32>
    %13 = arith.subf %0, %12 : vector<16x30xf32>
    %cst_4 = arith.constant 9.99999974E-6 : f32
    %14 = vector.broadcast %cst_4 : f32 to vector<1x30xf32>
    %15 = arith.addf %11, %14 : vector<1x30xf32>
    %16 = math.rsqrt %15 : vector<1x30xf32>
    %17 = vector.broadcast %16 : vector<1x30xf32> to vector<16x30xf32>
    %18 = arith.mulf %13, %17 : vector<16x30xf32>
    %c0_5 = arith.constant 0 : index
    %c0_6 = arith.constant 0 : index
    %19 = vector.load %arg1[%c0_5, %c0_6] : memref<30x256xf32, #tpu.memory_space<vmem>>, vector<30x256xf32>
    %cst_7 = arith.constant dense<0.000000e+00> : vector<16x256xf32>
    %20 = tpu.matmul %18, %19, %cst_7 {dimension_numbers = #tpu.dot_dimension_numbers<[1], [0], [0], [1], [0, 0, 1, 1], [], []>} : vector<16x30xf32>, vector<30x256xf32>, vector<16x256xf32> -> vector<16x256xf32>
    %c0_8 = arith.constant 0 : index
    %c0_9 = arith.constant 0 : index
    %21 = vector.load %arg3[%c0_8, %c0_9] : memref<1x256xf32, #tpu.memory_space<vmem>>, vector<1x256xf32>
    %22 = vector.broadcast %21 : vector<1x256xf32> to vector<16x256xf32>
    %23 = arith.addf %20, %22 : vector<16x256xf32>
    %c0_10 = arith.constant 0 : index
    %c0_11 = arith.constant 0 : index
    %24 = vector.load %arg13[%c0_10, %c0_11] : memref<16x256xf32, #tpu.memory_space<vmem>>, vector<16x256xf32>
    tpu.vector_store %arg13[%c0_10, %c0_11], %23 {strides = array<i32>} : memref<16x256xf32, #tpu.memory_space<vmem>>, vector<16x256xf32>,
    %c0_12 = arith.constant 0 : index
    %c0_13 = arith.constant 0 : index
    %25 = vector.load %arg6[%c0_12, %c0_13] : memref<1x256xf32, #tpu.memory_space<vmem>>, vector<1x256xf32>
    %26 = vector.shape_cast %25 : vector<1x256xf32> to vector<1x256xf32>
    %27 = vector.broadcast %26 : vector<1x256xf32> to vector<2x256xf32>
    %c0_14 = arith.constant 0 : index
    %c0_15 = arith.constant 0 : index
    %28 = vector.load %arg9[%c0_14, %c0_15] : memref<1x256xf32, #tpu.memory_space<vmem>>, vector<1x256xf32>
    %29 = vector.shape_cast %28 : vector<1x256xf32> to vector<1x256xf32>
    %30 = vector.broadcast %29 : vector<1x256xf32> to vector<2x256xf32>
    %cst_16 = arith.constant 0.000000e+00 : f32
    %31 = vector.broadcast %cst_16 : f32 to vector<2x64xf32>
    %c0_17 = arith.constant 0 : index
    %c0_18 = arith.constant 0 : index
    %32 = vector.load %arg13[%c0_17, %c0_18] : memref<16x256xf32, #tpu.memory_space<vmem>>, vector<1x256xf32>
    %c8 = arith.constant 8 : index
    %c0_19 = arith.constant 0 : index
    %33 = vector.load %arg13[%c8, %c0_19] : memref<16x256xf32, #tpu.memory_space<vmem>>, vector<1x256xf32>
    %34 = tpu.concatenate %32, %33 in 0 : vector<1x256xf32>, vector<1x256xf32> -> vector<2x256xf32>
    %c0_20 = arith.constant 0 : index
    %c0_21 = arith.constant 0 : index
    %35 = vector.load %arg2[%c0_20, %c0_21] : memref<64x256xf32, #tpu.memory_space<vmem>>, vector<64x256xf32>
    %cst_22 = arith.constant dense<0.000000e+00> : vector<2x256xf32>
    %36 = tpu.matmul %31, %35, %cst_22 {dimension_numbers = #tpu.dot_dimension_numbers<[1], [0], [0], [1], [0, 0, 1, 1], [], []>} : vector<2x64xf32>, vector<64x256xf32>, vector<2x256xf32> -> vector<2x256xf32>
    %37 = arith.addf %34, %36 : vector<2x256xf32>
    %38 = arith.negf %37 : vector<2x256xf32>
    %39 = math.exp %38 : vector<2x256xf32>
    %cst_23 = arith.constant 1.000000e+00 : f32
    %40 = vector.broadcast %cst_23 : f32 to vector<2x256xf32>
    %41 = arith.addf %40, %39 : vector<2x256xf32>
    %42 = arith.divf %40, %41 : vector<2x256xf32>
    %43 = vector.extract_strided_slice %42 {offsets = [0, 0], sizes = [2, 64], strides = [1, 1]} : vector<2x256xf32> to vector<2x64xf32>
    %44 = vector.extract_strided_slice %42 {offsets = [0, 64], sizes = [2, 64], strides = [1, 1]} : vector<2x256xf32> to vector<2x64xf32>
    %45 = vector.extract_strided_slice %42 {offsets = [0, 128], sizes = [2, 64], strides = [1, 1]} : vector<2x256xf32> to vector<2x64xf32>
    %46 = vector.extract_strided_slice %37 {offsets = [0, 192], sizes = [2, 64], strides = [1, 1]} : vector<2x256xf32> to vector<2x64xf32>
    %47 = math.tanh %46 : vector<2x64xf32>
    %48 = arith.mulf %43, %31 : vector<2x64xf32>
    %49 = arith.mulf %44, %47 : vector<2x64xf32>
    %50 = arith.addf %48, %49 : vector<2x64xf32>
    %51 = math.tanh %50 : vector<2x64xf32>
    %52 = arith.mulf %45, %51 : vector<2x64xf32>
    %c1 = arith.constant 1 : index
    %c0_24 = arith.constant 0 : index
    %53 = vector.load %arg13[%c1, %c0_24] : memref<16x256xf32, #tpu.memory_space<vmem>>, vector<1x256xf32>
    %c9 = arith.constant 9 : index
    %c0_25 = arith.constant 0 : index
    %54 = vector.load %arg13[%c9, %c0_25] : memref<16x256xf32, #tpu.memory_space<vmem>>, vector<1x256xf32>
    %55 = tpu.concatenate %53, %54 in 0 : vector<1x256xf32>, vector<1x256xf32> -> vector<2x256xf32>
    %c0_26 = arith.constant 0 : index
    %c0_27 = arith.constant 0 : index
    %56 = vector.load %arg2[%c0_26, %c0_27] : memref<64x256xf32, #tpu.memory_space<vmem>>, vector<64x256xf32>
    %cst_28 = arith.constant dense<0.000000e+00> : vector<2x256xf32>
    %57 = tpu.matmul %52, %56, %cst_28 {dimension_numbers = #tpu.dot_dimension_numbers<[1], [0], [0], [1], [0, 0, 1, 1], [], []>} : vector<2x64xf32>, vector<64x256xf32>, vector<2x256xf32> -> vector<2x256xf32>
    %58 = arith.addf %55, %57 : vector<2x256xf32>
    %59 = arith.negf %58 : vector<2x256xf32>
    %60 = math.exp %59 : vector<2x256xf32>
    %cst_29 = arith.constant 1.000000e+00 : f32
    %61 = vector.broadcast %cst_29 : f32 to vector<2x256xf32>
    %62 = arith.addf %61, %60 : vector<2x256xf32>
    %63 = arith.divf %61, %62 : vector<2x256xf32>
    %64 = vector.extract_strided_slice %63 {offsets = [0, 0], sizes = [2, 64], strides = [1, 1]} : vector<2x256xf32> to vector<2x64xf32>
    %65 = vector.extract_strided_slice %63 {offsets = [0, 64], sizes = [2, 64], strides = [1, 1]} : vector<2x256xf32> to vector<2x64xf32>
    %66 = vector.extract_strided_slice %63 {offsets = [0, 128], sizes = [2, 64], strides = [1, 1]} : vector<2x256xf32> to vector<2x64xf32>
    %67 = vector.extract_strided_slice %58 {offsets = [0, 192], sizes = [2, 64], strides = [1, 1]} : vector<2x256xf32> to vector<2x64xf32>
    %68 = math.tanh %67 : vector<2x64xf32>
    %69 = arith.mulf %64, %50 : vector<2x64xf32>
    %70 = arith.mulf %65, %68 : vector<2x64xf32>
    %71 = arith.addf %69, %70 : vector<2x64xf32>
    %72 = math.tanh %71 : vector<2x64xf32>
    %73 = arith.mulf %66, %72 : vector<2x64xf32>
    %c0_30 = arith.constant 0 : index
    %c0_31 = arith.constant 0 : index
    %74 = vector.load %arg4[%c0_30, %c0_31] : memref<64x256xf32, #tpu.memory_space<vmem>>, vector<64x256xf32>
    %cst_32 = arith.constant dense<0.000000e+00> : vector<2x256xf32>
    %75 = tpu.matmul %52, %74, %cst_32 {dimension_numbers = #tpu.dot_dimension_numbers<[1], [0], [0], [1], [0, 0, 1, 1], [], []>} : vector<2x64xf32>, vector<64x256xf32>, vector<2x256xf32> -> vector<2x256xf32>
    %c0_33 = arith.constant 0 : index
    %c0_34 = arith.constant 0 : index
    %76 = vector.load %arg5[%c0_33, %c0_34] : memref<64x256xf32, #tpu.memory_space<vmem>>, vector<64x256xf32>
    %cst_35 = arith.constant dense<0.000000e+00> : vector<2x256xf32>
    %77 = tpu.matmul %31, %76, %cst_35 {dimension_numbers = #tpu.dot_dimension_numbers<[1], [0], [0], [1], [0, 0, 1, 1], [], []>} : vector<2x64xf32>, vector<64x256xf32>, vector<2x256xf32> -> vector<2x256xf32>
    %78 = arith.addf %75, %77 : vector<2x256xf32>
    %79 = arith.addf %78, %27 : vector<2x256xf32>
    %80 = arith.negf %79 : vector<2x256xf32>
    %81 = math.exp %80 : vector<2x256xf32>
    %cst_36 = arith.constant 1.000000e+00 : f32
    %82 = vector.broadcast %cst_36 : f32 to vector<2x256xf32>
    %83 = arith.addf %82, %81 : vector<2x256xf32>
    %84 = arith.divf %82, %83 : vector<2x256xf32>
    %85 = vector.extract_strided_slice %84 {offsets = [0, 0], sizes = [2, 64], strides = [1, 1]} : vector<2x256xf32> to vector<2x64xf32>
    %86 = vector.extract_strided_slice %84 {offsets = [0, 64], sizes = [2, 64], strides = [1, 1]} : vector<2x256xf32> to vector<2x64xf32>
    %87 = vector.extract_strided_slice %84 {offsets = [0, 128], sizes = [2, 64], strides = [1, 1]} : vector<2x256xf32> to vector<2x64xf32>
    %88 = vector.extract_strided_slice %79 {offsets = [0, 192], sizes = [2, 64], strides = [1, 1]} : vector<2x256xf32> to vector<2x64xf32>
    %89 = math.tanh %88 : vector<2x64xf32>
    %90 = arith.mulf %85, %31 : vector<2x64xf32>
    %91 = arith.mulf %86, %89 : vector<2x64xf32>
    %92 = arith.addf %90, %91 : vector<2x64xf32>
    %93 = math.tanh %92 : vector<2x64xf32>
    %94 = arith.mulf %87, %93 : vector<2x64xf32>
    %c2 = arith.constant 2 : index
    %c0_37 = arith.constant 0 : index
    %95 = vector.load %arg13[%c2, %c0_37] : memref<16x256xf32, #tpu.memory_space<vmem>>, vector<1x256xf32>
    %c10 = arith.constant 10 : index
    %c0_38 = arith.constant 0 : index
    %96 = vector.load %arg13[%c10, %c0_38] : memref<16x256xf32, #tpu.memory_space<vmem>>, vector<1x256xf32>
    %97 = tpu.concatenate %95, %96 in 0 : vector<1x256xf32>, vector<1x256xf32> -> vector<2x256xf32>
    %c0_39 = arith.constant 0 : index
    %c0_40 = arith.constant 0 : index
    %98 = vector.load %arg2[%c0_39, %c0_40] : memref<64x256xf32, #tpu.memory_space<vmem>>, vector<64x256xf32>
    %cst_41 = arith.constant dense<0.000000e+00> : vector<2x256xf32>
    %99 = tpu.matmul %73, %98, %cst_41 {dimension_numbers = #tpu.dot_dimension_numbers<[1], [0], [0], [1], [0, 0, 1, 1], [], []>} : vector<2x64xf32>, vector<64x256xf32>, vector<2x256xf32> -> vector<2x256xf32>
    %100 = arith.addf %97, %99 : vector<2x256xf32>
    %101 = arith.negf %100 : vector<2x256xf32>
    %102 = math.exp %101 : vector<2x256xf32>
    %cst_42 = arith.constant 1.000000e+00 : f32
    %103 = vector.broadcast %cst_42 : f32 to vector<2x256xf32>
    %104 = arith.addf %103, %102 : vector<2x256xf32>
    %105 = arith.divf %103, %104 : vector<2x256xf32>
    %106 = vector.extract_strided_slice %105 {offsets = [0, 0], sizes = [2, 64], strides = [1, 1]} : vector<2x256xf32> to vector<2x64xf32>
    %107 = vector.extract_strided_slice %105 {offsets = [0, 64], sizes = [2, 64], strides = [1, 1]} : vector<2x256xf32> to vector<2x64xf32>
    %108 = vector.extract_strided_slice %105 {offsets = [0, 128], sizes = [2, 64], strides = [1, 1]} : vector<2x256xf32> to vector<2x64xf32>
    %109 = vector.extract_strided_slice %100 {offsets = [0, 192], sizes = [2, 64], strides = [1, 1]} : vector<2x256xf32> to vector<2x64xf32>
    %110 = math.tanh %109 : vector<2x64xf32>
    %111 = arith.mulf %106, %71 : vector<2x64xf32>
    %112 = arith.mulf %107, %110 : vector<2x64xf32>
    %113 = arith.addf %111, %112 : vector<2x64xf32>
    %114 = math.tanh %113 : vector<2x64xf32>
    %115 = arith.mulf %108, %114 : vector<2x64xf32>
    %c0_43 = arith.constant 0 : index
    %c0_44 = arith.constant 0 : index
    %116 = vector.load %arg4[%c0_43, %c0_44] : memref<64x256xf32, #tpu.memory_space<vmem>>, vector<64x256xf32>
    %cst_45 = arith.constant dense<0.000000e+00> : vector<2x256xf32>
    %117 = tpu.matmul %73, %116, %cst_45 {dimension_numbers = #tpu.dot_dimension_numbers<[1], [0], [0], [1], [0, 0, 1, 1], [], []>} : vector<2x64xf32>, vector<64x256xf32>, vector<2x256xf32> -> vector<2x256xf32>
    %c0_46 = arith.constant 0 : index
    %c0_47 = arith.constant 0 : index
    %118 = vector.load %arg5[%c0_46, %c0_47] : memref<64x256xf32, #tpu.memory_space<vmem>>, vector<64x256xf32>
    %cst_48 = arith.constant dense<0.000000e+00> : vector<2x256xf32>
    %119 = tpu.matmul %94, %118, %cst_48 {dimension_numbers = #tpu.dot_dimension_numbers<[1], [0], [0], [1], [0, 0, 1, 1], [], []>} : vector<2x64xf32>, vector<64x256xf32>, vector<2x256xf32> -> vector<2x256xf32>
    %120 = arith.addf %117, %119 : vector<2x256xf32>
    %121 = arith.addf %120, %27 : vector<2x256xf32>
    %122 = arith.negf %121 : vector<2x256xf32>
    %123 = math.exp %122 : vector<2x256xf32>
    %cst_49 = arith.constant 1.000000e+00 : f32
    %124 = vector.broadcast %cst_49 : f32 to vector<2x256xf32>
    %125 = arith.addf %124, %123 : vector<2x256xf32>
    %126 = arith.divf %124, %125 : vector<2x256xf32>
    %127 = vector.extract_strided_slice %126 {offsets = [0, 0], sizes = [2, 64], strides = [1, 1]} : vector<2x256xf32> to vector<2x64xf32>
    %128 = vector.extract_strided_slice %126 {offsets = [0, 64], sizes = [2, 64], strides = [1, 1]} : vector<2x256xf32> to vector<2x64xf32>
    %129 = vector.extract_strided_slice %126 {offsets = [0, 128], sizes = [2, 64], strides = [1, 1]} : vector<2x256xf32> to vector<2x64xf32>
    %130 = vector.extract_strided_slice %121 {offsets = [0, 192], sizes = [2, 64], strides = [1, 1]} : vector<2x256xf32> to vector<2x64xf32>
    %131 = math.tanh %130 : vector<2x64xf32>
    %132 = arith.mulf %127, %92 : vector<2x64xf32>
    %133 = arith.mulf %128, %131 : vector<2x64xf32>
    %134 = arith.addf %132, %133 : vector<2x64xf32>
    %135 = math.tanh %134 : vector<2x64xf32>
    %136 = arith.mulf %129, %135 : vector<2x64xf32>
    %c0_50 = arith.constant 0 : index
    %c0_51 = arith.constant 0 : index
    %137 = vector.load %arg7[%c0_50, %c0_51] : memref<64x256xf32, #tpu.memory_space<vmem>>, vector<64x256xf32>
    %cst_52 = arith.constant dense<0.000000e+00> : vector<2x256xf32>
    %138 = tpu.matmul %94, %137, %cst_52 {dimension_numbers = #tpu.dot_dimension_numbers<[1], [0], [0], [1], [0, 0, 1, 1], [], []>} : vector<2x64xf32>, vector<64x256xf32>, vector<2x256xf32> -> vector<2x256xf32>
    %c0_53 = arith.constant 0 : index
    %c0_54 = arith.constant 0 : index
    %139 = vector.load %arg8[%c0_53, %c0_54] : memref<64x256xf32, #tpu.memory_space<vmem>>, vector<64x256xf32>
    %cst_55 = arith.constant dense<0.000000e+00> : vector<2x256xf32>
    %140 = tpu.matmul %31, %139, %cst_55 {dimension_numbers = #tpu.dot_dimension_numbers<[1], [0], [0], [1], [0, 0, 1, 1], [], []>} : vector<2x64xf32>, vector<64x256xf32>, vector<2x256xf32> -> vector<2x256xf32>
    %141 = arith.addf %138, %140 : vector<2x256xf32>
    %142 = arith.addf %141, %30 : vector<2x256xf32>
    %143 = arith.negf %142 : vector<2x256xf32>
    %144 = math.exp %143 : vector<2x256xf32>
    %cst_56 = arith.constant 1.000000e+00 : f32
    %145 = vector.broadcast %cst_56 : f32 to vector<2x256xf32>
    %146 = arith.addf %145, %144 : vector<2x256xf32>
    %147 = arith.divf %145, %146 : vector<2x256xf32>
    %148 = vector.extract_strided_slice %147 {offsets = [0, 0], sizes = [2, 64], strides = [1, 1]} : vector<2x256xf32> to vector<2x64xf32>
    %149 = vector.extract_strided_slice %147 {offsets = [0, 64], sizes = [2, 64], strides = [1, 1]} : vector<2x256xf32> to vector<2x64xf32>
    %150 = vector.extract_strided_slice %147 {offsets = [0, 128], sizes = [2, 64], strides = [1, 1]} : vector<2x256xf32> to vector<2x64xf32>
    %151 = vector.extract_strided_slice %142 {offsets = [0, 192], sizes = [2, 64], strides = [1, 1]} : vector<2x256xf32> to vector<2x64xf32>
    %152 = math.tanh %151 : vector<2x64xf32>
    %153 = arith.mulf %148, %31 : vector<2x64xf32>
    %154 = arith.mulf %149, %152 : vector<2x64xf32>
    %155 = arith.addf %153, %154 : vector<2x64xf32>
    %156 = math.tanh %155 : vector<2x64xf32>
    %157 = arith.mulf %150, %156 : vector<2x64xf32>
    %c3 = arith.constant 3 : index
    %c0_57 = arith.constant 0 : index
    %158 = vector.load %arg13[%c3, %c0_57] : memref<16x256xf32, #tpu.memory_space<vmem>>, vector<1x256xf32>
    %c11 = arith.constant 11 : index
    %c0_58 = arith.constant 0 : index
    %159 = vector.load %arg13[%c11, %c0_58] : memref<16x256xf32, #tpu.memory_space<vmem>>, vector<1x256xf32>
    %160 = tpu.concatenate %158, %159 in 0 : vector<1x256xf32>, vector<1x256xf32> -> vector<2x256xf32>
    %c0_59 = arith.constant 0 : index
    %c0_60 = arith.constant 0 : index
    %161 = vector.load %arg2[%c0_59, %c0_60] : memref<64x256xf32, #tpu.memory_space<vmem>>, vector<64x256xf32>
    %cst_61 = arith.constant dense<0.000000e+00> : vector<2x256xf32>
    %162 = tpu.matmul %115, %161, %cst_61 {dimension_numbers = #tpu.dot_dimension_numbers<[1], [0], [0], [1], [0, 0, 1, 1], [], []>} : vector<2x64xf32>, vector<64x256xf32>, vector<2x256xf32> -> vector<2x256xf32>
    %163 = arith.addf %160, %162 : vector<2x256xf32>
    %164 = arith.negf %163 : vector<2x256xf32>
    %165 = math.exp %164 : vector<2x256xf32>
    %cst_62 = arith.constant 1.000000e+00 : f32
    %166 = vector.broadcast %cst_62 : f32 to vector<2x256xf32>
    %167 = arith.addf %166, %165 : vector<2x256xf32>
    %168 = arith.divf %166, %167 : vector<2x256xf32>
    %169 = vector.extract_strided_slice %168 {offsets = [0, 0], sizes = [2, 64], strides = [1, 1]} : vector<2x256xf32> to vector<2x64xf32>
    %170 = vector.extract_strided_slice %168 {offsets = [0, 64], sizes = [2, 64], strides = [1, 1]} : vector<2x256xf32> to vector<2x64xf32>
    %171 = vector.extract_strided_slice %168 {offsets = [0, 128], sizes = [2, 64], strides = [1, 1]} : vector<2x256xf32> to vector<2x64xf32>
    %172 = vector.extract_strided_slice %163 {offsets = [0, 192], sizes = [2, 64], strides = [1, 1]} : vector<2x256xf32> to vector<2x64xf32>
    %173 = math.tanh %172 : vector<2x64xf32>
    %174 = arith.mulf %169, %113 : vector<2x64xf32>
    %175 = arith.mulf %170, %173 : vector<2x64xf32>
    %176 = arith.addf %174, %175 : vector<2x64xf32>
    %177 = math.tanh %176 : vector<2x64xf32>
    %178 = arith.mulf %171, %177 : vector<2x64xf32>
    %c0_63 = arith.constant 0 : index
    %c0_64 = arith.constant 0 : index
    %179 = vector.load %arg4[%c0_63, %c0_64] : memref<64x256xf32, #tpu.memory_space<vmem>>, vector<64x256xf32>
    %cst_65 = arith.constant dense<0.000000e+00> : vector<2x256xf32>
    %180 = tpu.matmul %115, %179, %cst_65 {dimension_numbers = #tpu.dot_dimension_numbers<[1], [0], [0], [1], [0, 0, 1, 1], [], []>} : vector<2x64xf32>, vector<64x256xf32>, vector<2x256xf32> -> vector<2x256xf32>
    %c0_66 = arith.constant 0 : index
    %c0_67 = arith.constant 0 : index
    %181 = vector.load %arg5[%c0_66, %c0_67] : memref<64x256xf32, #tpu.memory_space<vmem>>, vector<64x256xf32>
    %cst_68 = arith.constant dense<0.000000e+00> : vector<2x256xf32>
    %182 = tpu.matmul %136, %181, %cst_68 {dimension_numbers = #tpu.dot_dimension_numbers<[1], [0], [0], [1], [0, 0, 1, 1], [], []>} : vector<2x64xf32>, vector<64x256xf32>, vector<2x256xf32> -> vector<2x256xf32>
    %183 = arith.addf %180, %182 : vector<2x256xf32>
    %184 = arith.addf %183, %27 : vector<2x256xf32>
    %185 = arith.negf %184 : vector<2x256xf32>
    %186 = math.exp %185 : vector<2x256xf32>
    %cst_69 = arith.constant 1.000000e+00 : f32
    %187 = vector.broadcast %cst_69 : f32 to vector<2x256xf32>
    %188 = arith.addf %187, %186 : vector<2x256xf32>
    %189 = arith.divf %187, %188 : vector<2x256xf32>
    %190 = vector.extract_strided_slice %189 {offsets = [0, 0], sizes = [2, 64], strides = [1, 1]} : vector<2x256xf32> to vector<2x64xf32>
    %191 = vector.extract_strided_slice %189 {offsets = [0, 64], sizes = [2, 64], strides = [1, 1]} : vector<2x256xf32> to vector<2x64xf32>
    %192 = vector.extract_strided_slice %189 {offsets = [0, 128], sizes = [2, 64], strides = [1, 1]} : vector<2x256xf32> to vector<2x64xf32>
    %193 = vector.extract_strided_slice %184 {offsets = [0, 192], sizes = [2, 64], strides = [1, 1]} : vector<2x256xf32> to vector<2x64xf32>
    %194 = math.tanh %193 : vector<2x64xf32>
    %195 = arith.mulf %190, %134 : vector<2x64xf32>
    %196 = arith.mulf %191, %194 : vector<2x64xf32>
    %197 = arith.addf %195, %196 : vector<2x64xf32>
    %198 = math.tanh %197 : vector<2x64xf32>
    %199 = arith.mulf %192, %198 : vector<2x64xf32>
    %c0_70 = arith.constant 0 : index
    %c0_71 = arith.constant 0 : index
    %200 = vector.load %arg7[%c0_70, %c0_71] : memref<64x256xf32, #tpu.memory_space<vmem>>, vector<64x256xf32>
    %cst_72 = arith.constant dense<0.000000e+00> : vector<2x256xf32>
    %201 = tpu.matmul %136, %200, %cst_72 {dimension_numbers = #tpu.dot_dimension_numbers<[1], [0], [0], [1], [0, 0, 1, 1], [], []>} : vector<2x64xf32>, vector<64x256xf32>, vector<2x256xf32> -> vector<2x256xf32>
    %c0_73 = arith.constant 0 : index
    %c0_74 = arith.constant 0 : index
    %202 = vector.load %arg8[%c0_73, %c0_74] : memref<64x256xf32, #tpu.memory_space<vmem>>, vector<64x256xf32>
    %cst_75 = arith.constant dense<0.000000e+00> : vector<2x256xf32>
    %203 = tpu.matmul %157, %202, %cst_75 {dimension_numbers = #tpu.dot_dimension_numbers<[1], [0], [0], [1], [0, 0, 1, 1], [], []>} : vector<2x64xf32>, vector<64x256xf32>, vector<2x256xf32> -> vector<2x256xf32>
    %204 = arith.addf %201, %203 : vector<2x256xf32>
    %205 = arith.addf %204, %30 : vector<2x256xf32>
    %206 = arith.negf %205 : vector<2x256xf32>
    %207 = math.exp %206 : vector<2x256xf32>
    %cst_76 = arith.constant 1.000000e+00 : f32
    %208 = vector.broadcast %cst_76 : f32 to vector<2x256xf32>
    %209 = arith.addf %208, %207 : vector<2x256xf32>
    %210 = arith.divf %208, %209 : vector<2x256xf32>
    %211 = vector.extract_strided_slice %210 {offsets = [0, 0], sizes = [2, 64], strides = [1, 1]} : vector<2x256xf32> to vector<2x64xf32>
    %212 = vector.extract_strided_slice %210 {offsets = [0, 64], sizes = [2, 64], strides = [1, 1]} : vector<2x256xf32> to vector<2x64xf32>
    %213 = vector.extract_strided_slice %210 {offsets = [0, 128], sizes = [2, 64], strides = [1, 1]} : vector<2x256xf32> to vector<2x64xf32>
    %214 = vector.extract_strided_slice %205 {offsets = [0, 192], sizes = [2, 64], strides = [1, 1]} : vector<2x256xf32> to vector<2x64xf32>
    %215 = math.tanh %214 : vector<2x64xf32>
    %216 = arith.mulf %211, %155 : vector<2x64xf32>
    %217 = arith.mulf %212, %215 : vector<2x64xf32>
    %218 = arith.addf %216, %217 : vector<2x64xf32>
    %219 = math.tanh %218 : vector<2x64xf32>
    %220 = arith.mulf %213, %219 : vector<2x64xf32>
    %c4 = arith.constant 4 : index
    %c0_77 = arith.constant 0 : index
    %221 = vector.load %arg13[%c4, %c0_77] : memref<16x256xf32, #tpu.memory_space<vmem>>, vector<1x256xf32>
    %c12 = arith.constant 12 : index
    %c0_78 = arith.constant 0 : index
    %222 = vector.load %arg13[%c12, %c0_78] : memref<16x256xf32, #tpu.memory_space<vmem>>, vector<1x256xf32>
    %223 = tpu.concatenate %221, %222 in 0 : vector<1x256xf32>, vector<1x256xf32> -> vector<2x256xf32>
    %c0_79 = arith.constant 0 : index
    %c0_80 = arith.constant 0 : index
    %224 = vector.load %arg2[%c0_79, %c0_80] : memref<64x256xf32, #tpu.memory_space<vmem>>, vector<64x256xf32>
    %cst_81 = arith.constant dense<0.000000e+00> : vector<2x256xf32>
    %225 = tpu.matmul %178, %224, %cst_81 {dimension_numbers = #tpu.dot_dimension_numbers<[1], [0], [0], [1], [0, 0, 1, 1], [], []>} : vector<2x64xf32>, vector<64x256xf32>, vector<2x256xf32> -> vector<2x256xf32>
    %226 = arith.addf %223, %225 : vector<2x256xf32>
    %227 = arith.negf %226 : vector<2x256xf32>
    %228 = math.exp %227 : vector<2x256xf32>
    %cst_82 = arith.constant 1.000000e+00 : f32
    %229 = vector.broadcast %cst_82 : f32 to vector<2x256xf32>
    %230 = arith.addf %229, %228 : vector<2x256xf32>
    %231 = arith.divf %229, %230 : vector<2x256xf32>
    %232 = vector.extract_strided_slice %231 {offsets = [0, 0], sizes = [2, 64], strides = [1, 1]} : vector<2x256xf32> to vector<2x64xf32>
    %233 = vector.extract_strided_slice %231 {offsets = [0, 64], sizes = [2, 64], strides = [1, 1]} : vector<2x256xf32> to vector<2x64xf32>
    %234 = vector.extract_strided_slice %231 {offsets = [0, 128], sizes = [2, 64], strides = [1, 1]} : vector<2x256xf32> to vector<2x64xf32>
    %235 = vector.extract_strided_slice %226 {offsets = [0, 192], sizes = [2, 64], strides = [1, 1]} : vector<2x256xf32> to vector<2x64xf32>
    %236 = math.tanh %235 : vector<2x64xf32>
    %237 = arith.mulf %232, %176 : vector<2x64xf32>
    %238 = arith.mulf %233, %236 : vector<2x64xf32>
    %239 = arith.addf %237, %238 : vector<2x64xf32>
    %240 = math.tanh %239 : vector<2x64xf32>
    %241 = arith.mulf %234, %240 : vector<2x64xf32>
    %c0_83 = arith.constant 0 : index
    %c0_84 = arith.constant 0 : index
    %242 = vector.load %arg4[%c0_83, %c0_84] : memref<64x256xf32, #tpu.memory_space<vmem>>, vector<64x256xf32>
    %cst_85 = arith.constant dense<0.000000e+00> : vector<2x256xf32>
    %243 = tpu.matmul %178, %242, %cst_85 {dimension_numbers = #tpu.dot_dimension_numbers<[1], [0], [0], [1], [0, 0, 1, 1], [], []>} : vector<2x64xf32>, vector<64x256xf32>, vector<2x256xf32> -> vector<2x256xf32>
    %c0_86 = arith.constant 0 : index
    %c0_87 = arith.constant 0 : index
    %244 = vector.load %arg5[%c0_86, %c0_87] : memref<64x256xf32, #tpu.memory_space<vmem>>, vector<64x256xf32>
    %cst_88 = arith.constant dense<0.000000e+00> : vector<2x256xf32>
    %245 = tpu.matmul %199, %244, %cst_88 {dimension_numbers = #tpu.dot_dimension_numbers<[1], [0], [0], [1], [0, 0, 1, 1], [], []>} : vector<2x64xf32>, vector<64x256xf32>, vector<2x256xf32> -> vector<2x256xf32>
    %246 = arith.addf %243, %245 : vector<2x256xf32>
    %247 = arith.addf %246, %27 : vector<2x256xf32>
    %248 = arith.negf %247 : vector<2x256xf32>
    %249 = math.exp %248 : vector<2x256xf32>
    %cst_89 = arith.constant 1.000000e+00 : f32
    %250 = vector.broadcast %cst_89 : f32 to vector<2x256xf32>
    %251 = arith.addf %250, %249 : vector<2x256xf32>
    %252 = arith.divf %250, %251 : vector<2x256xf32>
    %253 = vector.extract_strided_slice %252 {offsets = [0, 0], sizes = [2, 64], strides = [1, 1]} : vector<2x256xf32> to vector<2x64xf32>
    %254 = vector.extract_strided_slice %252 {offsets = [0, 64], sizes = [2, 64], strides = [1, 1]} : vector<2x256xf32> to vector<2x64xf32>
    %255 = vector.extract_strided_slice %252 {offsets = [0, 128], sizes = [2, 64], strides = [1, 1]} : vector<2x256xf32> to vector<2x64xf32>
    %256 = vector.extract_strided_slice %247 {offsets = [0, 192], sizes = [2, 64], strides = [1, 1]} : vector<2x256xf32> to vector<2x64xf32>
    %257 = math.tanh %256 : vector<2x64xf32>
    %258 = arith.mulf %253, %197 : vector<2x64xf32>
    %259 = arith.mulf %254, %257 : vector<2x64xf32>
    %260 = arith.addf %258, %259 : vector<2x64xf32>
    %261 = math.tanh %260 : vector<2x64xf32>
    %262 = arith.mulf %255, %261 : vector<2x64xf32>
    %c0_90 = arith.constant 0 : index
    %c0_91 = arith.constant 0 : index
    %263 = vector.load %arg7[%c0_90, %c0_91] : memref<64x256xf32, #tpu.memory_space<vmem>>, vector<64x256xf32>
    %cst_92 = arith.constant dense<0.000000e+00> : vector<2x256xf32>
    %264 = tpu.matmul %199, %263, %cst_92 {dimension_numbers = #tpu.dot_dimension_numbers<[1], [0], [0], [1], [0, 0, 1, 1], [], []>} : vector<2x64xf32>, vector<64x256xf32>, vector<2x256xf32> -> vector<2x256xf32>
    %c0_93 = arith.constant 0 : index
    %c0_94 = arith.constant 0 : index
    %265 = vector.load %arg8[%c0_93, %c0_94] : memref<64x256xf32, #tpu.memory_space<vmem>>, vector<64x256xf32>
    %cst_95 = arith.constant dense<0.000000e+00> : vector<2x256xf32>
    %266 = tpu.matmul %220, %265, %cst_95 {dimension_numbers = #tpu.dot_dimension_numbers<[1], [0], [0], [1], [0, 0, 1, 1], [], []>} : vector<2x64xf32>, vector<64x256xf32>, vector<2x256xf32> -> vector<2x256xf32>
    %267 = arith.addf %264, %266 : vector<2x256xf32>
    %268 = arith.addf %267, %30 : vector<2x256xf32>
    %269 = arith.negf %268 : vector<2x256xf32>
    %270 = math.exp %269 : vector<2x256xf32>
    %cst_96 = arith.constant 1.000000e+00 : f32
    %271 = vector.broadcast %cst_96 : f32 to vector<2x256xf32>
    %272 = arith.addf %271, %270 : vector<2x256xf32>
    %273 = arith.divf %271, %272 : vector<2x256xf32>
    %274 = vector.extract_strided_slice %273 {offsets = [0, 0], sizes = [2, 64], strides = [1, 1]} : vector<2x256xf32> to vector<2x64xf32>
    %275 = vector.extract_strided_slice %273 {offsets = [0, 64], sizes = [2, 64], strides = [1, 1]} : vector<2x256xf32> to vector<2x64xf32>
    %276 = vector.extract_strided_slice %273 {offsets = [0, 128], sizes = [2, 64], strides = [1, 1]} : vector<2x256xf32> to vector<2x64xf32>
    %277 = vector.extract_strided_slice %268 {offsets = [0, 192], sizes = [2, 64], strides = [1, 1]} : vector<2x256xf32> to vector<2x64xf32>
    %278 = math.tanh %277 : vector<2x64xf32>
    %279 = arith.mulf %274, %218 : vector<2x64xf32>
    %280 = arith.mulf %275, %278 : vector<2x64xf32>
    %281 = arith.addf %279, %280 : vector<2x64xf32>
    %282 = math.tanh %281 : vector<2x64xf32>
    %283 = arith.mulf %276, %282 : vector<2x64xf32>
    %c5 = arith.constant 5 : index
    %c0_97 = arith.constant 0 : index
    %284 = vector.load %arg13[%c5, %c0_97] : memref<16x256xf32, #tpu.memory_space<vmem>>, vector<1x256xf32>
    %c13 = arith.constant 13 : index
    %c0_98 = arith.constant 0 : index
    %285 = vector.load %arg13[%c13, %c0_98] : memref<16x256xf32, #tpu.memory_space<vmem>>, vector<1x256xf32>
    %286 = tpu.concatenate %284, %285 in 0 : vector<1x256xf32>, vector<1x256xf32> -> vector<2x256xf32>
    %c0_99 = arith.constant 0 : index
    %c0_100 = arith.constant 0 : index
    %287 = vector.load %arg2[%c0_99, %c0_100] : memref<64x256xf32, #tpu.memory_space<vmem>>, vector<64x256xf32>
    %cst_101 = arith.constant dense<0.000000e+00> : vector<2x256xf32>
    %288 = tpu.matmul %241, %287, %cst_101 {dimension_numbers = #tpu.dot_dimension_numbers<[1], [0], [0], [1], [0, 0, 1, 1], [], []>} : vector<2x64xf32>, vector<64x256xf32>, vector<2x256xf32> -> vector<2x256xf32>
    %289 = arith.addf %286, %288 : vector<2x256xf32>
    %290 = arith.negf %289 : vector<2x256xf32>
    %291 = math.exp %290 : vector<2x256xf32>
    %cst_102 = arith.constant 1.000000e+00 : f32
    %292 = vector.broadcast %cst_102 : f32 to vector<2x256xf32>
    %293 = arith.addf %292, %291 : vector<2x256xf32>
    %294 = arith.divf %292, %293 : vector<2x256xf32>
    %295 = vector.extract_strided_slice %294 {offsets = [0, 0], sizes = [2, 64], strides = [1, 1]} : vector<2x256xf32> to vector<2x64xf32>
    %296 = vector.extract_strided_slice %294 {offsets = [0, 64], sizes = [2, 64], strides = [1, 1]} : vector<2x256xf32> to vector<2x64xf32>
    %297 = vector.extract_strided_slice %294 {offsets = [0, 128], sizes = [2, 64], strides = [1, 1]} : vector<2x256xf32> to vector<2x64xf32>
    %298 = vector.extract_strided_slice %289 {offsets = [0, 192], sizes = [2, 64], strides = [1, 1]} : vector<2x256xf32> to vector<2x64xf32>
    %299 = math.tanh %298 : vector<2x64xf32>
    %300 = arith.mulf %295, %239 : vector<2x64xf32>
    %301 = arith.mulf %296, %299 : vector<2x64xf32>
    %302 = arith.addf %300, %301 : vector<2x64xf32>
    %303 = math.tanh %302 : vector<2x64xf32>
    %304 = arith.mulf %297, %303 : vector<2x64xf32>
    %c0_103 = arith.constant 0 : index
    %c0_104 = arith.constant 0 : index
    %305 = vector.load %arg4[%c0_103, %c0_104] : memref<64x256xf32, #tpu.memory_space<vmem>>, vector<64x256xf32>
    %cst_105 = arith.constant dense<0.000000e+00> : vector<2x256xf32>
    %306 = tpu.matmul %241, %305, %cst_105 {dimension_numbers = #tpu.dot_dimension_numbers<[1], [0], [0], [1], [0, 0, 1, 1], [], []>} : vector<2x64xf32>, vector<64x256xf32>, vector<2x256xf32> -> vector<2x256xf32>
    %c0_106 = arith.constant 0 : index
    %c0_107 = arith.constant 0 : index
    %307 = vector.load %arg5[%c0_106, %c0_107] : memref<64x256xf32, #tpu.memory_space<vmem>>, vector<64x256xf32>
    %cst_108 = arith.constant dense<0.000000e+00> : vector<2x256xf32>
    %308 = tpu.matmul %262, %307, %cst_108 {dimension_numbers = #tpu.dot_dimension_numbers<[1], [0], [0], [1], [0, 0, 1, 1], [], []>} : vector<2x64xf32>, vector<64x256xf32>, vector<2x256xf32> -> vector<2x256xf32>
    %309 = arith.addf %306, %308 : vector<2x256xf32>
    %310 = arith.addf %309, %27 : vector<2x256xf32>
    %311 = arith.negf %310 : vector<2x256xf32>
    %312 = math.exp %311 : vector<2x256xf32>
    %cst_109 = arith.constant 1.000000e+00 : f32
    %313 = vector.broadcast %cst_109 : f32 to vector<2x256xf32>
    %314 = arith.addf %313, %312 : vector<2x256xf32>
    %315 = arith.divf %313, %314 : vector<2x256xf32>
    %316 = vector.extract_strided_slice %315 {offsets = [0, 0], sizes = [2, 64], strides = [1, 1]} : vector<2x256xf32> to vector<2x64xf32>
    %317 = vector.extract_strided_slice %315 {offsets = [0, 64], sizes = [2, 64], strides = [1, 1]} : vector<2x256xf32> to vector<2x64xf32>
    %318 = vector.extract_strided_slice %315 {offsets = [0, 128], sizes = [2, 64], strides = [1, 1]} : vector<2x256xf32> to vector<2x64xf32>
    %319 = vector.extract_strided_slice %310 {offsets = [0, 192], sizes = [2, 64], strides = [1, 1]} : vector<2x256xf32> to vector<2x64xf32>
    %320 = math.tanh %319 : vector<2x64xf32>
    %321 = arith.mulf %316, %260 : vector<2x64xf32>
    %322 = arith.mulf %317, %320 : vector<2x64xf32>
    %323 = arith.addf %321, %322 : vector<2x64xf32>
    %324 = math.tanh %323 : vector<2x64xf32>
    %325 = arith.mulf %318, %324 : vector<2x64xf32>
    %c0_110 = arith.constant 0 : index
    %c0_111 = arith.constant 0 : index
    %326 = vector.load %arg7[%c0_110, %c0_111] : memref<64x256xf32, #tpu.memory_space<vmem>>, vector<64x256xf32>
    %cst_112 = arith.constant dense<0.000000e+00> : vector<2x256xf32>
    %327 = tpu.matmul %262, %326, %cst_112 {dimension_numbers = #tpu.dot_dimension_numbers<[1], [0], [0], [1], [0, 0, 1, 1], [], []>} : vector<2x64xf32>, vector<64x256xf32>, vector<2x256xf32> -> vector<2x256xf32>
    %c0_113 = arith.constant 0 : index
    %c0_114 = arith.constant 0 : index
    %328 = vector.load %arg8[%c0_113, %c0_114] : memref<64x256xf32, #tpu.memory_space<vmem>>, vector<64x256xf32>
    %cst_115 = arith.constant dense<0.000000e+00> : vector<2x256xf32>
    %329 = tpu.matmul %283, %328, %cst_115 {dimension_numbers = #tpu.dot_dimension_numbers<[1], [0], [0], [1], [0, 0, 1, 1], [], []>} : vector<2x64xf32>, vector<64x256xf32>, vector<2x256xf32> -> vector<2x256xf32>
    %330 = arith.addf %327, %329 : vector<2x256xf32>
    %331 = arith.addf %330, %30 : vector<2x256xf32>
    %332 = arith.negf %331 : vector<2x256xf32>
    %333 = math.exp %332 : vector<2x256xf32>
    %cst_116 = arith.constant 1.000000e+00 : f32
    %334 = vector.broadcast %cst_116 : f32 to vector<2x256xf32>
    %335 = arith.addf %334, %333 : vector<2x256xf32>
    %336 = arith.divf %334, %335 : vector<2x256xf32>
    %337 = vector.extract_strided_slice %336 {offsets = [0, 0], sizes = [2, 64], strides = [1, 1]} : vector<2x256xf32> to vector<2x64xf32>
    %338 = vector.extract_strided_slice %336 {offsets = [0, 64], sizes = [2, 64], strides = [1, 1]} : vector<2x256xf32> to vector<2x64xf32>
    %339 = vector.extract_strided_slice %336 {offsets = [0, 128], sizes = [2, 64], strides = [1, 1]} : vector<2x256xf32> to vector<2x64xf32>
    %340 = vector.extract_strided_slice %331 {offsets = [0, 192], sizes = [2, 64], strides = [1, 1]} : vector<2x256xf32> to vector<2x64xf32>
    %341 = math.tanh %340 : vector<2x64xf32>
    %342 = arith.mulf %337, %281 : vector<2x64xf32>
    %343 = arith.mulf %338, %341 : vector<2x64xf32>
    %344 = arith.addf %342, %343 : vector<2x64xf32>
    %345 = math.tanh %344 : vector<2x64xf32>
    %346 = arith.mulf %339, %345 : vector<2x64xf32>
    %c6 = arith.constant 6 : index
    %c0_117 = arith.constant 0 : index
    %347 = vector.load %arg13[%c6, %c0_117] : memref<16x256xf32, #tpu.memory_space<vmem>>, vector<1x256xf32>
    %c14 = arith.constant 14 : index
    %c0_118 = arith.constant 0 : index
    %348 = vector.load %arg13[%c14, %c0_118] : memref<16x256xf32, #tpu.memory_space<vmem>>, vector<1x256xf32>
    %349 = tpu.concatenate %347, %348 in 0 : vector<1x256xf32>, vector<1x256xf32> -> vector<2x256xf32>
    %c0_119 = arith.constant 0 : index
    %c0_120 = arith.constant 0 : index
    %350 = vector.load %arg2[%c0_119, %c0_120] : memref<64x256xf32, #tpu.memory_space<vmem>>, vector<64x256xf32>
    %cst_121 = arith.constant dense<0.000000e+00> : vector<2x256xf32>
    %351 = tpu.matmul %304, %350, %cst_121 {dimension_numbers = #tpu.dot_dimension_numbers<[1], [0], [0], [1], [0, 0, 1, 1], [], []>} : vector<2x64xf32>, vector<64x256xf32>, vector<2x256xf32> -> vector<2x256xf32>
    %352 = arith.addf %349, %351 : vector<2x256xf32>
    %353 = arith.negf %352 : vector<2x256xf32>
    %354 = math.exp %353 : vector<2x256xf32>
    %cst_122 = arith.constant 1.000000e+00 : f32
    %355 = vector.broadcast %cst_122 : f32 to vector<2x256xf32>
    %356 = arith.addf %355, %354 : vector<2x256xf32>
    %357 = arith.divf %355, %356 : vector<2x256xf32>
    %358 = vector.extract_strided_slice %357 {offsets = [0, 0], sizes = [2, 64], strides = [1, 1]} : vector<2x256xf32> to vector<2x64xf32>
    %359 = vector.extract_strided_slice %357 {offsets = [0, 64], sizes = [2, 64], strides = [1, 1]} : vector<2x256xf32> to vector<2x64xf32>
    %360 = vector.extract_strided_slice %357 {offsets = [0, 128], sizes = [2, 64], strides = [1, 1]} : vector<2x256xf32> to vector<2x64xf32>
    %361 = vector.extract_strided_slice %352 {offsets = [0, 192], sizes = [2, 64], strides = [1, 1]} : vector<2x256xf32> to vector<2x64xf32>
    %362 = math.tanh %361 : vector<2x64xf32>
    %363 = arith.mulf %358, %302 : vector<2x64xf32>
    %364 = arith.mulf %359, %362 : vector<2x64xf32>
    %365 = arith.addf %363, %364 : vector<2x64xf32>
    %366 = math.tanh %365 : vector<2x64xf32>
    %367 = arith.mulf %360, %366 : vector<2x64xf32>
    %c0_123 = arith.constant 0 : index
    %c0_124 = arith.constant 0 : index
    %368 = vector.load %arg4[%c0_123, %c0_124] : memref<64x256xf32, #tpu.memory_space<vmem>>, vector<64x256xf32>
    %cst_125 = arith.constant dense<0.000000e+00> : vector<2x256xf32>
    %369 = tpu.matmul %304, %368, %cst_125 {dimension_numbers = #tpu.dot_dimension_numbers<[1], [0], [0], [1], [0, 0, 1, 1], [], []>} : vector<2x64xf32>, vector<64x256xf32>, vector<2x256xf32> -> vector<2x256xf32>
    %c0_126 = arith.constant 0 : index
    %c0_127 = arith.constant 0 : index
    %370 = vector.load %arg5[%c0_126, %c0_127] : memref<64x256xf32, #tpu.memory_space<vmem>>, vector<64x256xf32>
    %cst_128 = arith.constant dense<0.000000e+00> : vector<2x256xf32>
    %371 = tpu.matmul %325, %370, %cst_128 {dimension_numbers = #tpu.dot_dimension_numbers<[1], [0], [0], [1], [0, 0, 1, 1], [], []>} : vector<2x64xf32>, vector<64x256xf32>, vector<2x256xf32> -> vector<2x256xf32>
    %372 = arith.addf %369, %371 : vector<2x256xf32>
    %373 = arith.addf %372, %27 : vector<2x256xf32>
    %374 = arith.negf %373 : vector<2x256xf32>
    %375 = math.exp %374 : vector<2x256xf32>
    %cst_129 = arith.constant 1.000000e+00 : f32
    %376 = vector.broadcast %cst_129 : f32 to vector<2x256xf32>
    %377 = arith.addf %376, %375 : vector<2x256xf32>
    %378 = arith.divf %376, %377 : vector<2x256xf32>
    %379 = vector.extract_strided_slice %378 {offsets = [0, 0], sizes = [2, 64], strides = [1, 1]} : vector<2x256xf32> to vector<2x64xf32>
    %380 = vector.extract_strided_slice %378 {offsets = [0, 64], sizes = [2, 64], strides = [1, 1]} : vector<2x256xf32> to vector<2x64xf32>
    %381 = vector.extract_strided_slice %378 {offsets = [0, 128], sizes = [2, 64], strides = [1, 1]} : vector<2x256xf32> to vector<2x64xf32>
    %382 = vector.extract_strided_slice %373 {offsets = [0, 192], sizes = [2, 64], strides = [1, 1]} : vector<2x256xf32> to vector<2x64xf32>
    %383 = math.tanh %382 : vector<2x64xf32>
    %384 = arith.mulf %379, %323 : vector<2x64xf32>
    %385 = arith.mulf %380, %383 : vector<2x64xf32>
    %386 = arith.addf %384, %385 : vector<2x64xf32>
    %387 = math.tanh %386 : vector<2x64xf32>
    %388 = arith.mulf %381, %387 : vector<2x64xf32>
    %c0_130 = arith.constant 0 : index
    %c0_131 = arith.constant 0 : index
    %389 = vector.load %arg7[%c0_130, %c0_131] : memref<64x256xf32, #tpu.memory_space<vmem>>, vector<64x256xf32>
    %cst_132 = arith.constant dense<0.000000e+00> : vector<2x256xf32>
    %390 = tpu.matmul %325, %389, %cst_132 {dimension_numbers = #tpu.dot_dimension_numbers<[1], [0], [0], [1], [0, 0, 1, 1], [], []>} : vector<2x64xf32>, vector<64x256xf32>, vector<2x256xf32> -> vector<2x256xf32>
    %c0_133 = arith.constant 0 : index
    %c0_134 = arith.constant 0 : index
    %391 = vector.load %arg8[%c0_133, %c0_134] : memref<64x256xf32, #tpu.memory_space<vmem>>, vector<64x256xf32>
    %cst_135 = arith.constant dense<0.000000e+00> : vector<2x256xf32>
    %392 = tpu.matmul %346, %391, %cst_135 {dimension_numbers = #tpu.dot_dimension_numbers<[1], [0], [0], [1], [0, 0, 1, 1], [], []>} : vector<2x64xf32>, vector<64x256xf32>, vector<2x256xf32> -> vector<2x256xf32>
    %393 = arith.addf %390, %392 : vector<2x256xf32>
    %394 = arith.addf %393, %30 : vector<2x256xf32>
    %395 = arith.negf %394 : vector<2x256xf32>
    %396 = math.exp %395 : vector<2x256xf32>
    %cst_136 = arith.constant 1.000000e+00 : f32
    %397 = vector.broadcast %cst_136 : f32 to vector<2x256xf32>
    %398 = arith.addf %397, %396 : vector<2x256xf32>
    %399 = arith.divf %397, %398 : vector<2x256xf32>
    %400 = vector.extract_strided_slice %399 {offsets = [0, 0], sizes = [2, 64], strides = [1, 1]} : vector<2x256xf32> to vector<2x64xf32>
    %401 = vector.extract_strided_slice %399 {offsets = [0, 64], sizes = [2, 64], strides = [1, 1]} : vector<2x256xf32> to vector<2x64xf32>
    %402 = vector.extract_strided_slice %399 {offsets = [0, 128], sizes = [2, 64], strides = [1, 1]} : vector<2x256xf32> to vector<2x64xf32>
    %403 = vector.extract_strided_slice %394 {offsets = [0, 192], sizes = [2, 64], strides = [1, 1]} : vector<2x256xf32> to vector<2x64xf32>
    %404 = math.tanh %403 : vector<2x64xf32>
    %405 = arith.mulf %400, %344 : vector<2x64xf32>
    %406 = arith.mulf %401, %404 : vector<2x64xf32>
    %407 = arith.addf %405, %406 : vector<2x64xf32>
    %408 = math.tanh %407 : vector<2x64xf32>
    %409 = arith.mulf %402, %408 : vector<2x64xf32>
    %c7 = arith.constant 7 : index
    %c0_137 = arith.constant 0 : index
    %410 = vector.load %arg13[%c7, %c0_137] : memref<16x256xf32, #tpu.memory_space<vmem>>, vector<1x256xf32>
    %c15 = arith.constant 15 : index
    %c0_138 = arith.constant 0 : index
    %411 = vector.load %arg13[%c15, %c0_138] : memref<16x256xf32, #tpu.memory_space<vmem>>, vector<1x256xf32>
    %412 = tpu.concatenate %410, %411 in 0 : vector<1x256xf32>, vector<1x256xf32> -> vector<2x256xf32>
    %c0_139 = arith.constant 0 : index
    %c0_140 = arith.constant 0 : index
    %413 = vector.load %arg2[%c0_139, %c0_140] : memref<64x256xf32, #tpu.memory_space<vmem>>, vector<64x256xf32>
    %cst_141 = arith.constant dense<0.000000e+00> : vector<2x256xf32>
    %414 = tpu.matmul %367, %413, %cst_141 {dimension_numbers = #tpu.dot_dimension_numbers<[1], [0], [0], [1], [0, 0, 1, 1], [], []>} : vector<2x64xf32>, vector<64x256xf32>, vector<2x256xf32> -> vector<2x256xf32>
    %415 = arith.addf %412, %414 : vector<2x256xf32>
    %416 = arith.negf %415 : vector<2x256xf32>
    %417 = math.exp %416 : vector<2x256xf32>
    %cst_142 = arith.constant 1.000000e+00 : f32
    %418 = vector.broadcast %cst_142 : f32 to vector<2x256xf32>
    %419 = arith.addf %418, %417 : vector<2x256xf32>
    %420 = arith.divf %418, %419 : vector<2x256xf32>
    %421 = vector.extract_strided_slice %420 {offsets = [0, 0], sizes = [2, 64], strides = [1, 1]} : vector<2x256xf32> to vector<2x64xf32>
    %422 = vector.extract_strided_slice %420 {offsets = [0, 64], sizes = [2, 64], strides = [1, 1]} : vector<2x256xf32> to vector<2x64xf32>
    %423 = vector.extract_strided_slice %420 {offsets = [0, 128], sizes = [2, 64], strides = [1, 1]} : vector<2x256xf32> to vector<2x64xf32>
    %424 = vector.extract_strided_slice %415 {offsets = [0, 192], sizes = [2, 64], strides = [1, 1]} : vector<2x256xf32> to vector<2x64xf32>
    %425 = math.tanh %424 : vector<2x64xf32>
    %426 = arith.mulf %421, %365 : vector<2x64xf32>
    %427 = arith.mulf %422, %425 : vector<2x64xf32>
    %428 = arith.addf %426, %427 : vector<2x64xf32>
    %429 = math.tanh %428 : vector<2x64xf32>
    %430 = arith.mulf %423, %429 : vector<2x64xf32>
    %c0_143 = arith.constant 0 : index
    %c0_144 = arith.constant 0 : index
    %431 = vector.load %arg4[%c0_143, %c0_144] : memref<64x256xf32, #tpu.memory_space<vmem>>, vector<64x256xf32>
    %cst_145 = arith.constant dense<0.000000e+00> : vector<2x256xf32>
    %432 = tpu.matmul %367, %431, %cst_145 {dimension_numbers = #tpu.dot_dimension_numbers<[1], [0], [0], [1], [0, 0, 1, 1], [], []>} : vector<2x64xf32>, vector<64x256xf32>, vector<2x256xf32> -> vector<2x256xf32>
    %c0_146 = arith.constant 0 : index
    %c0_147 = arith.constant 0 : index
    %433 = vector.load %arg5[%c0_146, %c0_147] : memref<64x256xf32, #tpu.memory_space<vmem>>, vector<64x256xf32>
    %cst_148 = arith.constant dense<0.000000e+00> : vector<2x256xf32>
    %434 = tpu.matmul %388, %433, %cst_148 {dimension_numbers = #tpu.dot_dimension_numbers<[1], [0], [0], [1], [0, 0, 1, 1], [], []>} : vector<2x64xf32>, vector<64x256xf32>, vector<2x256xf32> -> vector<2x256xf32>
    %435 = arith.addf %432, %434 : vector<2x256xf32>
    %436 = arith.addf %435, %27 : vector<2x256xf32>
    %437 = arith.negf %436 : vector<2x256xf32>
    %438 = math.exp %437 : vector<2x256xf32>
    %cst_149 = arith.constant 1.000000e+00 : f32
    %439 = vector.broadcast %cst_149 : f32 to vector<2x256xf32>
    %440 = arith.addf %439, %438 : vector<2x256xf32>
    %441 = arith.divf %439, %440 : vector<2x256xf32>
    %442 = vector.extract_strided_slice %441 {offsets = [0, 0], sizes = [2, 64], strides = [1, 1]} : vector<2x256xf32> to vector<2x64xf32>
    %443 = vector.extract_strided_slice %441 {offsets = [0, 64], sizes = [2, 64], strides = [1, 1]} : vector<2x256xf32> to vector<2x64xf32>
    %444 = vector.extract_strided_slice %441 {offsets = [0, 128], sizes = [2, 64], strides = [1, 1]} : vector<2x256xf32> to vector<2x64xf32>
    %445 = vector.extract_strided_slice %436 {offsets = [0, 192], sizes = [2, 64], strides = [1, 1]} : vector<2x256xf32> to vector<2x64xf32>
    %446 = math.tanh %445 : vector<2x64xf32>
    %447 = arith.mulf %442, %386 : vector<2x64xf32>
    %448 = arith.mulf %443, %446 : vector<2x64xf32>
    %449 = arith.addf %447, %448 : vector<2x64xf32>
    %450 = math.tanh %449 : vector<2x64xf32>
    %451 = arith.mulf %444, %450 : vector<2x64xf32>
    %c0_150 = arith.constant 0 : index
    %c0_151 = arith.constant 0 : index
    %452 = vector.load %arg7[%c0_150, %c0_151] : memref<64x256xf32, #tpu.memory_space<vmem>>, vector<64x256xf32>
    %cst_152 = arith.constant dense<0.000000e+00> : vector<2x256xf32>
    %453 = tpu.matmul %388, %452, %cst_152 {dimension_numbers = #tpu.dot_dimension_numbers<[1], [0], [0], [1], [0, 0, 1, 1], [], []>} : vector<2x64xf32>, vector<64x256xf32>, vector<2x256xf32> -> vector<2x256xf32>
    %c0_153 = arith.constant 0 : index
    %c0_154 = arith.constant 0 : index
    %454 = vector.load %arg8[%c0_153, %c0_154] : memref<64x256xf32, #tpu.memory_space<vmem>>, vector<64x256xf32>
    %cst_155 = arith.constant dense<0.000000e+00> : vector<2x256xf32>
    %455 = tpu.matmul %409, %454, %cst_155 {dimension_numbers = #tpu.dot_dimension_numbers<[1], [0], [0], [1], [0, 0, 1, 1], [], []>} : vector<2x64xf32>, vector<64x256xf32>, vector<2x256xf32> -> vector<2x256xf32>
    %456 = arith.addf %453, %455 : vector<2x256xf32>
    %457 = arith.addf %456, %30 : vector<2x256xf32>
    %458 = arith.negf %457 : vector<2x256xf32>
    %459 = math.exp %458 : vector<2x256xf32>
    %cst_156 = arith.constant 1.000000e+00 : f32
    %460 = vector.broadcast %cst_156 : f32 to vector<2x256xf32>
    %461 = arith.addf %460, %459 : vector<2x256xf32>
    %462 = arith.divf %460, %461 : vector<2x256xf32>
    %463 = vector.extract_strided_slice %462 {offsets = [0, 0], sizes = [2, 64], strides = [1, 1]} : vector<2x256xf32> to vector<2x64xf32>
    %464 = vector.extract_strided_slice %462 {offsets = [0, 64], sizes = [2, 64], strides = [1, 1]} : vector<2x256xf32> to vector<2x64xf32>
    %465 = vector.extract_strided_slice %462 {offsets = [0, 128], sizes = [2, 64], strides = [1, 1]} : vector<2x256xf32> to vector<2x64xf32>
    %466 = vector.extract_strided_slice %457 {offsets = [0, 192], sizes = [2, 64], strides = [1, 1]} : vector<2x256xf32> to vector<2x64xf32>
    %467 = math.tanh %466 : vector<2x64xf32>
    %468 = arith.mulf %463, %407 : vector<2x64xf32>
    %469 = arith.mulf %464, %467 : vector<2x64xf32>
    %470 = arith.addf %468, %469 : vector<2x64xf32>
    %471 = math.tanh %470 : vector<2x64xf32>
    %472 = arith.mulf %465, %471 : vector<2x64xf32>
    %c0_157 = arith.constant 0 : index
    %c0_158 = arith.constant 0 : index
    %473 = vector.load %arg4[%c0_157, %c0_158] : memref<64x256xf32, #tpu.memory_space<vmem>>, vector<64x256xf32>
    %cst_159 = arith.constant dense<0.000000e+00> : vector<2x256xf32>
    %474 = tpu.matmul %430, %473, %cst_159 {dimension_numbers = #tpu.dot_dimension_numbers<[1], [0], [0], [1], [0, 0, 1, 1], [], []>} : vector<2x64xf32>, vector<64x256xf32>, vector<2x256xf32> -> vector<2x256xf32>
    %c0_160 = arith.constant 0 : index
    %c0_161 = arith.constant 0 : index
    %475 = vector.load %arg5[%c0_160, %c0_161] : memref<64x256xf32, #tpu.memory_space<vmem>>, vector<64x256xf32>
    %cst_162 = arith.constant dense<0.000000e+00> : vector<2x256xf32>
    %476 = tpu.matmul %451, %475, %cst_162 {dimension_numbers = #tpu.dot_dimension_numbers<[1], [0], [0], [1], [0, 0, 1, 1], [], []>} : vector<2x64xf32>, vector<64x256xf32>, vector<2x256xf32> -> vector<2x256xf32>
    %477 = arith.addf %474, %476 : vector<2x256xf32>
    %478 = arith.addf %477, %27 : vector<2x256xf32>
    %479 = arith.negf %478 : vector<2x256xf32>
    %480 = math.exp %479 : vector<2x256xf32>
    %cst_163 = arith.constant 1.000000e+00 : f32
    %481 = vector.broadcast %cst_163 : f32 to vector<2x256xf32>
    %482 = arith.addf %481, %480 : vector<2x256xf32>
    %483 = arith.divf %481, %482 : vector<2x256xf32>
    %484 = vector.extract_strided_slice %483 {offsets = [0, 0], sizes = [2, 64], strides = [1, 1]} : vector<2x256xf32> to vector<2x64xf32>
    %485 = vector.extract_strided_slice %483 {offsets = [0, 64], sizes = [2, 64], strides = [1, 1]} : vector<2x256xf32> to vector<2x64xf32>
    %486 = vector.extract_strided_slice %483 {offsets = [0, 128], sizes = [2, 64], strides = [1, 1]} : vector<2x256xf32> to vector<2x64xf32>
    %487 = vector.extract_strided_slice %478 {offsets = [0, 192], sizes = [2, 64], strides = [1, 1]} : vector<2x256xf32> to vector<2x64xf32>
    %488 = math.tanh %487 : vector<2x64xf32>
    %489 = arith.mulf %484, %449 : vector<2x64xf32>
    %490 = arith.mulf %485, %488 : vector<2x64xf32>
    %491 = arith.addf %489, %490 : vector<2x64xf32>
    %492 = math.tanh %491 : vector<2x64xf32>
    %493 = arith.mulf %486, %492 : vector<2x64xf32>
    %c0_164 = arith.constant 0 : index
    %c0_165 = arith.constant 0 : index
    %494 = vector.load %arg7[%c0_164, %c0_165] : memref<64x256xf32, #tpu.memory_space<vmem>>, vector<64x256xf32>
    %cst_166 = arith.constant dense<0.000000e+00> : vector<2x256xf32>
    %495 = tpu.matmul %451, %494, %cst_166 {dimension_numbers = #tpu.dot_dimension_numbers<[1], [0], [0], [1], [0, 0, 1, 1], [], []>} : vector<2x64xf32>, vector<64x256xf32>, vector<2x256xf32> -> vector<2x256xf32>
    %c0_167 = arith.constant 0 : index
    %c0_168 = arith.constant 0 : index
    %496 = vector.load %arg8[%c0_167, %c0_168] : memref<64x256xf32, #tpu.memory_space<vmem>>, vector<64x256xf32>
    %cst_169 = arith.constant dense<0.000000e+00> : vector<2x256xf32>
    %497 = tpu.matmul %472, %496, %cst_169 {dimension_numbers = #tpu.dot_dimension_numbers<[1], [0], [0], [1], [0, 0, 1, 1], [], []>} : vector<2x64xf32>, vector<64x256xf32>, vector<2x256xf32> -> vector<2x256xf32>
    %498 = arith.addf %495, %497 : vector<2x256xf32>
    %499 = arith.addf %498, %30 : vector<2x256xf32>
    %500 = arith.negf %499 : vector<2x256xf32>
    %501 = math.exp %500 : vector<2x256xf32>
    %cst_170 = arith.constant 1.000000e+00 : f32
    %502 = vector.broadcast %cst_170 : f32 to vector<2x256xf32>
    %503 = arith.addf %502, %501 : vector<2x256xf32>
    %504 = arith.divf %502, %503 : vector<2x256xf32>
    %505 = vector.extract_strided_slice %504 {offsets = [0, 0], sizes = [2, 64], strides = [1, 1]} : vector<2x256xf32> to vector<2x64xf32>
    %506 = vector.extract_strided_slice %504 {offsets = [0, 64], sizes = [2, 64], strides = [1, 1]} : vector<2x256xf32> to vector<2x64xf32>
    %507 = vector.extract_strided_slice %504 {offsets = [0, 128], sizes = [2, 64], strides = [1, 1]} : vector<2x256xf32> to vector<2x64xf32>
    %508 = vector.extract_strided_slice %499 {offsets = [0, 192], sizes = [2, 64], strides = [1, 1]} : vector<2x256xf32> to vector<2x64xf32>
    %509 = math.tanh %508 : vector<2x64xf32>
    %510 = arith.mulf %505, %470 : vector<2x64xf32>
    %511 = arith.mulf %506, %509 : vector<2x64xf32>
    %512 = arith.addf %510, %511 : vector<2x64xf32>
    %513 = math.tanh %512 : vector<2x64xf32>
    %514 = arith.mulf %507, %513 : vector<2x64xf32>
    %c0_171 = arith.constant 0 : index
    %c0_172 = arith.constant 0 : index
    %515 = vector.load %arg7[%c0_171, %c0_172] : memref<64x256xf32, #tpu.memory_space<vmem>>, vector<64x256xf32>
    %cst_173 = arith.constant dense<0.000000e+00> : vector<2x256xf32>
    %516 = tpu.matmul %493, %515, %cst_173 {dimension_numbers = #tpu.dot_dimension_numbers<[1], [0], [0], [1], [0, 0, 1, 1], [], []>} : vector<2x64xf32>, vector<64x256xf32>, vector<2x256xf32> -> vector<2x256xf32>
    %c0_174 = arith.constant 0 : index
    %c0_175 = arith.constant 0 : index
    %517 = vector.load %arg8[%c0_174, %c0_175] : memref<64x256xf32, #tpu.memory_space<vmem>>, vector<64x256xf32>
    %cst_176 = arith.constant dense<0.000000e+00> : vector<2x256xf32>
    %518 = tpu.matmul %514, %517, %cst_176 {dimension_numbers = #tpu.dot_dimension_numbers<[1], [0], [0], [1], [0, 0, 1, 1], [], []>} : vector<2x64xf32>, vector<64x256xf32>, vector<2x256xf32> -> vector<2x256xf32>
    %519 = arith.addf %516, %518 : vector<2x256xf32>
    %520 = arith.addf %519, %30 : vector<2x256xf32>
    %521 = arith.negf %520 : vector<2x256xf32>
    %522 = math.exp %521 : vector<2x256xf32>
    %cst_177 = arith.constant 1.000000e+00 : f32
    %523 = vector.broadcast %cst_177 : f32 to vector<2x256xf32>
    %524 = arith.addf %523, %522 : vector<2x256xf32>
    %525 = arith.divf %523, %524 : vector<2x256xf32>
    %526 = vector.extract_strided_slice %525 {offsets = [0, 0], sizes = [2, 64], strides = [1, 1]} : vector<2x256xf32> to vector<2x64xf32>
    %527 = vector.extract_strided_slice %525 {offsets = [0, 64], sizes = [2, 64], strides = [1, 1]} : vector<2x256xf32> to vector<2x64xf32>
    %528 = vector.extract_strided_slice %525 {offsets = [0, 128], sizes = [2, 64], strides = [1, 1]} : vector<2x256xf32> to vector<2x64xf32>
    %529 = vector.extract_strided_slice %520 {offsets = [0, 192], sizes = [2, 64], strides = [1, 1]} : vector<2x256xf32> to vector<2x64xf32>
    %530 = math.tanh %529 : vector<2x64xf32>
    %531 = arith.mulf %526, %512 : vector<2x64xf32>
    %532 = arith.mulf %527, %530 : vector<2x64xf32>
    %533 = arith.addf %531, %532 : vector<2x64xf32>
    %534 = math.tanh %533 : vector<2x64xf32>
    %535 = arith.mulf %528, %534 : vector<2x64xf32>
    %c0_178 = arith.constant 0 : index
    %c0_179 = arith.constant 0 : index
    %536 = vector.load %arg10[%c0_178, %c0_179] : memref<64x8xf32, #tpu.memory_space<vmem>>, vector<64x8xf32>
    %cst_180 = arith.constant dense<0.000000e+00> : vector<2x8xf32>
    %537 = tpu.matmul %535, %536, %cst_180 {dimension_numbers = #tpu.dot_dimension_numbers<[1], [0], [0], [1], [0, 0, 1, 1], [], []>} : vector<2x64xf32>, vector<64x8xf32>, vector<2x8xf32> -> vector<2x8xf32>
    %c0_181 = arith.constant 0 : index
    %c0_182 = arith.constant 0 : index
    %538 = vector.load %arg11[%c0_181, %c0_182] : memref<1x8xf32, #tpu.memory_space<vmem>>, vector<1x8xf32>
    %539 = vector.broadcast %538 : vector<1x8xf32> to vector<2x8xf32>
    %540 = arith.addf %537, %539 : vector<2x8xf32>
    %c0_183 = arith.constant 0 : index
    %c0_184 = arith.constant 0 : index
    %541 = vector.load %arg12[%c0_183, %c0_184] : memref<2x8xf32, #tpu.memory_space<vmem>>, vector<2x8xf32>
    tpu.vector_store %arg12[%c0_183, %c0_184], %540 {strides = array<i32>} : memref<2x8xf32, #tpu.memory_space<vmem>>, vector<2x8xf32>,
    return
  }
}

</mosaic_0001>

<bundles_post_ra>
// kernel: dual_lstm_forward.1
= control target key start
LH: loop header
LB: loop body
LE: loop exit
PB: predicated region body
PF: predicated region fallthrough
CT: control target
= control target key end

     0   :  { %17 = vsyncpa [#allocation4], 0  ;;  %s6288_s0 = inlined_call_operand.hbm [shape: f32[16,30], index: 0, kind: input, shape index: {}]   ;;  %s6289_s1 = inlined_call_operand.vmem [shape: f32[30,256], index: 1, kind: input, shape index: {}]   ;;  %s6290_s2 = inlined_call_operand.hbm [shape: f32[64,256], index: 2, kind: input, shape index: {}]   ;;  %s6291_s3 = inlined_call_operand.vmem [shape: f32[1,256], index: 3, kind: input, shape index: {}]   ;;  %s6292_s4 = inlined_call_operand.hbm [shape: f32[64,256], index: 4, kind: input, shape index: {}]   ;;  %s6293_s5 = inlined_call_operand.hbm [shape: f32[64,256], index: 5, kind: input, shape index: {}]   ;;  %s6294_s6 = inlined_call_operand.vmem [shape: f32[1,256], index: 6, kind: input, shape index: {}]   ;;  %s6295_s7 = inlined_call_operand.hbm [shape: f32[64,256], index: 7, kind: input, shape index: {}]   ;;  %s6296_s8 = inlined_call_operand.hbm [shape: f32[64,256], index: 8, kind: input, shape index: {}]   ;;  %s6297_s9 = inlined_call_operand.vmem [shape: f32[1,256], index: 9, kind: input, shape index: {}]   ;;  %s6298_s10 = inlined_call_operand.vmem [shape: f32[64,8], index: 10, kind: input, shape index: {}]   ;;  %s6299_s11 = inlined_call_operand.vmem [shape: f32[1,8], index: 11, kind: input, shape index: {}]   ;;  %s6300_s12 = inlined_call_operand.hbm [shape: f32[2,8], index: 12, kind: output, shape index: {}]  }
   0x1   :  { %18 = vsyncpa [#allocation7], 0 }
   0x2   :  { %19 = vsyncpa [#allocation10], 0 }
   0x3   :  { %20 = vsyncpa [#allocation13], 0 }
   0x4   :  { %21 = vsyncpa [#allocation5], 0  ;;  %s4912_s21 = smov [#allocation6]  }
   0x5   :  { %s41_s22 = sshll.u32 %s4912_s21, 4  ;;  %s42_s22 = int_to_ptr.vmem [resolvable:$true] %s41_s22 }
   0x6   :  { %s4770_s23 = scalar_lea.vmem %s42_s22, 2048  ;;  %p4775_p1 = scmp.lt.s32.totalorder %s42_s22, %s42_s22 }
   0x7   :  { %p4771_p0 = scmp.ne.s32.totalorder %s42_s22, %s4770_s23  ;;  %p4776_p2 = scmp.lt.s32.totalorder %s4770_s23, %s4770_s23 }
   0x9   :  { %p4777_p3 = por %p4776_p2, %p4775_p1 }
   0xb   :  { %p4778_p4 = pnand %p4777_p3, %p4771_p0 }
   0xd   :  { %4781 = shalt.err (!%p4778_p4)
}
   0xe   :  { %s4913_s24 = smov 256   ;;  %s4914_s25 = smov 16  }
   0xf   :  { %47 = dma.hbm_to_vmem [thread:$0]  %s6290_s2, 2048, %s42_s22, [#allocation7], %s4913_s24, %s4913_s24, %s4914_s25  }
  0x10   :  { %s4915_s28 = smov [#allocation9]   ;;  %s4916_s30 = smov [#allocation3]  }
  0x11   :  { %s67_s29 = sshll.u32 %s4915_s28, 4  ;;  %s27_s13 = sshll.u32 %s4916_s30, 4  ;;  %s68_s29 = int_to_ptr.vmem [resolvable:$true] %s67_s29  ;;  %s28_s13 = int_to_ptr.vmem [resolvable:$true] %s27_s13 }
  0x12   :  { %s4790_s14 = scalar_lea.vmem %s68_s29, 2048  ;;  %p4795_p6 = scmp.lt.s32.totalorder %s68_s29, %s68_s29 }
  0x13   :  { %p4791_p5 = scmp.ne.s32.totalorder %s68_s29, %s4790_s14  ;;  %p4796_p7 = scmp.lt.s32.totalorder %s4790_s14, %s4790_s14 }
  0x15   :  { %p4797_p8 = por %p4796_p7, %p4795_p6 }
  0x17   :  { %p4798_p9 = pnand %p4797_p8, %p4791_p5 }
  0x19   :  { %4801 = shalt.err (!%p4798_p9)
}
  0x1a   :  { %73 = dma.hbm_to_vmem [thread:$0]  %s6293_s5, 2048, %s68_s29, [#allocation10], %s4913_s24, %s4913_s24, %s4914_s25  }
  0x1b   :  { %s4810_s2 = scalar_lea.vmem %s28_s13, 256  ;;  %p4815_p11 = scmp.lt.s32.totalorder %s28_s13, %s28_s13 }
  0x1c   :  { %p4811_p10 = scmp.ne.s32.totalorder %s28_s13, %s4810_s2  ;;  %p4816_p12 = scmp.lt.s32.totalorder %s4810_s2, %s4810_s2 }
  0x1e   :  { %p4817_p13 = por %p4816_p12, %p4815_p11 }
  0x20   :  { %p4818_p0 = pnand %p4817_p13, %p4811_p10 }
  0x22   :  { %4821 = shalt.err (!%p4818_p0)
}
  0x23   :  { %s4917_s17 = smov 128   ;;  %s4918_s18 = smov 8  }
  0x24   :  { %33 = dma.hbm_to_vmem [thread:$0]  %s6288_s0, 256, %s28_s13, [#allocation4], %s4917_s17, %s4917_s17, %s4918_s18  }
  0x25   :  { %s4919_s21 = smov [#allocation8]   ;;  %s4920_s23 = smov [#allocation11]  }
  0x26   :  { %s55_s22 = sshll.u32 %s4919_s21, 4  ;;  %s81_s26 = sshll.u32 %s4920_s23, 4  ;;  %s56_s22 = int_to_ptr.vmem [resolvable:$true] %s55_s22  ;;  %s82_s26 = int_to_ptr.vmem [resolvable:$true] %s81_s26 }
  0x27   :  { %s4830_s5 = scalar_lea.vmem %s56_s22, 2048  ;;  %p4835_p2 = scmp.lt.s32.totalorder %s56_s22, %s56_s22 }
  0x28   :  { %p4831_p1 = scmp.ne.s32.totalorder %s56_s22, %s4830_s5  ;;  %p4836_p3 = scmp.lt.s32.totalorder %s4830_s5, %s4830_s5 }
  0x2a   :  { %p4837_p4 = por %p4836_p3, %p4835_p2 }
  0x2c   :  { %p4838_p5 = pnand %p4837_p4, %p4831_p1 }
  0x2e   :  { %4841 = shalt.err (!%p4838_p5)
}
  0x2f   :  { %61 = dma.hbm_to_vmem [thread:$0]  %s6292_s4, 2048, %s56_s22, [#allocation7], %s4913_s24, %s4913_s24, %s4914_s25  }
  0x30   :  { %s4850_s0 = scalar_lea.vmem %s82_s26, 2048  ;;  %p4855_p7 = scmp.lt.s32.totalorder %s82_s26, %s82_s26 }
  0x31   :  { %p4851_p6 = scmp.ne.s32.totalorder %s82_s26, %s4850_s0  ;;  %p4856_p8 = scmp.lt.s32.totalorder %s4850_s0, %s4850_s0 }
  0x33   :  { %p4857_p9 = por %p4856_p8, %p4855_p7 }
  0x35   :  { %p4858_p10 = pnand %p4857_p9, %p4851_p6 }
  0x37   :  { %4861 = shalt.err (!%p4858_p10)
}
  0x38   :  { %87 = dma.hbm_to_vmem [thread:$0]  %s6295_s7, 2048, %s82_s26, [#allocation10], %s4913_s24, %s4913_s24, %s4914_s25  }
  0x39   :  { %s4921_s13 = smov [#allocation12]  }
  0x3a   :  { %s93_s14 = sshll.u32 %s4921_s13, 4  ;;  %s94_s14 = int_to_ptr.vmem [resolvable:$true] %s93_s14 }
  0x3b   :  { %s4870_s15 = scalar_lea.vmem %s94_s14, 2048  ;;  %p4875_p12 = scmp.lt.s32.totalorder %s94_s14, %s94_s14 }
  0x3c   :  { %p4871_p11 = scmp.ne.s32.totalorder %s94_s14, %s4870_s15  ;;  %p4876_p13 = scmp.lt.s32.totalorder %s4870_s15, %s4870_s15 }
  0x3e   :  { %p4877_p0 = por %p4876_p13, %p4875_p12 }
  0x40   :  { %p4878_p1 = pnand %p4877_p0, %p4871_p11 }
  0x42   :  { %4881 = shalt.err (!%p4878_p1)
}
  0x43   :  { %99 = dma.hbm_to_vmem [thread:$0]  %s6296_s8, 2048, %s94_s14, [#allocation13], %s4913_s24, %s4913_s24, %s4914_s25  }
  0x44   :  { %4902 = dma.done.wait [#allocation4], 256  }
  0x45   :  { %4903 = vsyncadd [#allocation4], 4294967040 }
  0x46   :  { %4904 = dma.done.wait [#allocation7], 4096  }
  0x47   :  { %4905 = vsyncadd [#allocation7], 4294963200 }
  0x48   :  { %4906 = dma.done.wait [#allocation10], 4096  }
  0x49   :  { %4907 = vsyncadd [#allocation10], 4294963200 }
  0x4a   :  { %4908 = dma.done.wait [#allocation13], 2048  }
  0x4b   :  { %4909 = vsyncadd [#allocation13], 4294965248  ;;  %v6301_v0 = vmov 0.0   ;;  %vm182_vm0 = vcmask 1045504   ;;  %v163_v1 = vld [vmem:[%s6289_s1 + $0x38] sm:$0x3f]  ;;  %v166_v55 = vlaneseq }
  0x4c   :  { %253 = vmatprep.mubr.f32.mxu0 %v6301_v0  ;;  %406 = vmatprep.mubr.f32.mxu1 %v6301_v0  ;;  %v162_v2 = vld [vmem:[%s6289_s1 + $0x30] sm:$0x3f]  ;;  %v161_v3 = vld [vmem:[%s6289_s1 + $0x28] sm:$0xff]  ;;  %vm126_vm1 = vcmask 244736   ;;  %v160_v4 = vld [vmem:[%s6289_s1 + $0x20] sm:$0xff]  ;;  %vm319_vm2 = vcmask 1040384  }
  0x4d   :  { %4195 = vmatprep.subr.msk.mxu0 %vm182_vm0, %v163_v1  ;;  %v159_v5 = vld [vmem:[%s6289_s1 + $0x18] sm:$0xff]  ;;  %v158_v6 = vld [vmem:[%s6289_s1 + $0x10] sm:$0xff]  ;;  %v124_v7 = vld [vmem:[#allocation3] sm:$0xff]  ;;  %v167_v56 = vshrl.u32 %v166_v55, 7  ;;  %vm338_vm3 = vcmask 523264   ;;  %vm4924_vm4 = vmmov 0  }
  0x4e   :  { %4196 = vmatpush1.msk.msra.mxu0 %vm182_vm0, %v162_v2  ;;  %v125_v8 = vld [vmem:[#allocation3 + $0x8] sm:$0xff]  ;;  %v127_v9 = vsel %vm126_vm1, %v124_v7, 0.0  ;;  %v5047_v11 = vld [vmem:[#allocation6 + $0x70] sm:$0xff]  ;;  %v5054_v14 = vld [vmem:[#allocation6 + $0x68] sm:$0xff]  ;;  %s4925_s26 = smov [#allocation14]   ;;  %vm4175_vm5 = vcmask 58368  }
  0x4f   :  { %215 = vmatprep.subr.mxu0 %v161_v3  ;;  %v5045_v10 = vld [vmem:[#allocation6 + $0x78] sm:$0xff]  ;;  %v128_v13 = vsel %vm126_vm1, %v125_v8, 0.0  ;;  %v5056_v15 = vld [vmem:[#allocation6 + $0x60] sm:$0xff]  ;;  %v156_v16 = vld [vmem:[%s6289_s1] sm:$0xff]  ;;  %v5124_v57 = vsub.s32 0, %v167_v56  ;;  %v5129_v59 = vsub.s32 1, %v167_v56 }
  0x50   :  { %216 = vmatpush1.msra.mxu0 %v160_v4  ;;  %v157_v12 = vld [vmem:[%s6289_s1 + $0x8] sm:$0xff]  ;;  %358 = vmatprep.subr.mxu1 %v5045_v10  ;;  %v129_v17 = vadd.f32 %v128_v13, %v127_v9  ;;  %v5065_v19 = vld [vmem:[#allocation6 + $0x50] sm:$0xff]  ;;  %v5068_v21 = vld [vmem:[#allocation6 + $0x48] sm:$0xff]  ;;  %s4183_s5 = sshll.u32 %s4925_s26, 4  ;;  %s4184_s5 = int_to_ptr.vmem [resolvable:$true] %s4183_s5 }
  0x51   :  { %217 = vmatprep.subr.mxu0 %v159_v5  ;;  %359 = vmatpush1.msra.mxu1 %v5047_v11  ;;  %v5062_v18 = vld [vmem:[#allocation6 + $0x58] sm:$0xff]  ;;  %v5071_v22 = vld [vmem:[#allocation6 + $0x40] sm:$0xff]  ;;  %v5078_v25 = vld [vmem:[#allocation6 + $0x30] sm:$0xff]  ;;  %6464 = vst [vmem:[#allocation21_spill] sm:$0xff] %v5124_v57  ;;  %s4882_s27 = scalar_lea.vmem %s4184_s5, 32  ;;  %p4887_p3 = scmp.lt.s32.totalorder %s4184_s5, %s4184_s5 }
  0x52   :  { %218 = vmatpush1.msra.mxu0 %v158_v6  ;;  %360 = vmatprep.subr.mxu1 %v5054_v14  ;;  %v130_v20 = vrot.slane %v129_v17, 4  ;;  %v5074_v24 = vld [vmem:[#allocation6 + $0x38] sm:$0xff]  ;;  %v5081_v27 = vld [vmem:[#allocation6 + $0x28] sm:$0xff]  ;;  %v5084_v28 = vld [vmem:[#allocation6 + $0x20] sm:$0xff]  ;;  %6465 = vst [vmem:[#allocation22_spill] sm:$0xff] %v5129_v59  ;;  %p4883_p2 = scmp.ne.s32.totalorder %s4184_s5, %s4882_s27  ;;  %p4888_p4 = scmp.lt.s32.totalorder %s4882_s27, %s4882_s27 }
  0x53   :  { %219 = vmatprep.subr.mxu0 %v157_v12  ;;  %361 = vmatpush1.msra.mxu1 %v5056_v15  ;;  %v5087_v30 = vld [vmem:[#allocation6 + $0x18] sm:$0xff]  ;;  %v5090_v31 = vld [vmem:[#allocation6 + $0x10] sm:$0xff]  ;;  %v5093_v33 = vld [vmem:[#allocation6 + $0x8] sm:$0xff] }
  0x54   :  { %220 = vmatpush1.msra.mxu0 %v156_v16  ;;  %362 = vmatprep.subr.mxu1 %v5062_v18  ;;  %v131_v23 = vadd.f32 %v130_v20, %v129_v17  ;;  %v5096_v34 = vld [vmem:[#allocation6] sm:$0xff]  ;;  %v164_v58 = vld [vmem:[%s6291_s3] sm:$0x3]  ;;  %s4923_s3 = smov 64   ;;  %v5185_v56 = vld [vmem:[#allocation9 + $0x8] sm:$0xff]  ;;  %p4889_p5 = por %p4888_p4, %p4887_p3 }
  0x55   :  { %363 = vmatpush1.msra.mxu1 %v5065_v19  ;;  %484 = vmatprep.subr.mxu0 %v5045_v10  ;;  %6463 = vst [vmem:[#allocation20_spill] sm:$0xff] %v5096_v34  ;;  %v169_v60 = vrot.slane %v164_v58, %v5124_v57  ;;  %v173_v61 = vrot.slane %v164_v58, %v5129_v59  ;;  %v5182_v55 = vld [vmem:[#allocation9 + $0x10] sm:$0xff]  ;;  %6470 = vst [vmem:[#allocation27_spill] sm:$0xff] %v5185_v56  ;;  %v5188_v58 = vld [vmem:[#allocation9] sm:$0xff] }
  0x56   :  { %364 = vmatprep.subr.mxu1 %v5068_v21  ;;  %v132_v26 = vrot.slane %v131_v23, 2  ;;  %6469 = vst [vmem:[#allocation26_spill] sm:$0xff] %v5182_v55  ;;  %6471 = vst [vmem:[#allocation28_spill] sm:$0xff] %v5188_v58  ;;  %p4890_p6 = pnand %p4889_p5, %p4883_p2 }
  0x57   :  { %365 = vmatpush1.msra.mxu1 %v5071_v22 }
  0x58   :  { %366 = vmatprep.subr.mxu1 %v5074_v24  ;;  %v133_v29 = vadd.f32 %v132_v26, %v131_v23 }
  0x59   :  { %367 = vmatpush1.msra.mxu1 %v5078_v25 }
  0x5a   :  { %368 = vmatprep.subr.mxu1 %v5081_v27  ;;  %v134_v32 = vrot.slane %v133_v29, 1 }
  0x5b   :  { %369 = vmatpush1.msra.mxu1 %v5084_v28 }
  0x5c   :  { %370 = vmatprep.subr.mxu1 %v5087_v30  ;;  %v135_v35 = vadd.f32 %v134_v32, %v133_v29 }
  0x5d   :  { %371 = vmatpush1.msra.mxu1 %v5090_v31 }
  0x5e   :  { %372 = vmatprep.subr.mxu1 %v5093_v33  ;;  %v137_v36 = vmul.f32 0.0625, %v135_v35 }
  0x5f   :  { %373 = vmatpush1.msra.mxu1 %v5096_v34 }
  0x60   :  { %407 = vmatmul.mubr.f32.vlgmr.msra.gmra.mxu1 %v6301_v0  ;;  %v138_v37 = vsub.f32 %v124_v7, %v137_v36  ;;  %v139_v38 = vsub.f32 %v125_v8, %v137_v36 }
  0x61   :  { %659 = vmatprep.mubr.f32.mxu1 %v6301_v0 }
  0x62   :  { %v140_v39 = vmul.f32 %v138_v37, %v138_v37  ;;  %v141_v40 = vmul.f32 %v139_v38, %v139_v38 }
  0x64   :  { %v142_v41 = vsel %vm126_vm1, %v140_v39, 0.0  ;;  %v143_v42 = vsel %vm126_vm1, %v141_v40, 0.0 }
  0x65   :  { %v144_v43 = vadd.f32 %v143_v42, %v142_v41  ;;  %v5140_v41 = vld [vmem:[#allocation9 + $0x78] sm:$0xff]  ;;  %v5143_v42 = vld [vmem:[#allocation9 + $0x70] sm:$0xff] }
  0x66   :  { %611 = vmatprep.subr.mxu1 %v5140_v41 }
  0x67   :  { %v145_v44 = vrot.slane %v144_v43, 4  ;;  %612 = vmatpush1.msra.mxu1 %v5143_v42 }
  0x69   :  { %v146_v45 = vadd.f32 %v145_v44, %v144_v43  ;;  %v5145_v43 = vld [vmem:[#allocation9 + $0x68] sm:$0xff]  ;;  %v5147_v44 = vld [vmem:[#allocation8 + $0x78] sm:$0xff] }
  0x6a   :  { %6466 = vst [vmem:[#allocation23_spill] sm:$0xff] %v5147_v44  ;;  %613 = vmatprep.subr.mxu1 %v5145_v43 }
  0x6b   :  { %v147_v46 = vrot.slane %v146_v45, 2 }
  0x6d   :  { %v148_v47 = vadd.f32 %v147_v46, %v146_v45  ;;  %v5152_v45 = vld [vmem:[#allocation9 + $0x60] sm:$0xff]  ;;  %v5155_v46 = vld [vmem:[#allocation9 + $0x58] sm:$0xff] }
  0x6e   :  { %614 = vmatpush1.msra.mxu1 %v5152_v45 }
  0x6f   :  { %v149_v48 = vrot.slane %v148_v47, 1  ;;  %615 = vmatprep.subr.mxu1 %v5155_v46 }
  0x71   :  { %v150_v49 = vadd.f32 %v149_v48, %v148_v47  ;;  %v5158_v47 = vld [vmem:[#allocation9 + $0x50] sm:$0xff]  ;;  %v5161_v48 = vld [vmem:[#allocation9 + $0x48] sm:$0xff] }
  0x72   :  { %616 = vmatpush1.msra.mxu1 %v5158_v47 }
  0x73   :  { %v151_v50 = vmul.f32 0.0625, %v150_v49  ;;  %617 = vmatprep.subr.mxu1 %v5161_v48  ;;  %v5164_v49 = vld [vmem:[#allocation9 + $0x40] sm:$0xff] }
  0x74   :  { %618 = vmatpush1.msra.mxu1 %v5164_v49 }
  0x75   :  { %v152_v51 = vadd.f32 1e-05, %v151_v50  ;;  %v5167_v50 = vld [vmem:[#allocation9 + $0x38] sm:$0xff] }
  0x76   :  { %619 = vmatprep.subr.mxu1 %v5167_v50 }
  0x77   :  { %4328 = vrsqrt.f32 %v152_v51  ;;  %v5170_v51 = vld [vmem:[#allocation9 + $0x30] sm:$0xff] }
  0x78   :  { %620 = vmatpush1.msra.mxu1 %v5170_v51 }
  0x84   :  { %v4329_v52 = vpop.eup %4328 }
  0x85   :  { %v154_v53 = vmul.f32 %v4329_v52, %v138_v37  ;;  %v155_v54 = vmul.f32 %v4329_v52, %v139_v38  ;;  %v5173_v52 = vld [vmem:[#allocation9 + $0x28] sm:$0xff] }
  0x86   :  { %621 = vmatprep.subr.mxu1 %v5173_v52 }
  0x87   :  { %4197 = vmatmul.mubr.msk.f32.vlgmr.msra.gmra.mxu0 %vm126_vm1, %v154_v53  ;;  %v5176_v53 = vld [vmem:[#allocation9 + $0x20] sm:$0xff] }
  0x88   :  { %259 = vmatprep.mubr.f32.mxu0 %v6301_v0  ;;  %485 = vmatpush1.msra.mxu0 %v5047_v11  ;;  %6467 = vst [vmem:[#allocation24_spill] sm:$0xff] %v5176_v53 }
  0x89   :  { %486 = vmatprep.subr.mxu0 %v5054_v14  ;;  %622 = vmatpush1.msra.mxu1 %v5176_v53 }
  0x8a   :  { %487 = vmatpush1.msra.mxu0 %v5056_v15 }
  0x8b   :  { %4198 = vmatmul.mubr.msk.f32.gmra.mxu0 %vm126_vm1, %v155_v54  ;;  %488 = vmatprep.subr.mxu0 %v5062_v18  ;;  %v5179_v54 = vld [vmem:[#allocation9 + $0x18] sm:$0xff] }
  0x8c   :  { %489 = vmatpush1.msra.mxu0 %v5065_v19  ;;  %532 = vmatprep.mubr.f32.mxu0 %v6301_v0  ;;  %6468 = vst [vmem:[#allocation25_spill] sm:$0xff] %v5179_v54 }
  0x8d   :  { %490 = vmatprep.subr.mxu0 %v5068_v21  ;;  %623 = vmatprep.subr.mxu1 %v5179_v54 }
  0x8e   :  { %491 = vmatpush1.msra.mxu0 %v5071_v22  ;;  %624 = vmatpush1.msra.mxu1 %v5182_v55 }
  0x8f   :  { %492 = vmatprep.subr.mxu0 %v5074_v24  ;;  %625 = vmatprep.subr.mxu1 %v5185_v56 }
  0x90   :  { %493 = vmatpush1.msra.mxu0 %v5078_v25  ;;  %626 = vmatpush1.msra.mxu1 %v5188_v58 }
  0x91   :  { %494 = vmatprep.subr.mxu0 %v5081_v27  ;;  %660 = vmatmul.mubr.f32.vlgmr.msra.gmra.mxu1 %v6301_v0 }
  0x92   :  { %495 = vmatpush1.msra.mxu0 %v5084_v28  ;;  %808 = vmatprep.subr.mxu1 %v5045_v10 }
  0x93   :  { %496 = vmatprep.subr.mxu0 %v5087_v30  ;;  %809 = vmatpush1.msra.mxu1 %v5047_v11 }
  0x94   :  { %497 = vmatpush1.msra.mxu0 %v5090_v31  ;;  %856 = vmatprep.mubr.f32.mxu1 %v6301_v0 }
  0x95   :  { %498 = vmatprep.subr.mxu0 %v5093_v33  ;;  %810 = vmatprep.subr.mxu1 %v5054_v14 }
  0x96   :  { %499 = vmatpush1.msra.mxu0 %v5096_v34  ;;  %811 = vmatpush1.msra.mxu1 %v5056_v15 }
  0x97   :  { %682 = vmatprep.subr.mxu0 %v5147_v44  ;;  %812 = vmatprep.subr.mxu1 %v5062_v18 }
  0x98   :  { %813 = vmatpush1.msra.mxu1 %v5065_v19 }
  0x99   :  { %814 = vmatprep.subr.mxu1 %v5068_v21 }
  0x9a   :  { %815 = vmatpush1.msra.mxu1 %v5071_v22 }
  0x9b   :  { %816 = vmatprep.subr.mxu1 %v5074_v24 }
  0x9c   :  { %817 = vmatpush1.msra.mxu1 %v5078_v25 }
  0x9d   :  { %818 = vmatprep.subr.mxu1 %v5081_v27 }
  0x9e   :  { %819 = vmatpush1.msra.mxu1 %v5084_v28 }
  0x9f   :  { %820 = vmatprep.subr.mxu1 %v5087_v30 }
  0xa0   :  { %821 = vmatpush1.msra.mxu1 %v5090_v31 }
  0xa1   :  { %822 = vmatprep.subr.mxu1 %v5093_v33 }
  0xa2   :  { %823 = vmatpush1.msra.mxu1 %v5096_v34 }
  0xa3   :  { %977 = vmatprep.subr.mxu1 %v5147_v44 }
 0x120   :  { %v408_v16 = vpop.f32.mrf.mxu1 }
 0x122   :  { %v410_v32 = vpop.f32.mrf.mxu1 }
 0x147   :  { %v255_v62 = vpop.f32.mrf.mxu0 }
 0x148   :  { %v256_v63 = vadd.f32 %v255_v62, %v169_v60 }
 0x149   :  { %v257_v1 = vpop.f32.mrf.mxu0 }
 0x14a   :  { %266 = vst [vmem:[#allocation2] sm:$0xff] %v256_v63  ;;  %v258_v2 = vadd.f32 %v257_v1, %v173_v61 }
 0x14b   :  { %v261_v3 = vpop.f32.mrf.mxu0 }
 0x14c   :  { %267 = vst [vmem:[#allocation2 + $0x8] sm:$0xff] %v258_v2  ;;  %v262_v4 = vadd.f32 %v261_v3, %v169_v60 }
 0x14d   :  { %v263_v5 = vpop.f32.mrf.mxu0 }
 0x14e   :  { %268 = vst [vmem:[#allocation2 + $0x10] sm:$0xff] %v262_v4  ;;  %v264_v6 = vadd.f32 %v263_v5, %v173_v61 }
 0x150   :  { %269 = vst [vmem:[#allocation2 + $0x18] sm:$0xff] %v264_v6  ;;  %v5213_v6 = vld [vmem:[#allocation8 + $0x70] sm:$0xff] }
 0x153   :  { %v294_v7 = vld [vmem:[#allocation2] ss:$8 sm:$0x3] }
 0x154   :  { %v301_v9 = vrot.slane %v294_v7, %v5124_v57  ;;  %v305_v26 = vrot.slane %v294_v7, %v5129_v59  ;;  %v5215_v7 = vld [vmem:[#allocation8 + $0x68] sm:$0xff] }
 0x157   :  { %v296_v8 = vld [vmem:[#allocation2 + $0x10] ss:$8 sm:$0x3] }
 0x158   :  { %v312_v12 = vrot.slane %v296_v8, %v5124_v57  ;;  %v316_v23 = vrot.slane %v296_v8, %v5129_v59  ;;  %v5218_v8 = vld [vmem:[#allocation8 + $0x60] sm:$0xff] }
 0x15a   :  { %v320_v13 = vsel %vm319_vm2, %v301_v9, %v312_v12  ;;  %v321_v29 = vsel %vm319_vm2, %v305_v26, %v316_v23  ;;  %v5221_v9 = vld [vmem:[#allocation8 + $0x58] sm:$0xff]  ;;  %v5225_v12 = vld [vmem:[#allocation8 + $0x50] sm:$0xff]  ;;  %v5240_v23 = vld [vmem:[#allocation8 + $0x28] sm:$0xff] }
 0x15b   :  { %v413_v17 = vadd.f32 %v408_v16, %v320_v13  ;;  %v414_v35 = vadd.f32 %v410_v32, %v321_v29  ;;  %v5228_v13 = vld [vmem:[#allocation8 + $0x48] sm:$0xff]  ;;  %v5231_v16 = vld [vmem:[#allocation8 + $0x40] sm:$0xff]  ;;  %v5246_v29 = vld [vmem:[#allocation8 + $0x18] sm:$0xff] }
 0x15c   :  { %v5243_v26 = vld [vmem:[#allocation8 + $0x20] sm:$0xff]  ;;  %v5249_v32 = vld [vmem:[#allocation8 + $0x10] sm:$0xff] }
 0x15d   :  { %v4199_v20 = vmul.f32 -1.442695, %v413_v17  ;;  %v4200_v60 = vmul.f32 -1.442695, %v414_v35  ;;  %v5234_v17 = vld [vmem:[#allocation8 + $0x38] sm:$0xff] }
 0x15f   :  { %4330 = vpow2.f32 %v4199_v20  ;;  %v5237_v20 = vld [vmem:[#allocation8 + $0x30] sm:$0xff] }
 0x160   :  { %4332 = vtanh.f32 %v414_v35  ;;  %v5252_v35 = vld [vmem:[#allocation8 + $0x8] sm:$0xff] }
 0x16c   :  { %v4331_v36 = vpop.eup %4330 }
 0x16d   :  { %v421_v37 = vadd.f32 1.0, %v4331_v36  ;;  %v4333_v38 = vpop.eup %4332  ;;  %v5255_v36 = vld [vmem:[#allocation8] sm:$0xff] }
 0x16f   :  { %4334 = vrcp.f32 %v421_v37  ;;  %v440_v37 = vld [vmem:[#allocation2 + $0x11] ss:$8 sm:$0x3] }
 0x170   :  { %4336 = vpow2.f32 %v4200_v60 }
 0x17c   :  { %v4335_v39 = vpop.eup %4334 }
 0x17d   :  { %v429_v40 = vmul.f32 %v4335_v39, %v4333_v38  ;;  %v4337_v61 = vpop.eup %4336  ;;  %v428_v63 = vmul.f32 0.0, %v4335_v39  ;;  %v438_v38 = vld [vmem:[#allocation2 + $0x1] ss:$8 sm:$0x3]  ;;  %v456_v39 = vrot.slane %v440_v37, %v5124_v57 }
 0x17e   :  { %v422_v62 = vadd.f32 1.0, %v4337_v61 }
 0x17f   :  { %431 = vrot.lane.b32.xlu0 %v429_v40, %s4923_s3  ;;  %v445_v40 = vrot.slane %v438_v38, %v5124_v57 }
 0x180   :  { %4338 = vrcp.f32 %v422_v62 }
 0x181   :  { %v463_v60 = vsel %vm319_vm2, %v445_v40, %v456_v39  ;;  %v661_v39 = vpop.f32.mrf.mxu1 }
 0x18d   :  { %v4339_v3 = vpop.eup %4338 }
 0x1f1   :  { %v432_v1 = vpop.permute.xlu0 %431 }
 0x1f2   :  { %v5210_v2 = vadd.f32 %v432_v1, %v428_v63  ;;  %v460_v1 = vrot.slane %v440_v37, %v5129_v59 }
 0x1f4   :  { %4340 = vtanh.f32 %v5210_v2 }
 0x201   :  { %v4341_v4 = vpop.eup %4340 }
 0x202   :  { %v436_v5 = vmul.f32 %v4341_v4, %v4339_v3  ;;  %v270_v3 = vld [vmem:[%s6294_s6] sm:$0x3]  ;;  %v449_v4 = vrot.slane %v438_v38, %v5129_v59  ;;  %v663_v38 = vpop.f32.mrf.mxu1 }
 0x203   :  { %v5292_v34 = vrot.slane %v270_v3, %v5129_v59 }
 0x204   :  { %4201 = vmatmul.mubr.msk.f32.vlgmr.msra.gmra.mxu0 %vm338_vm3, %v436_v5 }
 0x205   :  { %683 = vmatpush1.msra.mxu0 %v5213_v6  ;;  %730 = vmatprep.mubr.f32.mxu0 %v6301_v0  ;;  %6473 = vst [vmem:[#allocation30_spill] sm:$0xff] %v5292_v34 }
 0x206   :  { %684 = vmatprep.subr.mxu0 %v5215_v7 }
 0x207   :  { %685 = vmatpush1.msra.mxu0 %v5218_v8 }
 0x208   :  { %686 = vmatprep.subr.mxu0 %v5221_v9 }
 0x209   :  { %687 = vmatpush1.msra.mxu0 %v5225_v12 }
 0x20a   :  { %688 = vmatprep.subr.mxu0 %v5228_v13 }
 0x20b   :  { %689 = vmatpush1.msra.mxu0 %v5231_v16 }
 0x20c   :  { %690 = vmatprep.subr.mxu0 %v5234_v17 }
 0x20d   :  { %691 = vmatpush1.msra.mxu0 %v5237_v20 }
 0x20e   :  { %692 = vmatprep.subr.mxu0 %v5240_v23 }
 0x20f   :  { %693 = vmatpush1.msra.mxu0 %v5243_v26 }
 0x210   :  { %694 = vmatprep.subr.mxu0 %v5246_v29 }
 0x211   :  { %695 = vmatpush1.msra.mxu0 %v5249_v32 }
 0x212   :  { %696 = vmatprep.subr.mxu0 %v5252_v35 }
 0x213   :  { %697 = vmatpush1.msra.mxu0 %v5255_v36 }
 0x214   :  { %4204 = vmatmul.mubr.msk.f32.vlgmr.msra.gmra.mxu0 %vm338_vm3, %v436_v5  ;;  %906 = vmatprep.subr.mxu0 %v5140_v41 }
 0x215   :  { %907 = vmatpush1.msra.mxu0 %v5143_v42  ;;  %954 = vmatprep.mubr.f32.mxu0 %v6301_v0  ;;  %v464_v0 = vsel %vm319_vm2, %v449_v4, %v460_v1 }
 0x216   :  { %908 = vmatprep.subr.mxu0 %v5145_v43 }
 0x217   :  { %909 = vmatpush1.msra.mxu0 %v5152_v45 }
 0x218   :  { %910 = vmatprep.subr.mxu0 %v5155_v46 }
 0x219   :  { %911 = vmatpush1.msra.mxu0 %v5158_v47 }
 0x21a   :  { %912 = vmatprep.subr.mxu0 %v5161_v48 }
 0x21b   :  { %913 = vmatpush1.msra.mxu0 %v5164_v49 }
 0x21c   :  { %914 = vmatprep.subr.mxu0 %v5167_v50 }
 0x21d   :  { %915 = vmatpush1.msra.mxu0 %v5170_v51 }
 0x21e   :  { %916 = vmatprep.subr.mxu0 %v5173_v52 }
 0x21f   :  { %917 = vmatpush1.msra.mxu0 %v5176_v53 }
 0x220   :  { %918 = vmatprep.subr.mxu0 %v5179_v54 }
 0x221   :  { %919 = vmatpush1.msra.mxu0 %v5182_v55 }
 0x222   :  { %920 = vmatprep.subr.mxu0 %v5185_v56 }
 0x223   :  { %921 = vmatpush1.msra.mxu0 %v5188_v58  ;;  %v5288_v58 = vrot.slane %v270_v3, %v5124_v57 }
 0x225   :  { %6472 = vst [vmem:[#allocation29_spill] sm:$0xff] %v5288_v58 }
 0x2c4   :  { %v534_v61 = vpop.f32.mrf.mxu0 }
 0x2c5   :  { %v539_v62 = vadd.f32 %v534_v61, %v463_v60 }
 0x2c6   :  { %v536_v5 = vpop.f32.mrf.mxu0 }
 0x2c7   :  { %v4202_v63 = vmul.f32 -1.442695, %v539_v62  ;;  %v540_v44 = vadd.f32 %v536_v5, %v464_v0 }
 0x2c9   :  { %4342 = vpow2.f32 %v4202_v63 }
 0x2ca   :  { %4344 = vtanh.f32 %v540_v44 }
 0x2d4   :  { %v732_v40 = vpop.f32.mrf.mxu0 }
 0x2d5   :  { %v733_v60 = vadd.f32 %v732_v40, %v661_v39 }
 0x2d6   :  { %v4343_v61 = vpop.eup %4342  ;;  %v734_v56 = vpop.f32.mrf.mxu0 }
 0x2d7   :  { %v547_v62 = vadd.f32 1.0, %v4343_v61  ;;  %v737_v37 = vadd.f32 %v733_v60, %v5288_v58  ;;  %v735_v1 = vadd.f32 %v734_v56, %v663_v38  ;;  %v4345_v4 = vpop.eup %4344  ;;  %v4203_v56 = vmul.f32 -1.442695, %v540_v44 }
 0x2d9   :  { %4346 = vrcp.f32 %v547_v62  ;;  %v4205_v63 = vmul.f32 -1.442695, %v737_v37  ;;  %v738_v0 = vadd.f32 %v735_v1, %v5292_v34  ;;  %v5297_v37 = vld [vmem:[#allocation12 + $0x78] sm:$0xff] }
 0x2da   :  { %6474 = vst [vmem:[#allocation31_spill] sm:$0xff] %v5297_v37  ;;  %1104 = vmatprep.subr.mxu0 %v5297_v37 }
 0x2db   :  { %4348 = vpow2.f32 %v4205_v63  ;;  %v4206_v63 = vmul.f32 -1.442695, %v738_v0 }
 0x2dc   :  { %4350 = vtanh.f32 %v738_v0 }
 0x2e6   :  { %v4347_v57 = vpop.eup %4346 }
 0x2e7   :  { %v555_v5 = vmul.f32 %v4347_v57, %v4345_v4  ;;  %v554_v1 = vmul.f32 %v4347_v57, %v5210_v2  ;;  %v6475_v57 = vmov 0.0   ;;  %v5325_v2 = vld [vmem:[#allocation11 + $0x70] sm:$0xff] }
 0x2e8   :  { %v4349_v39 = vpop.eup %4348 }
 0x2e9   :  { %557 = vrot.lane.b32.xlu0 %v555_v5, %s4923_s3  ;;  %v745_v40 = vadd.f32 1.0, %v4349_v39  ;;  %v4351_v60 = vpop.eup %4350 }
 0x2eb   :  { %4352 = vrcp.f32 %v745_v40 }
 0x2ec   :  { %4354 = vpow2.f32 %v4203_v56  ;;  %v5328_v56 = vld [vmem:[#allocation11 + $0x68] sm:$0xff] }
 0x2ed   :  { %4356 = vpow2.f32 %v4206_v63  ;;  %v5332_v63 = vld [vmem:[#allocation11 + $0x60] sm:$0xff] }
 0x2ee   :  { %6476 = vst [vmem:[#allocation32_spill] sm:$0xff] %v5332_v63 }
 0x2f8   :  { %v4353_v61 = vpop.eup %4352 }
 0x2f9   :  { %v753_v62 = vmul.f32 %v4353_v61, %v4351_v60  ;;  %v4355_v3 = vpop.eup %4354  ;;  %v752_v58 = vmul.f32 0.0, %v4353_v61 }
 0x2fa   :  { %v548_v38 = vadd.f32 1.0, %v4355_v3  ;;  %v4357_v39 = vpop.eup %4356 }
 0x2fb   :  { %755 = vrot.lane.b32.xlu1 %v753_v62, %s4923_s3  ;;  %v746_v62 = vadd.f32 1.0, %v4357_v39  ;;  %v5341_v39 = vld [vmem:[#allocation12 + $0x68] sm:$0xff] }
 0x2fc   :  { %4358 = vrcp.f32 %v548_v38  ;;  %6479 = vst [vmem:[#allocation35_spill] sm:$0xff] %v5341_v39 }
 0x309   :  { %v4359_v40 = vpop.eup %4358 }
 0x35b   :  { %v558_v4 = vpop.permute.xlu0 %557 }
 0x35c   :  { %v5301_v5 = vadd.f32 %v558_v4, %v554_v1  ;;  %v5335_v1 = vld [vmem:[#allocation12 + $0x70] sm:$0xff]  ;;  %v5337_v4 = vld [vmem:[#allocation11 + $0x58] sm:$0xff] }
 0x35d   :  { %6477 = vst [vmem:[#allocation33_spill] sm:$0xff] %v5335_v1  ;;  %6478 = vst [vmem:[#allocation34_spill] sm:$0xff] %v5337_v4 }
 0x35e   :  { %4360 = vtanh.f32 %v5301_v5 }
 0x35f   :  { %4362 = vrcp.f32 %v746_v62  ;;  %v5353_v62 = vld [vmem:[#allocation12 + $0x58] sm:$0xff] }
 0x360   :  { %6483 = vst [vmem:[#allocation39_spill] sm:$0xff] %v5353_v62 }
 0x36b   :  { %v4361_v60 = vpop.eup %4360 }
 0x36c   :  { %v562_v34 = vmul.f32 %v4361_v60, %v4359_v40  ;;  %v4363_v61 = vpop.eup %4362  ;;  %v5343_v40 = vld [vmem:[#allocation11 + $0x50] sm:$0xff]  ;;  %v5349_v60 = vld [vmem:[#allocation11 + $0x48] sm:$0xff] }
 0x36d   :  { %v756_v44 = vpop.permute.xlu1 %755  ;;  %6480 = vst [vmem:[#allocation36_spill] sm:$0xff] %v5343_v40  ;;  %6482 = vst [vmem:[#allocation38_spill] sm:$0xff] %v5349_v60 }
 0x36e   :  { %4207 = vmatmul.mubr.msk.f32.vlgmr.msra.gmra.mxu1 %vm338_vm3, %v562_v34  ;;  %v5305_v0 = vadd.f32 %v756_v44, %v752_v58  ;;  %v5322_v58 = vld [vmem:[#allocation11 + $0x78] sm:$0xff]  ;;  %v5355_v44 = vld [vmem:[#allocation11 + $0x40] sm:$0xff] }
 0x36f   :  { %978 = vmatpush1.msra.mxu1 %v5213_v6  ;;  %1025 = vmatprep.mubr.f32.mxu1 %v6475_v57  ;;  %6484 = vst [vmem:[#allocation40_spill] sm:$0xff] %v5355_v44 }
 0x370   :  { %979 = vmatprep.subr.mxu1 %v5215_v7  ;;  %4364 = vtanh.f32 %v5305_v0 }
 0x371   :  { %980 = vmatpush1.msra.mxu1 %v5218_v8 }
 0x372   :  { %981 = vmatprep.subr.mxu1 %v5221_v9 }
 0x373   :  { %982 = vmatpush1.msra.mxu1 %v5225_v12 }
 0x374   :  { %983 = vmatprep.subr.mxu1 %v5228_v13 }
 0x375   :  { %984 = vmatpush1.msra.mxu1 %v5231_v16 }
 0x376   :  { %985 = vmatprep.subr.mxu1 %v5234_v17 }
 0x377   :  { %986 = vmatpush1.msra.mxu1 %v5237_v20 }
 0x378   :  { %987 = vmatprep.subr.mxu1 %v5240_v23 }
 0x379   :  { %988 = vmatpush1.msra.mxu1 %v5243_v26 }
 0x37a   :  { %989 = vmatprep.subr.mxu1 %v5246_v29 }
 0x37b   :  { %990 = vmatpush1.msra.mxu1 %v5249_v32 }
 0x37c   :  { %991 = vmatprep.subr.mxu1 %v5252_v35 }
 0x37d   :  { %992 = vmatpush1.msra.mxu1 %v5255_v36  ;;  %v4365_v3 = vpop.eup %4364 }
 0x37e   :  { %4211 = vmatmul.mubr.msk.f32.vlgmr.msra.gmra.mxu1 %vm338_vm3, %v562_v34  ;;  %1175 = vmatprep.subr.mxu1 %v5322_v58  ;;  %v760_v38 = vmul.f32 %v4365_v3, %v4363_v61  ;;  %v5347_v34 = vld [vmem:[#allocation12 + $0x60] sm:$0xff]  ;;  %v5359_v61 = vld [vmem:[#allocation12 + $0x50] sm:$0xff]  ;;  %v5361_v3 = vld [vmem:[#allocation11 + $0x38] sm:$0xff] }
 0x37f   :  { %1176 = vmatpush1.msra.mxu1 %v5325_v2  ;;  %1223 = vmatprep.mubr.f32.mxu1 %v6475_v57  ;;  %6481 = vst [vmem:[#allocation37_spill] sm:$0xff] %v5347_v34  ;;  %6485 = vst [vmem:[#allocation41_spill] sm:$0xff] %v5359_v61 }
 0x380   :  { %1177 = vmatprep.subr.mxu1 %v5328_v56  ;;  %4210 = vmatmul.mubr.msk.f32.vlgmr.msra.gmra.mxu0 %vm338_vm3, %v760_v38  ;;  %6486 = vst [vmem:[#allocation42_spill] sm:$0xff] %v5361_v3 }
 0x381   :  { %1178 = vmatpush1.msra.mxu1 %v5332_v63  ;;  %1105 = vmatpush1.msra.mxu0 %v5335_v1  ;;  %v5365_v63 = vld [vmem:[#allocation12 + $0x48] sm:$0xff]  ;;  %v5367_v1 = vld [vmem:[#allocation11 + $0x30] sm:$0xff] }
 0x382   :  { %1179 = vmatprep.subr.mxu1 %v5337_v4  ;;  %1106 = vmatprep.subr.mxu0 %v5341_v39  ;;  %6487 = vst [vmem:[#allocation43_spill] sm:$0xff] %v5365_v63  ;;  %6488 = vst [vmem:[#allocation44_spill] sm:$0xff] %v5367_v1  ;;  %v5371_v4 = vld [vmem:[#allocation12 + $0x40] sm:$0xff]  ;;  %v5373_v39 = vld [vmem:[#allocation11 + $0x28] sm:$0xff] }
 0x383   :  { %1180 = vmatpush1.msra.mxu1 %v5343_v40  ;;  %1107 = vmatpush1.msra.mxu0 %v5347_v34  ;;  %6489 = vst [vmem:[#allocation45_spill] sm:$0xff] %v5371_v4  ;;  %6490 = vst [vmem:[#allocation46_spill] sm:$0xff] %v5373_v39  ;;  %v5377_v40 = vld [vmem:[#allocation12 + $0x38] sm:$0xff]  ;;  %v5379_v34 = vld [vmem:[#allocation11 + $0x20] sm:$0xff] }
 0x384   :  { %1181 = vmatprep.subr.mxu1 %v5349_v60  ;;  %1108 = vmatprep.subr.mxu0 %v5353_v62  ;;  %6491 = vst [vmem:[#allocation47_spill] sm:$0xff] %v5377_v40  ;;  %v5383_v60 = vld [vmem:[#allocation12 + $0x30] sm:$0xff]  ;;  %v5385_v62 = vld [vmem:[#allocation11 + $0x18] sm:$0xff] }
 0x385   :  { %1182 = vmatpush1.msra.mxu1 %v5355_v44  ;;  %1109 = vmatpush1.msra.mxu0 %v5359_v61  ;;  %6492 = vst [vmem:[#allocation48_spill] sm:$0xff] %v5383_v60  ;;  %v5389_v44 = vld [vmem:[#allocation12 + $0x28] sm:$0xff]  ;;  %v5391_v61 = vld [vmem:[#allocation11 + $0x10] sm:$0xff] }
 0x386   :  { %1183 = vmatprep.subr.mxu1 %v5361_v3  ;;  %1110 = vmatprep.subr.mxu0 %v5365_v63  ;;  %6493 = vst [vmem:[#allocation49_spill] sm:$0xff] %v5389_v44  ;;  %v5395_v3 = vld [vmem:[#allocation12 + $0x20] sm:$0xff]  ;;  %v5397_v63 = vld [vmem:[#allocation11 + $0x8] sm:$0xff] }
 0x387   :  { %1184 = vmatpush1.msra.mxu1 %v5367_v1  ;;  %1111 = vmatpush1.msra.mxu0 %v5371_v4  ;;  %6494 = vst [vmem:[#allocation50_spill] sm:$0xff] %v5395_v3  ;;  %v5401_v1 = vld [vmem:[#allocation12 + $0x18] sm:$0xff]  ;;  %v5403_v4 = vld [vmem:[#allocation11] sm:$0xff] }
 0x388   :  { %1185 = vmatprep.subr.mxu1 %v5373_v39  ;;  %1112 = vmatprep.subr.mxu0 %v5377_v40  ;;  %6495 = vst [vmem:[#allocation51_spill] sm:$0xff] %v5401_v1  ;;  %6496 = vst [vmem:[#allocation52_spill] sm:$0xff] %v5403_v4  ;;  %v5407_v39 = vld [vmem:[#allocation12 + $0x10] sm:$0xff]  ;;  %v5411_v40 = vld [vmem:[#allocation12 + $0x8] sm:$0xff] }
 0x389   :  { %1186 = vmatpush1.msra.mxu1 %v5379_v34  ;;  %1113 = vmatpush1.msra.mxu0 %v5383_v60  ;;  %6497 = vst [vmem:[#allocation53_spill] sm:$0xff] %v5407_v39  ;;  %6498 = vst [vmem:[#allocation54_spill] sm:$0xff] %v5411_v40  ;;  %v5415_v60 = vld [vmem:[#allocation12] sm:$0xff] }
 0x38a   :  { %1187 = vmatprep.subr.mxu1 %v5385_v62  ;;  %1114 = vmatprep.subr.mxu0 %v5389_v44  ;;  %6499 = vst [vmem:[#allocation55_spill] sm:$0xff] %v5415_v60 }
 0x38b   :  { %1188 = vmatpush1.msra.mxu1 %v5391_v61  ;;  %1115 = vmatpush1.msra.mxu0 %v5395_v3 }
 0x38c   :  { %1189 = vmatprep.subr.mxu1 %v5397_v63  ;;  %1116 = vmatprep.subr.mxu0 %v5401_v1 }
 0x38d   :  { %1190 = vmatpush1.msra.mxu1 %v5403_v4  ;;  %1117 = vmatpush1.msra.mxu0 %v5407_v39 }
 0x38e   :  { %1152 = vmatprep.mubr.f32.mxu0 %v6475_v57  ;;  %1118 = vmatprep.subr.mxu0 %v5411_v40 }
 0x38f   :  { %4214 = vmatmul.mubr.msk.f32.vlgmr.msra.gmra.mxu1 %vm338_vm3, %v760_v38  ;;  %1119 = vmatpush1.msra.mxu0 %v5415_v60 }
 0x390   :  { %1399 = vmatprep.subr.mxu1 %v5140_v41  ;;  %1153 = vmatmul.mubr.f32.vlgmr.msra.gmra.mxu0 %v6475_v57 }
 0x391   :  { %1301 = vmatprep.subr.mxu0 %v5045_v10  ;;  %1349 = vmatprep.mubr.f32.mxu0 %v6475_v57  ;;  %v6500_v10 = vld [vmem:[#allocation20_spill] sm:$0xff] }
 0x392   :  { %1302 = vmatpush1.msra.mxu0 %v5047_v11  ;;  %1400 = vmatpush1.msra.mxu1 %v5143_v42  ;;  %v6501_v11 = vld [vmem:[#allocation27_spill] sm:$0xff] }
 0x393   :  { %1303 = vmatprep.subr.mxu0 %v5054_v14  ;;  %1401 = vmatprep.subr.mxu1 %v5145_v43  ;;  %v6502_v14 = vld [vmem:[#allocation23_spill] sm:$0xff] }
 0x394   :  { %1304 = vmatpush1.msra.mxu0 %v5056_v15  ;;  %1402 = vmatpush1.msra.mxu1 %v5152_v45  ;;  %v6503_v15 = vld [vmem:[#allocation28_spill] sm:$0xff] }
 0x395   :  { %1305 = vmatprep.subr.mxu0 %v5062_v18  ;;  %1403 = vmatprep.subr.mxu1 %v5155_v46  ;;  %v764_v18 = vld [vmem:[#allocation2 + $0x12] ss:$8 sm:$0x3] }
 0x396   :  { %1306 = vmatpush1.msra.mxu0 %v5065_v19  ;;  %1404 = vmatpush1.msra.mxu1 %v5158_v47  ;;  %v762_v19 = vld [vmem:[#allocation2 + $0x2] ss:$8 sm:$0x3] }
 0x397   :  { %1307 = vmatprep.subr.mxu0 %v5068_v21  ;;  %1405 = vmatprep.subr.mxu1 %v5161_v48  ;;  %v6504_v21 = vld [vmem:[#allocation21_spill] sm:$0xff] }
 0x398   :  { %1308 = vmatpush1.msra.mxu0 %v5071_v22  ;;  %1406 = vmatpush1.msra.mxu1 %v5164_v49  ;;  %v780_v22 = vrot.slane %v764_v18, %v6504_v21 }
 0x399   :  { %1309 = vmatprep.subr.mxu0 %v5074_v24  ;;  %1407 = vmatprep.subr.mxu1 %v5167_v50  ;;  %v769_v24 = vrot.slane %v762_v19, %v6504_v21 }
 0x39a   :  { %1310 = vmatpush1.msra.mxu0 %v5078_v25  ;;  %1408 = vmatpush1.msra.mxu1 %v5170_v51 }
 0x39b   :  { %1311 = vmatprep.subr.mxu0 %v5081_v27  ;;  %1409 = vmatprep.subr.mxu1 %v5173_v52  ;;  %v787_v25 = vsel %vm319_vm2, %v769_v24, %v780_v22  ;;  %v6505_v22 = vld [vmem:[#allocation29_spill] sm:$0xff] }
 0x39c   :  { %1312 = vmatpush1.msra.mxu0 %v5084_v28  ;;  %1410 = vmatpush1.msra.mxu1 %v5176_v53 }
 0x39d   :  { %1313 = vmatprep.subr.mxu0 %v5087_v30  ;;  %1411 = vmatprep.subr.mxu1 %v5179_v54 }
 0x39e   :  { %1314 = vmatpush1.msra.mxu0 %v5090_v31  ;;  %1412 = vmatpush1.msra.mxu1 %v5182_v55  ;;  %v784_v31 = vrot.slane %v764_v18, %v5129_v59  ;;  %v282_v18 = vld [vmem:[%s6297_s9] sm:$0x3] }
 0x39f   :  { %1315 = vmatprep.subr.mxu0 %v5093_v33  ;;  %1413 = vmatprep.subr.mxu1 %v6501_v11  ;;  %v773_v33 = vrot.slane %v762_v19, %v5129_v59 }
 0x3a0   :  { %1316 = vmatpush1.msra.mxu0 %v6500_v10  ;;  %1414 = vmatpush1.msra.mxu1 %v6503_v15 }
 0x3a1   :  { %1470 = vmatprep.subr.mxu0 %v6502_v14  ;;  %1447 = vmatprep.mubr.f32.mxu1 %v6475_v57  ;;  %v788_v10 = vsel %vm319_vm2, %v773_v33, %v784_v31 }
 0x3a2   :  { %1568 = vmatprep.subr.mxu1 %v5297_v37 }
 0x42e   :  { %v858_v27 = vpop.f32.mrf.mxu1 }
 0x42f   :  { %v863_v28 = vadd.f32 %v858_v27, %v787_v25 }
 0x430   :  { %v860_v38 = vpop.f32.mrf.mxu1 }
 0x431   :  { %v4208_v30 = vmul.f32 -1.442695, %v863_v28  ;;  %v864_v14 = vadd.f32 %v860_v38, %v788_v10 }
 0x433   :  { %4366 = vpow2.f32 %v4208_v30 }
 0x434   :  { %4368 = vtanh.f32 %v864_v14 }
 0x43e   :  { %v1027_v11 = vpop.f32.mrf.mxu1 }
 0x440   :  { %v4367_v37 = vpop.eup %4366  ;;  %v956_v55 = vpop.f32.mrf.mxu0 }
 0x441   :  { %v871_v15 = vadd.f32 1.0, %v4367_v37  ;;  %v1028_v54 = vadd.f32 %v1027_v11, %v956_v55  ;;  %v1029_v28 = vpop.f32.mrf.mxu1  ;;  %v4369_v19 = vpop.eup %4368  ;;  %v5470_v37 = vrot.slane %v282_v18, %v6504_v21  ;;  %v5476_v21 = vrot.slane %v282_v18, %v5129_v59 }
 0x442   :  { %v958_v27 = vpop.f32.mrf.mxu0 }
 0x443   :  { %4370 = vrcp.f32 %v871_v15  ;;  %v1032_v24 = vadd.f32 %v1028_v54, %v6505_v22  ;;  %v1030_v30 = vadd.f32 %v1029_v28, %v958_v27  ;;  %v6506_v15 = vld [vmem:[#allocation30_spill] sm:$0xff]  ;;  %6507 = vst [vmem:[#allocation20_spill] sm:$0xff] %v5476_v21 }
 0x445   :  { %v4212_v25 = vmul.f32 -1.442695, %v1032_v24  ;;  %v1033_v54 = vadd.f32 %v1030_v30, %v6506_v15 }
 0x447   :  { %4372 = vpow2.f32 %v4212_v25 }
 0x448   :  { %4374 = vtanh.f32 %v1033_v54 }
 0x44f   :  { %v1225_v31 = vpop.f32.mrf.mxu1 }
 0x450   :  { %v4371_v33 = vpop.eup %4370  ;;  %v1154_v38 = vpop.f32.mrf.mxu0 }
 0x451   :  { %v879_v55 = vmul.f32 %v4371_v33, %v4369_v19  ;;  %v1226_v11 = vadd.f32 %v1225_v31, %v1154_v38  ;;  %v1227_v27 = vpop.f32.mrf.mxu1 }
 0x452   :  { %v1156_v28 = vpop.f32.mrf.mxu0 }
 0x453   :  { %881 = vrot.lane.b32.xlu1 %v879_v55, %s4923_s3  ;;  %v1230_v10 = vadd.f32 %v1226_v11, %v5470_v37  ;;  %v1228_v53 = vadd.f32 %v1227_v27, %v1156_v28  ;;  %v4213_v27 = vmul.f32 -1.442695, %v1033_v54 }
 0x454   :  { %v4373_v24 = vpop.eup %4372 }
 0x455   :  { %v1040_v25 = vadd.f32 1.0, %v4373_v24  ;;  %v4215_v22 = vmul.f32 -1.442695, %v1230_v10  ;;  %v4375_v19 = vpop.eup %4374  ;;  %v1231_v31 = vadd.f32 %v1228_v53, %v5476_v21  ;;  %v4209_v24 = vmul.f32 -1.442695, %v864_v14 }
 0x456   :  { %v878_v53 = vmul.f32 %v4371_v33, %v5301_v5 }
 0x457   :  { %4376 = vrcp.f32 %v1040_v25 }
 0x458   :  { %4378 = vpow2.f32 %v4215_v22 }
 0x459   :  { %4380 = vtanh.f32 %v1231_v31 }
 0x464   :  { %v4377_v30 = vpop.eup %4376 }
 0x465   :  { %v4379_v38 = vpop.eup %4378  ;;  %v1048_v55 = vmul.f32 %v4377_v30, %v4375_v19  ;;  %v1047_v14 = vmul.f32 %v4377_v30, %v5305_v0 }
 0x466   :  { %v1238_v15 = vadd.f32 1.0, %v4379_v38  ;;  %v4381_v11 = vpop.eup %4380 }
 0x467   :  { %1050 = vrot.lane.b32.xlu0 %v1048_v55, %s4923_s3 }
 0x468   :  { %4382 = vrcp.f32 %v1238_v15 }
 0x469   :  { %4384 = vpow2.f32 %v4209_v24 }
 0x475   :  { %v4383_v10 = vpop.eup %4382 }
 0x476   :  { %v1246_v22 = vmul.f32 %v4383_v10, %v4381_v11  ;;  %v4385_v18 = vpop.eup %4384  ;;  %v4216_v11 = vmul.f32 -1.442695, %v1231_v31  ;;  %v1245_v24 = vmul.f32 0.0, %v4383_v10  ;;  %v6512_v10 = vld [vmem:[#allocation38_spill] sm:$0xff] }
 0x477   :  { %v872_v25 = vadd.f32 1.0, %v4385_v18 }
 0x478   :  { %1248 = vrot.lane.b32.xlu1 %v1246_v22, %s4923_s3 }
 0x479   :  { %4386 = vrcp.f32 %v872_v25  ;;  %v6508_v25 = vld [vmem:[#allocation32_spill] sm:$0xff] }
 0x47a   :  { %4388 = vpow2.f32 %v4213_v27 }
 0x486   :  { %v4387_v15 = vpop.eup %4386 }
 0x487   :  { %v4389_v38 = vpop.eup %4388 }
 0x488   :  { %v1041_v22 = vadd.f32 1.0, %v4389_v38  ;;  %v6513_v38 = vld [vmem:[#allocation35_spill] sm:$0xff] }
 0x4c5   :  { %v882_v28 = vpop.permute.xlu1 %881 }
 0x4c6   :  { %v5482_v19 = vadd.f32 %v882_v28, %v878_v53  ;;  %v6509_v28 = vld [vmem:[#allocation34_spill] sm:$0xff] }
 0x4c8   :  { %4390 = vtanh.f32 %v5482_v19 }
 0x4c9   :  { %4392 = vpow2.f32 %v4216_v11  ;;  %v6515_v11 = vld [vmem:[#allocation37_spill] sm:$0xff] }
 0x4ca   :  { %4394 = vrcp.f32 %v1041_v22  ;;  %v6516_v22 = vld [vmem:[#allocation42_spill] sm:$0xff] }
 0x4d5   :  { %v4391_v55 = vpop.eup %4390 }
 0x4d6   :  { %v886_v21 = vmul.f32 %v4391_v55, %v4387_v15  ;;  %v4393_v0 = vpop.eup %4392  ;;  %v6511_v15 = vld [vmem:[#allocation33_spill] sm:$0xff]  ;;  %v6514_v55 = vld [vmem:[#allocation40_spill] sm:$0xff] }
 0x4d7   :  { %v4395_v54 = vpop.eup %4394  ;;  %v1239_v31 = vadd.f32 1.0, %v4393_v0  ;;  %v6519_v0 = vld [vmem:[#allocation41_spill] sm:$0xff] }
 0x4d8   :  { %4217 = vmatmul.mubr.msk.f32.vlgmr.msra.gmra.mxu0 %vm338_vm3, %v886_v21 }
 0x4d9   :  { %1471 = vmatpush1.msra.mxu0 %v5213_v6  ;;  %1518 = vmatprep.mubr.f32.mxu0 %v6475_v57  ;;  %v1051_v5 = vpop.permute.xlu0 %1050 }
 0x4da   :  { %1472 = vmatprep.subr.mxu0 %v5215_v7  ;;  %v5490_v33 = vadd.f32 %v1051_v5, %v1047_v14  ;;  %v6517_v14 = vld [vmem:[#allocation39_spill] sm:$0xff]  ;;  %v6518_v5 = vld [vmem:[#allocation44_spill] sm:$0xff] }
 0x4db   :  { %1473 = vmatpush1.msra.mxu0 %v5218_v8 }
 0x4dc   :  { %1474 = vmatprep.subr.mxu0 %v5221_v9  ;;  %4396 = vtanh.f32 %v5490_v33 }
 0x4dd   :  { %1475 = vmatpush1.msra.mxu0 %v5225_v12  ;;  %4398 = vrcp.f32 %v1239_v31  ;;  %v6521_v31 = vld [vmem:[#allocation43_spill] sm:$0xff] }
 0x4de   :  { %1476 = vmatprep.subr.mxu0 %v5228_v13 }
 0x4df   :  { %1477 = vmatpush1.msra.mxu0 %v5231_v16 }
 0x4e0   :  { %1478 = vmatprep.subr.mxu0 %v5234_v17 }
 0x4e1   :  { %1479 = vmatpush1.msra.mxu0 %v5237_v20 }
 0x4e2   :  { %1480 = vmatprep.subr.mxu0 %v5240_v23 }
 0x4e3   :  { %1481 = vmatpush1.msra.mxu0 %v5243_v26 }
 0x4e4   :  { %1482 = vmatprep.subr.mxu0 %v5246_v29 }
 0x4e5   :  { %1483 = vmatpush1.msra.mxu0 %v5249_v32 }
 0x4e6   :  { %1484 = vmatprep.subr.mxu0 %v5252_v35 }
 0x4e7   :  { %1485 = vmatpush1.msra.mxu0 %v5255_v36 }
 0x4e8   :  { %4221 = vmatmul.mubr.msk.f32.vlgmr.msra.gmra.mxu0 %vm338_vm3, %v886_v21  ;;  %1639 = vmatprep.subr.mxu0 %v5322_v58  ;;  %v6510_v21 = vld [vmem:[#allocation36_spill] sm:$0xff] }
 0x4e9   :  { %1640 = vmatpush1.msra.mxu0 %v5325_v2  ;;  %1687 = vmatprep.mubr.f32.mxu0 %v6475_v57  ;;  %v4397_v30 = vpop.eup %4396 }
 0x4ea   :  { %1641 = vmatprep.subr.mxu0 %v5328_v56  ;;  %v1249_v18 = vpop.permute.xlu1 %1248  ;;  %v1055_v27 = vmul.f32 %v4397_v30, %v4395_v54  ;;  %v6520_v54 = vld [vmem:[#allocation46_spill] sm:$0xff]  ;;  %v6522_v30 = vld [vmem:[#allocation45_spill] sm:$0xff] }
 0x4eb   :  { %1642 = vmatpush1.msra.mxu0 %v6508_v25  ;;  %v5512_v53 = vadd.f32 %v1249_v18, %v1245_v24  ;;  %v6523_v24 = vld [vmem:[#allocation47_spill] sm:$0xff]  ;;  %v6524_v18 = vld [vmem:[#allocation48_spill] sm:$0xff] }
 0x4ec   :  { %1643 = vmatprep.subr.mxu0 %v6509_v28  ;;  %4220 = vmatmul.mubr.msk.f32.vlgmr.msra.gmra.mxu1 %vm338_vm3, %v1055_v27 }
 0x4ed   :  { %1644 = vmatpush1.msra.mxu0 %v6510_v21  ;;  %4400 = vtanh.f32 %v5512_v53  ;;  %1569 = vmatpush1.msra.mxu1 %v6511_v15 }
 0x4ee   :  { %1645 = vmatprep.subr.mxu0 %v6512_v10  ;;  %1570 = vmatprep.subr.mxu1 %v6513_v38 }
 0x4ef   :  { %1646 = vmatpush1.msra.mxu0 %v6514_v55  ;;  %1571 = vmatpush1.msra.mxu1 %v6515_v11 }
 0x4f0   :  { %1647 = vmatprep.subr.mxu0 %v6516_v22  ;;  %1572 = vmatprep.subr.mxu1 %v6517_v14 }
 0x4f1   :  { %1648 = vmatpush1.msra.mxu0 %v6518_v5  ;;  %1573 = vmatpush1.msra.mxu1 %v6519_v0 }
 0x4f2   :  { %1649 = vmatprep.subr.mxu0 %v6520_v54  ;;  %1574 = vmatprep.subr.mxu1 %v6521_v31 }
 0x4f3   :  { %1650 = vmatpush1.msra.mxu0 %v5379_v34  ;;  %1575 = vmatpush1.msra.mxu1 %v6522_v30  ;;  %v4399_v30 = vpop.eup %4398 }
 0x4f4   :  { %1651 = vmatprep.subr.mxu0 %v5385_v62  ;;  %1576 = vmatprep.subr.mxu1 %v6523_v24 }
 0x4f5   :  { %1652 = vmatpush1.msra.mxu0 %v5391_v61  ;;  %1577 = vmatpush1.msra.mxu1 %v6524_v18 }
 0x4f6   :  { %1653 = vmatprep.subr.mxu0 %v5397_v63  ;;  %1578 = vmatprep.subr.mxu1 %v5389_v44 }
 0x4f7   :  { %1654 = vmatpush1.msra.mxu0 %v5403_v4  ;;  %1579 = vmatpush1.msra.mxu1 %v5395_v3 }
 0x4f8   :  { %4225 = vmatmul.mubr.msk.f32.vlgmr.msra.gmra.mxu0 %vm338_vm3, %v1055_v27  ;;  %1580 = vmatprep.subr.mxu1 %v5401_v1  ;;  %v5548_v27 = vld [vmem:[#allocation6 + $0x78] sm:$0xff] }
 0x4f9   :  { %1616 = vmatprep.mubr.f32.mxu1 %v6475_v57  ;;  %1581 = vmatpush1.msra.mxu1 %v5407_v39  ;;  %6525 = vst [vmem:[#allocation32_spill] sm:$0xff] %v5548_v27 }
 0x4fa   :  { %1863 = vmatprep.subr.mxu0 %v5140_v41  ;;  %v4401_v18 = vpop.eup %4400  ;;  %1582 = vmatprep.subr.mxu1 %v5411_v40  ;;  %v5554_v41 = vld [vmem:[#allocation6 + $0x70] sm:$0xff] }
 0x4fb   :  { %1864 = vmatpush1.msra.mxu0 %v5143_v42  ;;  %1583 = vmatpush1.msra.mxu1 %v5415_v60  ;;  %v1253_v44 = vmul.f32 %v4401_v18, %v4399_v30  ;;  %6526 = vst [vmem:[#allocation34_spill] sm:$0xff] %v5554_v41  ;;  %v5558_v42 = vld [vmem:[#allocation6 + $0x68] sm:$0xff]  ;;  %v5586_v30 = vld [vmem:[#allocation6 + $0x30] sm:$0xff] }
 0x4fc   :  { %1865 = vmatprep.subr.mxu0 %v5145_v43  ;;  %1765 = vmatprep.subr.mxu1 %v5548_v27  ;;  %6527 = vst [vmem:[#allocation36_spill] sm:$0xff] %v5558_v42  ;;  %v5562_v43 = vld [vmem:[#allocation6 + $0x60] sm:$0xff]  ;;  %6535 = vst [vmem:[#allocation39_spill] sm:$0xff] %v5586_v30  ;;  %v5590_v18 = vld [vmem:[#allocation6 + $0x28] sm:$0xff] }
 0x4fd   :  { %1866 = vmatpush1.msra.mxu0 %v5152_v45  ;;  %4224 = vmatmul.mubr.msk.f32.vlgmr.msra.gmra.mxu1 %vm338_vm3, %v1253_v44  ;;  %6528 = vst [vmem:[#allocation33_spill] sm:$0xff] %v5562_v43  ;;  %v5566_v45 = vld [vmem:[#allocation6 + $0x58] sm:$0xff]  ;;  %v5574_v44 = vld [vmem:[#allocation6 + $0x48] sm:$0xff]  ;;  %6537 = vst [vmem:[#allocation44_spill] sm:$0xff] %v5590_v18 }
 0x4fe   :  { %1867 = vmatprep.subr.mxu0 %v5155_v46  ;;  %1766 = vmatpush1.msra.mxu1 %v5554_v41  ;;  %6529 = vst [vmem:[#allocation38_spill] sm:$0xff] %v5566_v45  ;;  %v5570_v46 = vld [vmem:[#allocation6 + $0x50] sm:$0xff]  ;;  %6531 = vst [vmem:[#allocation40_spill] sm:$0xff] %v5574_v44 }
 0x4ff   :  { %1813 = vmatprep.mubr.f32.mxu1 %v6475_v57  ;;  %1767 = vmatprep.subr.mxu1 %v5558_v42  ;;  %6530 = vst [vmem:[#allocation35_spill] sm:$0xff] %v5570_v46 }
 0x500   :  { %1868 = vmatpush1.msra.mxu0 %v5158_v47  ;;  %1768 = vmatpush1.msra.mxu1 %v5562_v43  ;;  %v5578_v47 = vld [vmem:[#allocation6 + $0x40] sm:$0xff] }
 0x501   :  { %1869 = vmatprep.subr.mxu0 %v5161_v48  ;;  %1769 = vmatprep.subr.mxu1 %v5566_v45  ;;  %6532 = vst [vmem:[#allocation37_spill] sm:$0xff] %v5578_v47  ;;  %v5582_v48 = vld [vmem:[#allocation6 + $0x38] sm:$0xff] }
 0x502   :  { %1870 = vmatpush1.msra.mxu0 %v5164_v49  ;;  %1770 = vmatpush1.msra.mxu1 %v5570_v46  ;;  %6533 = vst [vmem:[#allocation42_spill] sm:$0xff] %v5582_v48  ;;  %v6534_v49 = vld [vmem:[#allocation24_spill] sm:$0xff] }
 0x503   :  { %1871 = vmatprep.subr.mxu0 %v5167_v50  ;;  %1771 = vmatprep.subr.mxu1 %v5574_v44  ;;  %v6536_v50 = vld [vmem:[#allocation25_spill] sm:$0xff] }
 0x504   :  { %1872 = vmatpush1.msra.mxu0 %v5170_v51  ;;  %1772 = vmatpush1.msra.mxu1 %v5578_v47  ;;  %v6538_v51 = vld [vmem:[#allocation26_spill] sm:$0xff]  ;;  %v5594_v47 = vld [vmem:[#allocation6 + $0x20] sm:$0xff] }
 0x505   :  { %1873 = vmatprep.subr.mxu0 %v5173_v52  ;;  %1773 = vmatprep.subr.mxu1 %v5582_v48  ;;  %6539 = vst [vmem:[#allocation41_spill] sm:$0xff] %v5594_v47  ;;  %v6540_v52 = vld [vmem:[#allocation27_spill] sm:$0xff] }
 0x506   :  { %1874 = vmatpush1.msra.mxu0 %v6534_v49  ;;  %1774 = vmatpush1.msra.mxu1 %v5586_v30  ;;  %v5598_v48 = vld [vmem:[#allocation6 + $0x18] sm:$0xff]  ;;  %v6542_v49 = vld [vmem:[#allocation28_spill] sm:$0xff]  ;;  %v5602_v30 = vld [vmem:[#allocation6 + $0x10] sm:$0xff] }
 0x507   :  { %1875 = vmatprep.subr.mxu0 %v6536_v50  ;;  %1775 = vmatprep.subr.mxu1 %v5590_v18  ;;  %6541 = vst [vmem:[#allocation46_spill] sm:$0xff] %v5598_v48  ;;  %6543 = vst [vmem:[#allocation43_spill] sm:$0xff] %v5602_v30  ;;  %v5606_v50 = vld [vmem:[#allocation6 + $0x8] sm:$0xff] }
 0x508   :  { %1876 = vmatpush1.msra.mxu0 %v6538_v51  ;;  %1776 = vmatpush1.msra.mxu1 %v5594_v47  ;;  %6544 = vst [vmem:[#allocation47_spill] sm:$0xff] %v5606_v50  ;;  %v6545_v51 = vld [vmem:[#allocation31_spill] sm:$0xff]  ;;  %v6548_v18 = vld [vmem:[#allocation21_spill] sm:$0xff] }
 0x509   :  { %1877 = vmatprep.subr.mxu0 %v6540_v52  ;;  %1777 = vmatprep.subr.mxu1 %v5598_v48  ;;  %v5610_v47 = vld [vmem:[#allocation6] sm:$0xff] }
 0x50a   :  { %1878 = vmatpush1.msra.mxu0 %v6542_v49  ;;  %1778 = vmatpush1.msra.mxu1 %v5602_v30  ;;  %6546 = vst [vmem:[#allocation24_spill] sm:$0xff] %v5610_v47  ;;  %v6547_v52 = vld [vmem:[#allocation23_spill] sm:$0xff]  ;;  %v1257_v48 = vld [vmem:[#allocation2 + $0x13] ss:$8 sm:$0x3] }
 0x50b   :  { %1911 = vmatprep.mubr.f32.mxu0 %v6475_v57  ;;  %1779 = vmatprep.subr.mxu1 %v5606_v50  ;;  %v1255_v49 = vld [vmem:[#allocation2 + $0x3] ss:$8 sm:$0x3]  ;;  %v1273_v44 = vrot.slane %v1257_v48, %v6548_v18 }
 0x50c   :  { %2032 = vmatprep.subr.mxu0 %v6545_v51  ;;  %1780 = vmatpush1.msra.mxu1 %v5610_v47  ;;  %v1262_v30 = vrot.slane %v1255_v49, %v6548_v18  ;;  %v1277_v51 = vrot.slane %v1257_v48, %v5129_v59  ;;  %v1266_v50 = vrot.slane %v1255_v49, %v5129_v59 }
 0x50d   :  { %1934 = vmatprep.subr.mxu1 %v6547_v52 }
 0x50e   :  { %v1280_v46 = vsel %vm319_vm2, %v1262_v30, %v1273_v44  ;;  %v1281_v47 = vsel %vm319_vm2, %v1266_v50, %v1277_v51  ;;  %v6549_v44 = vld [vmem:[#allocation29_spill] sm:$0xff] }
 0x598   :  { %v1351_v45 = vpop.f32.mrf.mxu0 }
 0x599   :  { %v1356_v43 = vadd.f32 %v1351_v45, %v1280_v46 }
 0x59a   :  { %v1353_v41 = vpop.f32.mrf.mxu0 }
 0x59b   :  { %v4218_v42 = vmul.f32 -1.442695, %v1356_v43  ;;  %v1357_v52 = vadd.f32 %v1353_v41, %v1281_v47 }
 0x59d   :  { %4402 = vpow2.f32 %v4218_v42 }
 0x59e   :  { %4404 = vtanh.f32 %v1357_v52 }
 0x5a8   :  { %v1520_v40 = vpop.f32.mrf.mxu0 }
 0x5aa   :  { %v4403_v27 = vpop.eup %4402  ;;  %v1522_v48 = vpop.f32.mrf.mxu0 }
 0x5ab   :  { %v1364_v60 = vadd.f32 1.0, %v4403_v27  ;;  %v4405_v43 = vpop.eup %4404  ;;  %v6550_v27 = vld [vmem:[#allocation30_spill] sm:$0xff] }
 0x5ac   :  { %v1449_v18 = vpop.f32.mrf.mxu1 }
 0x5ad   :  { %4406 = vrcp.f32 %v1364_v60  ;;  %v1521_v39 = vadd.f32 %v1520_v40, %v1449_v18 }
 0x5ae   :  { %v1451_v42 = vpop.f32.mrf.mxu1 }
 0x5af   :  { %v1525_v30 = vadd.f32 %v1521_v39, %v6549_v44  ;;  %v1523_v49 = vadd.f32 %v1522_v48, %v1451_v42 }
 0x5b1   :  { %v4222_v45 = vmul.f32 -1.442695, %v1525_v30  ;;  %v1526_v50 = vadd.f32 %v1523_v49, %v6550_v27 }
 0x5b3   :  { %4408 = vpow2.f32 %v4222_v45 }
 0x5b4   :  { %4410 = vtanh.f32 %v1526_v50 }
 0x5b8   :  { %v1689_v41 = vpop.f32.mrf.mxu0 }
 0x5ba   :  { %v4407_v46 = vpop.eup %4406  ;;  %v1691_v45 = vpop.f32.mrf.mxu0 }
 0x5bb   :  { %v1372_v59 = vmul.f32 %v4407_v46, %v4405_v43  ;;  %v6551_v43 = vld [vmem:[#allocation20_spill] sm:$0xff] }
 0x5bd   :  { %1374 = vrot.lane.b32.xlu0 %v1372_v59, %s4923_s3  ;;  %v1618_v47 = vpop.f32.mrf.mxu1 }
 0x5be   :  { %v1690_v60 = vadd.f32 %v1689_v41, %v1618_v47 }
 0x5bf   :  { %v1620_v30 = vpop.f32.mrf.mxu1 }
 0x5c0   :  { %v4409_v51 = vpop.eup %4408  ;;  %v1694_v40 = vadd.f32 %v1690_v60, %v5470_v37  ;;  %v1692_v44 = vadd.f32 %v1691_v45, %v1620_v30  ;;  %v4219_v60 = vmul.f32 -1.442695, %v1357_v52 }
 0x5c1   :  { %v1533_v18 = vadd.f32 1.0, %v4409_v51  ;;  %v4411_v42 = vpop.eup %4410 }
 0x5c2   :  { %v4226_v39 = vmul.f32 -1.442695, %v1694_v40  ;;  %v1695_v48 = vadd.f32 %v1692_v44, %v6551_v43 }
 0x5c3   :  { %4412 = vrcp.f32 %v1533_v18  ;;  %v1371_v18 = vmul.f32 %v4407_v46, %v5482_v19 }
 0x5c4   :  { %4414 = vpow2.f32 %v4226_v39  ;;  %v4223_v39 = vmul.f32 -1.442695, %v1526_v50 }
 0x5c5   :  { %4416 = vtanh.f32 %v1695_v48 }
 0x5d0   :  { %v4413_v59 = vpop.eup %4412 }
 0x5d1   :  { %v4415_v1 = vpop.eup %4414  ;;  %v1541_v3 = vmul.f32 %v4413_v59, %v4411_v42  ;;  %v4227_v42 = vmul.f32 -1.442695, %v1695_v48  ;;  %v1540_v52 = vmul.f32 %v4413_v59, %v5490_v33  ;;  %v6561_v33 = vld [vmem:[#allocation55_spill] sm:$0xff]  ;;  %v6569_v48 = vld [vmem:[#allocation37_spill] sm:$0xff] }
 0x5d2   :  { %v1702_v4 = vadd.f32 1.0, %v4415_v1  ;;  %v4417_v49 = vpop.eup %4416  ;;  %v5738_v59 = vld [vmem:[#allocation9 + $0x18] sm:$0xff] }
 0x5d3   :  { %1543 = vrot.lane.b32.xlu1 %v1541_v3, %s4923_s3 }
 0x5d4   :  { %4418 = vrcp.f32 %v1702_v4 }
 0x5d5   :  { %4420 = vpow2.f32 %v4219_v60  ;;  %v5746_v60 = vld [vmem:[#allocation9 + $0x8] sm:$0xff] }
 0x5e1   :  { %v4419_v41 = vpop.eup %4418 }
 0x5e2   :  { %v1710_v47 = vmul.f32 %v4419_v41, %v4417_v49  ;;  %v4421_v51 = vpop.eup %4420  ;;  %v6570_v49 = vld [vmem:[#allocation42_spill] sm:$0xff] }
 0x5e3   :  { %v1365_v40 = vadd.f32 1.0, %v4421_v51  ;;  %v6572_v51 = vld [vmem:[#allocation44_spill] sm:$0xff] }
 0x5e4   :  { %1712 = vrot.lane.b32.xlu0 %v1710_v47, %s4923_s3  ;;  %v6571_v47 = vld [vmem:[#allocation39_spill] sm:$0xff] }
 0x5e5   :  { %4422 = vrcp.f32 %v1365_v40  ;;  %v5750_v40 = vld [vmem:[#allocation9] sm:$0xff] }
 0x5f2   :  { %v4423_v1 = vpop.eup %4422 }
 0x62f   :  { %v1375_v44 = vpop.permute.xlu0 %1374 }
 0x630   :  { %v5628_v30 = vadd.f32 %v1375_v44, %v1371_v18  ;;  %v6573_v18 = vld [vmem:[#allocation41_spill] sm:$0xff]  ;;  %v6574_v44 = vld [vmem:[#allocation46_spill] sm:$0xff] }
 0x632   :  { %4424 = vtanh.f32 %v5628_v30 }
 0x633   :  { %4426 = vpow2.f32 %v4223_v39  ;;  %v5756_v39 = vld [vmem:[#allocation12 + $0x78] sm:$0xff] }
 0x634   :  { %4428 = vpow2.f32 %v4227_v42  ;;  %v1721_v42 = vld [vmem:[#allocation2 + $0x14] ss:$8 sm:$0x3] }
 0x63f   :  { %v4425_v4 = vpop.eup %4424 }
 0x640   :  { %v1379_v3 = vmul.f32 %v4425_v4, %v4423_v1  ;;  %v4427_v45 = vpop.eup %4426  ;;  %v6575_v1 = vld [vmem:[#allocation43_spill] sm:$0xff] }
 0x641   :  { %v1534_v19 = vadd.f32 1.0, %v4427_v45  ;;  %v6576_v4 = vld [vmem:[#allocation47_spill] sm:$0xff] }
 0x642   :  { %4228 = vmatmul.mubr.msk.f32.vlgmr.msra.gmra.mxu1 %vm338_vm3, %v1379_v3  ;;  %v5762_v45 = vld [vmem:[#allocation8 + $0x78] sm:$0xff] }
 0x643   :  { %1935 = vmatpush1.msra.mxu1 %v5213_v6  ;;  %1982 = vmatprep.mubr.f32.mxu1 %v6475_v57  ;;  %4430 = vrcp.f32 %v1534_v19  ;;  %v4429_v6 = vpop.eup %4428  ;;  %v1719_v19 = vld [vmem:[#allocation2 + $0x4] ss:$8 sm:$0x3] }
 0x644   :  { %1936 = vmatprep.subr.mxu1 %v5215_v7 }
 0x645   :  { %1937 = vmatpush1.msra.mxu1 %v5218_v8  ;;  %v1544_v46 = vpop.permute.xlu1 %1543  ;;  %v1703_v8 = vadd.f32 1.0, %v4429_v6 }
 0x646   :  { %1938 = vmatprep.subr.mxu1 %v5221_v9  ;;  %v5638_v50 = vadd.f32 %v1544_v46, %v1540_v52  ;;  %v6578_v52 = vld [vmem:[#allocation21_spill] sm:$0xff] }
 0x647   :  { %1939 = vmatpush1.msra.mxu1 %v5225_v12  ;;  %v1709_v12 = vmul.f32 %v4419_v41, %v5512_v53  ;;  %v5704_v53 = vld [vmem:[#allocation9 + $0x58] sm:$0xff]  ;;  %v5742_v41 = vld [vmem:[#allocation9 + $0x10] sm:$0xff]  ;;  %v1737_v46 = vrot.slane %v1721_v42, %v6578_v52  ;;  %v1726_v6 = vrot.slane %v1719_v19, %v6578_v52 }
 0x648   :  { %1940 = vmatprep.subr.mxu1 %v5228_v13  ;;  %4432 = vtanh.f32 %v5638_v50 }
 0x649   :  { %1941 = vmatpush1.msra.mxu1 %v5231_v16  ;;  %4434 = vrcp.f32 %v1703_v8 }
 0x64a   :  { %1942 = vmatprep.subr.mxu1 %v5234_v17 }
 0x64b   :  { %1943 = vmatpush1.msra.mxu1 %v5237_v20  ;;  %v6552_v20 = vld [vmem:[#allocation45_spill] sm:$0xff] }
 0x64c   :  { %1944 = vmatprep.subr.mxu1 %v5240_v23  ;;  %v6553_v23 = vld [vmem:[#allocation52_spill] sm:$0xff] }
 0x64d   :  { %1945 = vmatpush1.msra.mxu1 %v5243_v26  ;;  %v6554_v26 = vld [vmem:[#allocation48_spill] sm:$0xff] }
 0x64e   :  { %1946 = vmatprep.subr.mxu1 %v5246_v29  ;;  %v6555_v29 = vld [vmem:[#allocation49_spill] sm:$0xff] }
 0x64f   :  { %1947 = vmatpush1.msra.mxu1 %v5249_v32  ;;  %v6556_v32 = vld [vmem:[#allocation50_spill] sm:$0xff] }
 0x650   :  { %1948 = vmatprep.subr.mxu1 %v5252_v35  ;;  %v4431_v7 = vpop.eup %4430  ;;  %v5688_v35 = vld [vmem:[#allocation9 + $0x78] sm:$0xff] }
 0x651   :  { %1949 = vmatpush1.msra.mxu1 %v5255_v36  ;;  %v6557_v36 = vld [vmem:[#allocation51_spill] sm:$0xff] }
 0x652   :  { %4232 = vmatmul.mubr.msk.f32.vlgmr.msra.gmra.mxu1 %vm338_vm3, %v1379_v3  ;;  %2103 = vmatprep.subr.mxu1 %v5322_v58  ;;  %v5692_v58 = vld [vmem:[#allocation9 + $0x70] sm:$0xff]  ;;  %v6577_v3 = vld [vmem:[#allocation24_spill] sm:$0xff] }
 0x653   :  { %2104 = vmatpush1.msra.mxu1 %v5325_v2  ;;  %2151 = vmatprep.mubr.f32.mxu1 %v6475_v57  ;;  %6558 = vst [vmem:[#allocation25_spill] sm:$0xff] %v5692_v58 }
 0x654   :  { %2105 = vmatprep.subr.mxu1 %v5328_v56  ;;  %v6559_v56 = vld [vmem:[#allocation53_spill] sm:$0xff] }
 0x655   :  { %2106 = vmatpush1.msra.mxu1 %v6508_v25  ;;  %v4433_v9 = vpop.eup %4432 }
 0x656   :  { %2107 = vmatprep.subr.mxu1 %v6509_v28  ;;  %v1713_v13 = vpop.permute.xlu0 %1712  ;;  %v1548_v16 = vmul.f32 %v4433_v9, %v4431_v7  ;;  %v4435_v2 = vpop.eup %4434  ;;  %v6562_v28 = vld [vmem:[#allocation32_spill] sm:$0xff]  ;;  %v1744_v7 = vsel %vm319_vm2, %v1726_v6, %v1737_v46 }
 0x657   :  { %2108 = vmatpush1.msra.mxu1 %v6510_v21  ;;  %v5661_v17 = vadd.f32 %v1713_v13, %v1709_v12  ;;  %v5708_v21 = vld [vmem:[#allocation9 + $0x50] sm:$0xff] }
 0x658   :  { %2109 = vmatprep.subr.mxu1 %v6512_v10  ;;  %4231 = vmatmul.mubr.msk.f32.vlgmr.msra.gmra.mxu0 %vm338_vm3, %v1548_v16  ;;  %v6563_v10 = vld [vmem:[#allocation34_spill] sm:$0xff] }
 0x659   :  { %2110 = vmatpush1.msra.mxu1 %v6514_v55  ;;  %4436 = vtanh.f32 %v5661_v17  ;;  %2033 = vmatpush1.msra.mxu0 %v6511_v15  ;;  %v5712_v15 = vld [vmem:[#allocation9 + $0x48] sm:$0xff]  ;;  %v5718_v55 = vld [vmem:[#allocation9 + $0x40] sm:$0xff]  ;;  %v6579_v13 = vld [vmem:[#allocation22_spill] sm:$0xff] }
 0x65a   :  { %2111 = vmatprep.subr.mxu1 %v6516_v22  ;;  %2034 = vmatprep.subr.mxu0 %v6513_v38  ;;  %v6564_v38 = vld [vmem:[#allocation36_spill] sm:$0xff]  ;;  %v5722_v22 = vld [vmem:[#allocation9 + $0x38] sm:$0xff] }
 0x65b   :  { %2112 = vmatpush1.msra.mxu1 %v6518_v5  ;;  %2035 = vmatpush1.msra.mxu0 %v6515_v11  ;;  %v6565_v11 = vld [vmem:[#allocation33_spill] sm:$0xff] }
 0x65c   :  { %2113 = vmatprep.subr.mxu1 %v6520_v54  ;;  %2036 = vmatprep.subr.mxu0 %v6517_v14  ;;  %v6566_v14 = vld [vmem:[#allocation38_spill] sm:$0xff]  ;;  %v5730_v54 = vld [vmem:[#allocation9 + $0x28] sm:$0xff] }
 0x65d   :  { %2114 = vmatpush1.msra.mxu1 %v5379_v34  ;;  %2037 = vmatpush1.msra.mxu0 %v6519_v0  ;;  %v5726_v5 = vld [vmem:[#allocation9 + $0x30] sm:$0xff]  ;;  %v6567_v0 = vld [vmem:[#allocation35_spill] sm:$0xff] }
 0x65e   :  { %2115 = vmatprep.subr.mxu1 %v5385_v62  ;;  %2038 = vmatprep.subr.mxu0 %v6521_v31  ;;  %v6560_v62 = vld [vmem:[#allocation54_spill] sm:$0xff]  ;;  %v6568_v31 = vld [vmem:[#allocation40_spill] sm:$0xff] }
 0x65f   :  { %2116 = vmatpush1.msra.mxu1 %v5391_v61  ;;  %2039 = vmatpush1.msra.mxu0 %v6552_v20  ;;  %v5700_v61 = vld [vmem:[#allocation9 + $0x60] sm:$0xff]  ;;  %v1730_v20 = vrot.slane %v1719_v19, %v6579_v13 }
 0x660   :  { %2117 = vmatprep.subr.mxu1 %v5397_v63  ;;  %2040 = vmatprep.subr.mxu0 %v6523_v24  ;;  %v5696_v63 = vld [vmem:[#allocation9 + $0x68] sm:$0xff]  ;;  %v5734_v24 = vld [vmem:[#allocation9 + $0x20] sm:$0xff] }
 0x661   :  { %2118 = vmatpush1.msra.mxu1 %v6553_v23  ;;  %2041 = vmatpush1.msra.mxu0 %v6554_v26 }
 0x662   :  { %4236 = vmatmul.mubr.msk.f32.vlgmr.msra.gmra.mxu1 %vm338_vm3, %v1548_v16  ;;  %2042 = vmatprep.subr.mxu0 %v6555_v29  ;;  %v1741_v16 = vrot.slane %v1721_v42, %v6579_v13 }
 0x663   :  { %2080 = vmatprep.mubr.f32.mxu0 %v6475_v57  ;;  %2043 = vmatpush1.msra.mxu0 %v6556_v32 }
 0x664   :  { %2327 = vmatprep.subr.mxu1 %v5688_v35  ;;  %2044 = vmatprep.subr.mxu0 %v6557_v36  ;;  %v1745_v26 = vsel %vm319_vm2, %v1730_v20, %v1741_v16 }
 0x665   :  { %2328 = vmatpush1.msra.mxu1 %v5692_v58  ;;  %2045 = vmatpush1.msra.mxu0 %v6559_v56 }
 0x666   :  { %2329 = vmatprep.subr.mxu1 %v5696_v63  ;;  %v4437_v34 = vpop.eup %4436  ;;  %2046 = vmatprep.subr.mxu0 %v6560_v62  ;;  %v6580_v62 = vld [vmem:[#allocation29_spill] sm:$0xff] }
 0x667   :  { %2330 = vmatpush1.msra.mxu1 %v5700_v61  ;;  %2047 = vmatpush1.msra.mxu0 %v6561_v33  ;;  %v1717_v25 = vmul.f32 %v4437_v34, %v4435_v2 }
 0x668   :  { %2331 = vmatprep.subr.mxu1 %v5704_v53  ;;  %2229 = vmatprep.subr.mxu0 %v6562_v28 }
 0x669   :  { %2332 = vmatpush1.msra.mxu1 %v5708_v21  ;;  %4235 = vmatmul.mubr.msk.f32.vlgmr.msra.gmra.mxu0 %vm338_vm3, %v1717_v25 }
 0x66a   :  { %2333 = vmatprep.subr.mxu1 %v5712_v15  ;;  %2230 = vmatpush1.msra.mxu0 %v6563_v10 }
 0x66b   :  { %2277 = vmatprep.mubr.f32.mxu0 %v6475_v57  ;;  %2231 = vmatprep.subr.mxu0 %v6564_v38 }
 0x66c   :  { %2334 = vmatpush1.msra.mxu1 %v5718_v55  ;;  %2232 = vmatpush1.msra.mxu0 %v6565_v11 }
 0x66d   :  { %2335 = vmatprep.subr.mxu1 %v5722_v22  ;;  %2233 = vmatprep.subr.mxu0 %v6566_v14 }
 0x66e   :  { %2336 = vmatpush1.msra.mxu1 %v5726_v5  ;;  %2234 = vmatpush1.msra.mxu0 %v6567_v0 }
 0x66f   :  { %2337 = vmatprep.subr.mxu1 %v5730_v54  ;;  %2235 = vmatprep.subr.mxu0 %v6568_v31 }
 0x670   :  { %2338 = vmatpush1.msra.mxu1 %v5734_v24  ;;  %2236 = vmatpush1.msra.mxu0 %v6569_v48 }
 0x671   :  { %2339 = vmatprep.subr.mxu1 %v5738_v59  ;;  %2237 = vmatprep.subr.mxu0 %v6570_v49 }
 0x672   :  { %2340 = vmatpush1.msra.mxu1 %v5742_v41  ;;  %2238 = vmatpush1.msra.mxu0 %v6571_v47 }
 0x673   :  { %2341 = vmatprep.subr.mxu1 %v5746_v60  ;;  %2239 = vmatprep.subr.mxu0 %v6572_v51 }
 0x674   :  { %2342 = vmatpush1.msra.mxu1 %v5750_v40  ;;  %2240 = vmatpush1.msra.mxu0 %v6573_v18 }
 0x675   :  { %2375 = vmatprep.mubr.f32.mxu1 %v6475_v57  ;;  %2241 = vmatprep.subr.mxu0 %v6574_v44 }
 0x676   :  { %2496 = vmatprep.subr.mxu1 %v5756_v39  ;;  %2242 = vmatpush1.msra.mxu0 %v6575_v1 }
 0x677   :  { %2243 = vmatprep.subr.mxu0 %v6576_v4 }
 0x678   :  { %2244 = vmatpush1.msra.mxu0 %v6577_v3 }
 0x679   :  { %2398 = vmatprep.subr.mxu0 %v5762_v45 }
 0x702   :  { %v1815_v8 = vpop.f32.mrf.mxu1 }
 0x703   :  { %v1820_v9 = vadd.f32 %v1815_v8, %v1744_v7 }
 0x704   :  { %v1817_v23 = vpop.f32.mrf.mxu1 }
 0x705   :  { %v4229_v12 = vmul.f32 -1.442695, %v1820_v9  ;;  %v1821_v29 = vadd.f32 %v1817_v23, %v1745_v26 }
 0x707   :  { %4438 = vpow2.f32 %v4229_v12 }
 0x708   :  { %4440 = vtanh.f32 %v1821_v29 }
 0x712   :  { %v1984_v2 = vpop.f32.mrf.mxu1 }
 0x714   :  { %v4439_v32 = vpop.eup %4438  ;;  %v1986_v19 = vpop.f32.mrf.mxu1 }
 0x715   :  { %v1828_v36 = vadd.f32 1.0, %v4439_v32  ;;  %v4441_v46 = vpop.eup %4440 }
 0x717   :  { %4442 = vrcp.f32 %v1828_v36 }
 0x718   :  { %v1913_v56 = vpop.f32.mrf.mxu0 }
 0x719   :  { %v1985_v34 = vadd.f32 %v1984_v2, %v1913_v56 }
 0x71a   :  { %v1915_v42 = vpop.f32.mrf.mxu0 }
 0x71b   :  { %v1989_v33 = vadd.f32 %v1985_v34, %v6580_v62  ;;  %v1987_v8 = vadd.f32 %v1986_v19, %v1915_v42 }
 0x71d   :  { %v4233_v25 = vmul.f32 -1.442695, %v1989_v33  ;;  %v1990_v16 = vadd.f32 %v1987_v8, %v6550_v27 }
 0x71f   :  { %4444 = vpow2.f32 %v4233_v25 }
 0x720   :  { %4446 = vtanh.f32 %v1990_v16 }
 0x722   :  { %v2153_v9 = vpop.f32.mrf.mxu1 }
 0x724   :  { %v4443_v6 = vpop.eup %4442  ;;  %v2155_v56 = vpop.f32.mrf.mxu1 }
 0x725   :  { %v1836_v7 = vmul.f32 %v4443_v6, %v4441_v46 }
 0x727   :  { %1838 = vrot.lane.b32.xlu1 %v1836_v7, %s4923_s3 }
 0x729   :  { %v2082_v12 = vpop.f32.mrf.mxu0 }
 0x72a   :  { %v2154_v20 = vadd.f32 %v2153_v9, %v2082_v12 }
 0x72b   :  { %v2084_v2 = vpop.f32.mrf.mxu0 }
 0x72c   :  { %v4445_v23 = vpop.eup %4444  ;;  %v2158_v26 = vadd.f32 %v2154_v20, %v5470_v37  ;;  %v2156_v34 = vadd.f32 %v2155_v56, %v2084_v2  ;;  %v4230_v20 = vmul.f32 -1.442695, %v1821_v29  ;;  %v4234_v56 = vmul.f32 -1.442695, %v1990_v16 }
 0x72d   :  { %v1997_v32 = vadd.f32 1.0, %v4445_v23  ;;  %v4447_v33 = vpop.eup %4446 }
 0x72e   :  { %v4237_v36 = vmul.f32 -1.442695, %v2158_v26  ;;  %v2159_v25 = vadd.f32 %v2156_v34, %v6551_v43 }
 0x72f   :  { %4448 = vrcp.f32 %v1997_v32  ;;  %v1835_v32 = vmul.f32 %v4443_v6, %v5628_v30  ;;  %v5790_v30 = vld [vmem:[#allocation8 + $0x68] sm:$0xff]  ;;  %v5793_v6 = vld [vmem:[#allocation8 + $0x60] sm:$0xff] }
 0x730   :  { %4450 = vpow2.f32 %v4237_v36  ;;  %v4238_v29 = vmul.f32 -1.442695, %v2159_v25 }
 0x731   :  { %4452 = vtanh.f32 %v2159_v25 }
 0x73c   :  { %v4449_v46 = vpop.eup %4448 }
 0x73d   :  { %v4451_v42 = vpop.eup %4450  ;;  %v2005_v7 = vmul.f32 %v4449_v46, %v4447_v33  ;;  %v2004_v25 = vmul.f32 %v4449_v46, %v5638_v50  ;;  %v5815_v50 = vld [vmem:[#allocation8 + $0x30] sm:$0xff]  ;;  %v5818_v46 = vld [vmem:[#allocation8 + $0x28] sm:$0xff] }
 0x73e   :  { %v2166_v19 = vadd.f32 1.0, %v4451_v42  ;;  %v4453_v8 = vpop.eup %4452  ;;  %6581 = vst [vmem:[#allocation26_spill] sm:$0xff] %v5815_v50  ;;  %6582 = vst [vmem:[#allocation27_spill] sm:$0xff] %v5818_v46 }
 0x73f   :  { %2007 = vrot.lane.b32.xlu0 %v2005_v7, %s4923_s3 }
 0x740   :  { %4454 = vrcp.f32 %v2166_v19  ;;  %v5786_v19 = vld [vmem:[#allocation8 + $0x70] sm:$0xff] }
 0x741   :  { %4456 = vpow2.f32 %v4230_v20 }
 0x74d   :  { %v5777_v9 = vpop.eup %4454 }
 0x74e   :  { %v2174_v12 = vmul.f32 %v5777_v9, %v4453_v8  ;;  %v4457_v23 = vpop.eup %4456  ;;  %v5796_v8 = vld [vmem:[#allocation8 + $0x58] sm:$0xff] }
 0x74f   :  { %v1829_v26 = vadd.f32 1.0, %v4457_v23  ;;  %v5803_v23 = vld [vmem:[#allocation8 + $0x48] sm:$0xff] }
 0x750   :  { %2176 = vrot.lane.b32.xlu1 %v2174_v12, %s4923_s3  ;;  %v5800_v12 = vld [vmem:[#allocation8 + $0x50] sm:$0xff] }
 0x751   :  { %4458 = vrcp.f32 %v1829_v26 }
 0x75e   :  { %v4459_v34 = vpop.eup %4458 }
 0x799   :  { %v1839_v36 = vpop.permute.xlu1 %1838 }
 0x79a   :  { %v5782_v2 = vadd.f32 %v1839_v36, %v1835_v32  ;;  %v5808_v32 = vld [vmem:[#allocation8 + $0x40] sm:$0xff]  ;;  %v5811_v36 = vld [vmem:[#allocation8 + $0x38] sm:$0xff] }
 0x79c   :  { %4460 = vtanh.f32 %v5782_v2 }
 0x79d   :  { %4462 = vpow2.f32 %v4234_v56  ;;  %v5821_v56 = vld [vmem:[#allocation8 + $0x20] sm:$0xff] }
 0x79e   :  { %4464 = vpow2.f32 %v4238_v29  ;;  %6583 = vst [vmem:[#allocation28_spill] sm:$0xff] %v5821_v56  ;;  %v5833_v29 = vld [vmem:[#allocation8] sm:$0xff] }
 0x79f   :  { %6587 = vst [vmem:[#allocation20_spill] sm:$0xff] %v5833_v29 }
 0x7a9   :  { %v4461_v33 = vpop.eup %4460 }
 0x7aa   :  { %v1843_v42 = vmul.f32 %v4461_v33, %v4459_v34  ;;  %v4463_v7 = vpop.eup %4462  ;;  %v5824_v34 = vld [vmem:[#allocation8 + $0x18] sm:$0xff]  ;;  %v5827_v33 = vld [vmem:[#allocation8 + $0x10] sm:$0xff] }
 0x7ab   :  { %v1998_v16 = vadd.f32 1.0, %v4463_v7  ;;  %6584 = vst [vmem:[#allocation31_spill] sm:$0xff] %v5824_v34  ;;  %6585 = vst [vmem:[#allocation23_spill] sm:$0xff] %v5827_v33  ;;  %v5830_v7 = vld [vmem:[#allocation8 + $0x8] sm:$0xff] }
 0x7ac   :  { %4239 = vmatmul.mubr.msk.f32.vlgmr.msra.gmra.mxu0 %vm338_vm3, %v1843_v42  ;;  %6586 = vst [vmem:[#allocation30_spill] sm:$0xff] %v5830_v7 }
 0x7ad   :  { %2399 = vmatpush1.msra.mxu0 %v5786_v19  ;;  %2446 = vmatprep.mubr.f32.mxu0 %v6475_v57  ;;  %4466 = vrcp.f32 %v1998_v16  ;;  %v5837_v16 = vld [vmem:[#allocation11 + $0x78] sm:$0xff] }
 0x7ae   :  { %2400 = vmatprep.subr.mxu0 %v5790_v30  ;;  %6588 = vst [vmem:[#allocation45_spill] sm:$0xff] %v5837_v16 }
 0x7af   :  { %2401 = vmatpush1.msra.mxu0 %v5793_v6 }
 0x7b0   :  { %2402 = vmatprep.subr.mxu0 %v5796_v8 }
 0x7b1   :  { %2403 = vmatpush1.msra.mxu0 %v5800_v12  ;;  %v2008_v20 = vpop.permute.xlu0 %2007 }
 0x7b2   :  { %2404 = vmatprep.subr.mxu0 %v5803_v23  ;;  %v5806_v26 = vadd.f32 %v2008_v20, %v2004_v25  ;;  %v5840_v25 = vld [vmem:[#allocation11 + $0x70] sm:$0xff]  ;;  %v4465_v20 = vpop.eup %4464 }
 0x7b3   :  { %2405 = vmatpush1.msra.mxu0 %v5808_v32  ;;  %6589 = vst [vmem:[#allocation52_spill] sm:$0xff] %v5840_v25 }
 0x7b4   :  { %2406 = vmatprep.subr.mxu0 %v5811_v36  ;;  %4468 = vtanh.f32 %v5806_v26 }
 0x7b5   :  { %2407 = vmatpush1.msra.mxu0 %v5815_v50 }
 0x7b6   :  { %2408 = vmatprep.subr.mxu0 %v5818_v46  ;;  %v5858_v46 = vld [vmem:[#allocation11 + $0x48] sm:$0xff] }
 0x7b7   :  { %2409 = vmatpush1.msra.mxu0 %v5821_v56  ;;  %v2173_v56 = vmul.f32 %v5777_v9, %v5661_v17  ;;  %6593 = vst [vmem:[#allocation51_spill] sm:$0xff] %v5858_v46  ;;  %v5870_v17 = vld [vmem:[#allocation11 + $0x30] sm:$0xff] }
 0x7b8   :  { %2410 = vmatprep.subr.mxu0 %v5824_v34  ;;  %v5853_v34 = vld [vmem:[#allocation11 + $0x50] sm:$0xff] }
 0x7b9   :  { %2411 = vmatpush1.msra.mxu0 %v5827_v33  ;;  %v5844_v33 = vld [vmem:[#allocation11 + $0x68] sm:$0xff]  ;;  %v5874_v9 = vld [vmem:[#allocation12 + $0x70] sm:$0xff] }
 0x7ba   :  { %2412 = vmatprep.subr.mxu0 %v5830_v7  ;;  %6590 = vst [vmem:[#allocation48_spill] sm:$0xff] %v5844_v33  ;;  %v5847_v7 = vld [vmem:[#allocation11 + $0x60] sm:$0xff]  ;;  %6595 = vst [vmem:[#allocation54_spill] sm:$0xff] %v5874_v9 }
 0x7bb   :  { %2413 = vmatpush1.msra.mxu0 %v5833_v29  ;;  %6591 = vst [vmem:[#allocation49_spill] sm:$0xff] %v5847_v7  ;;  %v2167_v29 = vadd.f32 1.0, %v4465_v20  ;;  %v5866_v20 = vld [vmem:[#allocation11 + $0x38] sm:$0xff] }
 0x7bc   :  { %4243 = vmatmul.mubr.msk.f32.vlgmr.msra.gmra.mxu0 %vm338_vm3, %v1843_v42  ;;  %2567 = vmatprep.subr.mxu0 %v5837_v16  ;;  %v5850_v42 = vld [vmem:[#allocation11 + $0x58] sm:$0xff]  ;;  %v4467_v16 = vpop.eup %4466  ;;  %6594 = vst [vmem:[#allocation53_spill] sm:$0xff] %v5866_v20 }
 0x7bd   :  { %2568 = vmatpush1.msra.mxu0 %v5840_v25  ;;  %2615 = vmatprep.mubr.f32.mxu0 %v6475_v57  ;;  %6592 = vst [vmem:[#allocation50_spill] sm:$0xff] %v5850_v42  ;;  %4470 = vrcp.f32 %v2167_v29  ;;  %v5886_v29 = vld [vmem:[#allocation12 + $0x60] sm:$0xff] }
 0x7be   :  { %2569 = vmatprep.subr.mxu0 %v5844_v33  ;;  %6599 = vst [vmem:[#allocation36_spill] sm:$0xff] %v5886_v29 }
 0x7bf   :  { %2570 = vmatpush1.msra.mxu0 %v5847_v7  ;;  %v5861_v7 = vld [vmem:[#allocation11 + $0x40] sm:$0xff] }
 0x7c0   :  { %2571 = vmatprep.subr.mxu0 %v5850_v42 }
 0x7c1   :  { %2572 = vmatpush1.msra.mxu0 %v5853_v34  ;;  %v4469_v25 = vpop.eup %4468 }
 0x7c2   :  { %2573 = vmatprep.subr.mxu0 %v5858_v46  ;;  %v2177_v33 = vpop.permute.xlu1 %2176  ;;  %v2012_v42 = vmul.f32 %v4469_v25, %v4467_v16  ;;  %v5877_v16 = vld [vmem:[#allocation11 + $0x28] sm:$0xff]  ;;  %v5889_v25 = vld [vmem:[#allocation11 + $0x18] sm:$0xff] }
 0x7c3   :  { %2574 = vmatpush1.msra.mxu0 %v5861_v7  ;;  %v5864_v50 = vadd.f32 %v2177_v33, %v2173_v56  ;;  %6596 = vst [vmem:[#allocation55_spill] sm:$0xff] %v5877_v16  ;;  %v5880_v56 = vld [vmem:[#allocation12 + $0x68] sm:$0xff]  ;;  %v5883_v33 = vld [vmem:[#allocation11 + $0x20] sm:$0xff]  ;;  %6600 = vst [vmem:[#allocation33_spill] sm:$0xff] %v5889_v25 }
 0x7c4   :  { %2575 = vmatprep.subr.mxu0 %v5866_v20  ;;  %4242 = vmatmul.mubr.msk.f32.vlgmr.msra.gmra.mxu1 %vm338_vm3, %v2012_v42  ;;  %6597 = vst [vmem:[#allocation32_spill] sm:$0xff] %v5880_v56  ;;  %6598 = vst [vmem:[#allocation34_spill] sm:$0xff] %v5883_v33 }
 0x7c5   :  { %2576 = vmatpush1.msra.mxu0 %v5870_v17  ;;  %4472 = vtanh.f32 %v5864_v50  ;;  %2497 = vmatpush1.msra.mxu1 %v5874_v9  ;;  %v5892_v9 = vld [vmem:[#allocation12 + $0x58] sm:$0xff] }
 0x7c6   :  { %2577 = vmatprep.subr.mxu0 %v5877_v16  ;;  %2498 = vmatprep.subr.mxu1 %v5880_v56  ;;  %6601 = vst [vmem:[#allocation38_spill] sm:$0xff] %v5892_v9  ;;  %v5895_v16 = vld [vmem:[#allocation11 + $0x10] sm:$0xff] }
 0x7c7   :  { %2578 = vmatpush1.msra.mxu0 %v5883_v33  ;;  %2499 = vmatpush1.msra.mxu1 %v5886_v29  ;;  %6602 = vst [vmem:[#allocation35_spill] sm:$0xff] %v5895_v16  ;;  %v5898_v56 = vld [vmem:[#allocation12 + $0x50] sm:$0xff]  ;;  %v5901_v33 = vld [vmem:[#allocation11 + $0x8] sm:$0xff] }
 0x7c8   :  { %2579 = vmatprep.subr.mxu0 %v5889_v25  ;;  %2500 = vmatprep.subr.mxu1 %v5892_v9  ;;  %6603 = vst [vmem:[#allocation40_spill] sm:$0xff] %v5898_v56  ;;  %6604 = vst [vmem:[#allocation37_spill] sm:$0xff] %v5901_v33  ;;  %v5904_v29 = vld [vmem:[#allocation12 + $0x48] sm:$0xff]  ;;  %v5907_v25 = vld [vmem:[#allocation11] sm:$0xff] }
 0x7c9   :  { %2580 = vmatpush1.msra.mxu0 %v5895_v16  ;;  %2501 = vmatpush1.msra.mxu1 %v5898_v56  ;;  %6605 = vst [vmem:[#allocation42_spill] sm:$0xff] %v5904_v29  ;;  %v5910_v9 = vld [vmem:[#allocation12 + $0x40] sm:$0xff]  ;;  %v5914_v16 = vld [vmem:[#allocation12 + $0x38] sm:$0xff]  ;;  %v5918_v56 = vld [vmem:[#allocation12 + $0x30] sm:$0xff] }
 0x7ca   :  { %2581 = vmatprep.subr.mxu0 %v5901_v33  ;;  %2502 = vmatprep.subr.mxu1 %v5904_v29  ;;  %6606 = vst [vmem:[#allocation39_spill] sm:$0xff] %v5910_v9  ;;  %6607 = vst [vmem:[#allocation44_spill] sm:$0xff] %v5914_v16  ;;  %v5922_v29 = vld [vmem:[#allocation12 + $0x28] sm:$0xff] }
 0x7cb   :  { %2582 = vmatpush1.msra.mxu0 %v5907_v25  ;;  %2503 = vmatpush1.msra.mxu1 %v5910_v9  ;;  %6608 = vst [vmem:[#allocation41_spill] sm:$0xff] %v5918_v56  ;;  %6609 = vst [vmem:[#allocation46_spill] sm:$0xff] %v5922_v29  ;;  %v5926_v9 = vld [vmem:[#allocation12 + $0x20] sm:$0xff] }
 0x7cc   :  { %4247 = vmatmul.mubr.msk.f32.vlgmr.msra.gmra.mxu0 %vm338_vm3, %v2012_v42  ;;  %2504 = vmatprep.subr.mxu1 %v5914_v16  ;;  %6610 = vst [vmem:[#allocation43_spill] sm:$0xff] %v5926_v9  ;;  %v5930_v42 = vld [vmem:[#allocation12 + $0x18] sm:$0xff]  ;;  %v5934_v16 = vld [vmem:[#allocation12 + $0x10] sm:$0xff] }
 0x7cd   :  { %2544 = vmatprep.mubr.f32.mxu1 %v6475_v57  ;;  %2505 = vmatpush1.msra.mxu1 %v5918_v56  ;;  %6611 = vst [vmem:[#allocation47_spill] sm:$0xff] %v5930_v42  ;;  %v4471_v56 = vpop.eup %4470 }
 0x7ce   :  { %2791 = vmatprep.subr.mxu0 %v5688_v35  ;;  %2506 = vmatprep.subr.mxu1 %v5922_v29 }
 0x7cf   :  { %2792 = vmatpush1.msra.mxu0 %v5692_v58  ;;  %2507 = vmatpush1.msra.mxu1 %v5926_v9  ;;  %v5938_v58 = vld [vmem:[#allocation12 + $0x8] sm:$0xff]  ;;  %v5942_v9 = vld [vmem:[#allocation12] sm:$0xff] }
 0x7d0   :  { %2793 = vmatprep.subr.mxu0 %v5696_v63  ;;  %2508 = vmatprep.subr.mxu1 %v5930_v42  ;;  %6612 = vst [vmem:[#allocation24_spill] sm:$0xff] %v5942_v9 }
 0x7d1   :  { %2794 = vmatpush1.msra.mxu0 %v5700_v61  ;;  %2509 = vmatpush1.msra.mxu1 %v5934_v16 }
 0x7d2   :  { %2795 = vmatprep.subr.mxu0 %v5704_v53  ;;  %v4473_v29 = vpop.eup %4472  ;;  %2510 = vmatprep.subr.mxu1 %v5938_v58 }
 0x7d3   :  { %2796 = vmatpush1.msra.mxu0 %v5708_v21  ;;  %2511 = vmatpush1.msra.mxu1 %v5942_v9  ;;  %v2181_v42 = vmul.f32 %v4473_v29, %v4471_v56 }
 0x7d4   :  { %2797 = vmatprep.subr.mxu0 %v5712_v15  ;;  %2693 = vmatprep.subr.mxu1 %v6562_v28  ;;  %v2185_v28 = vld [vmem:[#allocation2 + $0x15] ss:$8 sm:$0x3] }
 0x7d5   :  { %2798 = vmatpush1.msra.mxu0 %v5718_v55  ;;  %4246 = vmatmul.mubr.msk.f32.vlgmr.msra.gmra.mxu1 %vm338_vm3, %v2181_v42 }
 0x7d6   :  { %2799 = vmatprep.subr.mxu0 %v5722_v22  ;;  %2694 = vmatpush1.msra.mxu1 %v6563_v10  ;;  %v2183_v10 = vld [vmem:[#allocation2 + $0x5] ss:$8 sm:$0x3] }
 0x7d7   :  { %2741 = vmatprep.mubr.f32.mxu1 %v6475_v57  ;;  %2695 = vmatprep.subr.mxu1 %v6564_v38  ;;  %v2201_v38 = vrot.slane %v2185_v28, %v6578_v52 }
 0x7d8   :  { %2800 = vmatpush1.msra.mxu0 %v5726_v5  ;;  %2696 = vmatpush1.msra.mxu1 %v6565_v11  ;;  %v2190_v11 = vrot.slane %v2183_v10, %v6578_v52 }
 0x7d9   :  { %2801 = vmatprep.subr.mxu0 %v5730_v54  ;;  %2697 = vmatprep.subr.mxu1 %v6566_v14 }
 0x7da   :  { %2802 = vmatpush1.msra.mxu0 %v5734_v24  ;;  %2698 = vmatpush1.msra.mxu1 %v6567_v0  ;;  %v2208_v14 = vsel %vm319_vm2, %v2190_v11, %v2201_v38 }
 0x7db   :  { %2803 = vmatprep.subr.mxu0 %v5738_v59  ;;  %2699 = vmatprep.subr.mxu1 %v6568_v31 }
 0x7dc   :  { %2804 = vmatpush1.msra.mxu0 %v5742_v41  ;;  %2700 = vmatpush1.msra.mxu1 %v6569_v48 }
 0x7dd   :  { %2805 = vmatprep.subr.mxu0 %v5746_v60  ;;  %2701 = vmatprep.subr.mxu1 %v6570_v49  ;;  %v2205_v49 = vrot.slane %v2185_v28, %v6579_v13 }
 0x7de   :  { %2806 = vmatpush1.msra.mxu0 %v5750_v40  ;;  %2702 = vmatpush1.msra.mxu1 %v6571_v47  ;;  %v2194_v47 = vrot.slane %v2183_v10, %v6579_v13 }
 0x7df   :  { %2839 = vmatprep.mubr.f32.mxu0 %v6475_v57  ;;  %2703 = vmatprep.subr.mxu1 %v6572_v51 }
 0x7e0   :  { %2960 = vmatprep.subr.mxu0 %v5756_v39  ;;  %2704 = vmatpush1.msra.mxu1 %v6573_v18  ;;  %v2209_v18 = vsel %vm319_vm2, %v2194_v47, %v2205_v49 }
 0x7e1   :  { %2705 = vmatprep.subr.mxu1 %v6574_v44 }
 0x7e2   :  { %2706 = vmatpush1.msra.mxu1 %v6575_v1 }
 0x7e3   :  { %2707 = vmatprep.subr.mxu1 %v6576_v4 }
 0x7e4   :  { %2708 = vmatpush1.msra.mxu1 %v6577_v3 }
 0x7e5   :  { %2862 = vmatprep.subr.mxu1 %v5762_v45 }
 0x86c   :  { %v2279_v0 = vpop.f32.mrf.mxu0 }
 0x86d   :  { %v2284_v31 = vadd.f32 %v2279_v0, %v2208_v14 }
 0x86e   :  { %v2281_v51 = vpop.f32.mrf.mxu0 }
 0x86f   :  { %v4240_v48 = vmul.f32 -1.442695, %v2284_v31  ;;  %v2285_v44 = vadd.f32 %v2281_v51, %v2209_v18 }
 0x871   :  { %4474 = vpow2.f32 %v4240_v48 }
 0x872   :  { %4476 = vtanh.f32 %v2285_v44 }
 0x87c   :  { %v2448_v3 = vpop.f32.mrf.mxu0 }
 0x87e   :  { %v4475_v1 = vpop.eup %4474  ;;  %v2450_v10 = vpop.f32.mrf.mxu0 }
 0x87f   :  { %v2292_v4 = vadd.f32 1.0, %v4475_v1  ;;  %v4477_v11 = vpop.eup %4476 }
 0x881   :  { %4478 = vrcp.f32 %v2292_v4 }
 0x884   :  { %v2377_v56 = vpop.f32.mrf.mxu1 }
 0x885   :  { %v2449_v29 = vadd.f32 %v2448_v3, %v2377_v56 }
 0x886   :  { %v2379_v0 = vpop.f32.mrf.mxu1 }
 0x887   :  { %v2453_v42 = vadd.f32 %v2449_v29, %v6580_v62  ;;  %v2451_v31 = vadd.f32 %v2450_v10, %v2379_v0 }
 0x889   :  { %v4244_v38 = vmul.f32 -1.442695, %v2453_v42  ;;  %v2454_v47 = vadd.f32 %v2451_v31, %v6550_v27 }
 0x88b   :  { %4480 = vpow2.f32 %v4244_v38 }
 0x88c   :  { %v2617_v48 = vpop.f32.mrf.mxu0  ;;  %4482 = vtanh.f32 %v2454_v47 }
 0x88e   :  { %v4479_v14 = vpop.eup %4478  ;;  %v2619_v29 = vpop.f32.mrf.mxu0 }
 0x88f   :  { %v2300_v28 = vmul.f32 %v4479_v14, %v4477_v11 }
 0x891   :  { %2302 = vrot.lane.b32.xlu0 %v2300_v28, %s4923_s3 }
 0x895   :  { %v2546_v49 = vpop.f32.mrf.mxu1 }
 0x896   :  { %v2618_v51 = vadd.f32 %v2617_v48, %v2546_v49 }
 0x897   :  { %v2548_v56 = vpop.f32.mrf.mxu1 }
 0x898   :  { %v4481_v18 = vpop.eup %4480  ;;  %v2622_v1 = vadd.f32 %v2618_v51, %v5470_v37  ;;  %v2620_v42 = vadd.f32 %v2619_v29, %v2548_v56  ;;  %v4241_v51 = vmul.f32 -1.442695, %v2285_v44  ;;  %v4245_v29 = vmul.f32 -1.442695, %v2454_v47 }
 0x899   :  { %v2461_v4 = vadd.f32 1.0, %v4481_v18  ;;  %v4483_v38 = vpop.eup %4482 }
 0x89a   :  { %v4248_v3 = vmul.f32 -1.442695, %v2622_v1  ;;  %v2623_v11 = vadd.f32 %v2620_v42, %v6551_v43 }
 0x89b   :  { %4484 = vrcp.f32 %v2461_v4  ;;  %v2299_v4 = vmul.f32 %v4479_v14, %v5782_v2 }
 0x89c   :  { %4486 = vpow2.f32 %v4248_v3  ;;  %v4249_v44 = vmul.f32 -1.442695, %v2623_v11 }
 0x89d   :  { %4488 = vtanh.f32 %v2623_v11  ;;  %v6613_v11 = vld [vmem:[#allocation26_spill] sm:$0xff] }
 0x8a8   :  { %v4485_v28 = vpop.eup %4484 }
 0x8a9   :  { %v4487_v0 = vpop.eup %4486  ;;  %v2469_v10 = vmul.f32 %v4485_v28, %v4483_v38  ;;  %v2468_v47 = vmul.f32 %v4485_v28, %v5806_v26  ;;  %v6618_v26 = vld [vmem:[#allocation30_spill] sm:$0xff]  ;;  %v6619_v28 = vld [vmem:[#allocation20_spill] sm:$0xff] }
 0x8aa   :  { %v2630_v62 = vadd.f32 1.0, %v4487_v0  ;;  %v4489_v31 = vpop.eup %4488 }
 0x8ab   :  { %2471 = vrot.lane.b32.xlu1 %v2469_v10, %s4923_s3 }
 0x8ac   :  { %4490 = vrcp.f32 %v2630_v62 }
 0x8ad   :  { %4492 = vpow2.f32 %v4241_v51  ;;  %v6616_v51 = vld [vmem:[#allocation31_spill] sm:$0xff] }
 0x8b9   :  { %v4491_v48 = vpop.eup %4490 }
 0x8ba   :  { %v2638_v49 = vmul.f32 %v4491_v48, %v4489_v31  ;;  %v4493_v18 = vpop.eup %4492  ;;  %v6614_v31 = vld [vmem:[#allocation27_spill] sm:$0xff] }
 0x8bb   :  { %v2293_v1 = vadd.f32 1.0, %v4493_v18  ;;  %v6617_v18 = vld [vmem:[#allocation23_spill] sm:$0xff] }
 0x8bc   :  { %2640 = vrot.lane.b32.xlu0 %v2638_v49, %s4923_s3  ;;  %v6615_v49 = vld [vmem:[#allocation28_spill] sm:$0xff] }
 0x8bd   :  { %4494 = vrcp.f32 %v2293_v1  ;;  %v6620_v1 = vld [vmem:[#allocation45_spill] sm:$0xff] }
 0x8ca   :  { %v4495_v62 = vpop.eup %4494 }
 0x903   :  { %v2303_v3 = vpop.permute.xlu0 %2302 }
 0x904   :  { %v5990_v56 = vadd.f32 %v2303_v3, %v2299_v4  ;;  %v6621_v4 = vld [vmem:[#allocation52_spill] sm:$0xff] }
 0x905   :  { %v6622_v3 = vld [vmem:[#allocation48_spill] sm:$0xff] }
 0x906   :  { %4496 = vtanh.f32 %v5990_v56 }
 0x907   :  { %4498 = vpow2.f32 %v4245_v29  ;;  %v6623_v29 = vld [vmem:[#allocation49_spill] sm:$0xff] }
 0x908   :  { %4500 = vpow2.f32 %v4249_v44 }
 0x913   :  { %v4497_v42 = vpop.eup %4496 }
 0x914   :  { %v2307_v38 = vmul.f32 %v4497_v42, %v4495_v62  ;;  %v4499_v2 = vpop.eup %4498  ;;  %v6624_v42 = vld [vmem:[#allocation50_spill] sm:$0xff] }
 0x915   :  { %v2462_v14 = vadd.f32 1.0, %v4499_v2  ;;  %v4501_v62 = vpop.eup %4500 }
 0x916   :  { %4250 = vmatmul.mubr.msk.f32.vlgmr.msra.gmra.mxu1 %vm338_vm3, %v2307_v38  ;;  %v2631_v44 = vadd.f32 1.0, %v4501_v62  ;;  %v6627_v62 = vld [vmem:[#allocation54_spill] sm:$0xff] }
 0x917   :  { %2863 = vmatpush1.msra.mxu1 %v5786_v19  ;;  %2910 = vmatprep.mubr.f32.mxu1 %v6475_v57  ;;  %4502 = vrcp.f32 %v2462_v14  ;;  %v2637_v14 = vmul.f32 %v4491_v48, %v5864_v50  ;;  %v6628_v50 = vld [vmem:[#allocation33_spill] sm:$0xff]  ;;  %v6629_v48 = vld [vmem:[#allocation32_spill] sm:$0xff] }
 0x918   :  { %2864 = vmatprep.subr.mxu1 %v5790_v30 }
 0x919   :  { %2865 = vmatpush1.msra.mxu1 %v5793_v6 }
 0x91a   :  { %2866 = vmatprep.subr.mxu1 %v5796_v8 }
 0x91b   :  { %2867 = vmatpush1.msra.mxu1 %v5800_v12 }
 0x91c   :  { %2868 = vmatprep.subr.mxu1 %v5803_v23 }
 0x91d   :  { %2869 = vmatpush1.msra.mxu1 %v5808_v32  ;;  %v2472_v0 = vpop.permute.xlu1 %2471 }
 0x91e   :  { %2870 = vmatprep.subr.mxu1 %v5811_v36  ;;  %v6004_v10 = vadd.f32 %v2472_v0, %v2468_v47 }
 0x91f   :  { %2871 = vmatpush1.msra.mxu1 %v6613_v11 }
 0x920   :  { %2872 = vmatprep.subr.mxu1 %v6614_v31  ;;  %4504 = vtanh.f32 %v6004_v10 }
 0x921   :  { %2873 = vmatpush1.msra.mxu1 %v6615_v49  ;;  %4506 = vrcp.f32 %v2631_v44  ;;  %v6633_v44 = vld [vmem:[#allocation40_spill] sm:$0xff] }
 0x922   :  { %2874 = vmatprep.subr.mxu1 %v6616_v51 }
 0x923   :  { %2875 = vmatpush1.msra.mxu1 %v6617_v18 }
 0x924   :  { %2876 = vmatprep.subr.mxu1 %v6618_v26  ;;  %v4503_v2 = vpop.eup %4502 }
 0x925   :  { %2877 = vmatpush1.msra.mxu1 %v6619_v28 }
 0x926   :  { %4254 = vmatmul.mubr.msk.f32.vlgmr.msra.gmra.mxu1 %vm338_vm3, %v2307_v38  ;;  %3031 = vmatprep.subr.mxu1 %v6620_v1 }
 0x927   :  { %3032 = vmatpush1.msra.mxu1 %v6621_v4  ;;  %3079 = vmatprep.mubr.f32.mxu1 %v6475_v57 }
 0x928   :  { %3033 = vmatprep.subr.mxu1 %v6622_v3 }
 0x929   :  { %3034 = vmatpush1.msra.mxu1 %v6623_v29 }
 0x92a   :  { %3035 = vmatprep.subr.mxu1 %v6624_v42  ;;  %v6625_v42 = vld [vmem:[#allocation55_spill] sm:$0xff] }
 0x92b   :  { %3036 = vmatpush1.msra.mxu1 %v5853_v34 }
 0x92c   :  { %3037 = vmatprep.subr.mxu1 %v5858_v46  ;;  %v6626_v46 = vld [vmem:[#allocation34_spill] sm:$0xff] }
 0x92d   :  { %3038 = vmatpush1.msra.mxu1 %v5861_v7  ;;  %v4505_v38 = vpop.eup %4504 }
 0x92e   :  { %3039 = vmatprep.subr.mxu1 %v5866_v20  ;;  %v2641_v47 = vpop.permute.xlu0 %2640  ;;  %v2476_v0 = vmul.f32 %v4505_v38, %v4503_v2  ;;  %v6630_v20 = vld [vmem:[#allocation35_spill] sm:$0xff]  ;;  %v6631_v2 = vld [vmem:[#allocation36_spill] sm:$0xff]  ;;  %v6632_v38 = vld [vmem:[#allocation38_spill] sm:$0xff] }
 0x92f   :  { %3040 = vmatpush1.msra.mxu1 %v5870_v17  ;;  %v6027_v29 = vadd.f32 %v2641_v47, %v2637_v14  ;;  %v6634_v14 = vld [vmem:[#allocation42_spill] sm:$0xff]  ;;  %v6635_v47 = vld [vmem:[#allocation39_spill] sm:$0xff] }
 0x930   :  { %3041 = vmatprep.subr.mxu1 %v6625_v42  ;;  %4253 = vmatmul.mubr.msk.f32.vlgmr.msra.gmra.mxu0 %vm338_vm3, %v2476_v0 }
 0x931   :  { %3042 = vmatpush1.msra.mxu1 %v6626_v46  ;;  %4508 = vtanh.f32 %v6027_v29  ;;  %2961 = vmatpush1.msra.mxu0 %v6627_v62 }
 0x932   :  { %3043 = vmatprep.subr.mxu1 %v6628_v50  ;;  %2962 = vmatprep.subr.mxu0 %v6629_v48  ;;  %v6636_v48 = vld [vmem:[#allocation44_spill] sm:$0xff] }
 0x933   :  { %3044 = vmatpush1.msra.mxu1 %v6630_v20  ;;  %2963 = vmatpush1.msra.mxu0 %v6631_v2  ;;  %v6637_v2 = vld [vmem:[#allocation25_spill] sm:$0xff] }
 0x934   :  { %3045 = vmatprep.subr.mxu1 %v5901_v33  ;;  %2964 = vmatprep.subr.mxu0 %v6632_v38  ;;  %v6638_v33 = vld [vmem:[#allocation41_spill] sm:$0xff]  ;;  %v6639_v38 = vld [vmem:[#allocation46_spill] sm:$0xff] }
 0x935   :  { %3046 = vmatpush1.msra.mxu1 %v5907_v25  ;;  %2965 = vmatpush1.msra.mxu0 %v6633_v44 }
 0x936   :  { %4258 = vmatmul.mubr.msk.f32.vlgmr.msra.gmra.mxu1 %vm338_vm3, %v2476_v0  ;;  %2966 = vmatprep.subr.mxu0 %v6634_v14  ;;  %v6640_v0 = vld [vmem:[#allocation43_spill] sm:$0xff] }
 0x937   :  { %3008 = vmatprep.mubr.f32.mxu0 %v6475_v57  ;;  %2967 = vmatpush1.msra.mxu0 %v6635_v47  ;;  %v6641_v14 = vld [vmem:[#allocation47_spill] sm:$0xff] }
 0x938   :  { %3255 = vmatprep.subr.mxu1 %v5688_v35  ;;  %2968 = vmatprep.subr.mxu0 %v6636_v48  ;;  %v4507_v35 = vpop.eup %4506 }
 0x939   :  { %3256 = vmatpush1.msra.mxu1 %v6637_v2  ;;  %2969 = vmatpush1.msra.mxu0 %v6638_v33 }
 0x93a   :  { %3257 = vmatprep.subr.mxu1 %v5696_v63  ;;  %2970 = vmatprep.subr.mxu0 %v6639_v38 }
 0x93b   :  { %3258 = vmatpush1.msra.mxu1 %v5700_v61  ;;  %2971 = vmatpush1.msra.mxu0 %v6640_v0  ;;  %v4698_v61 = vld [vmem:[#allocation6 + $0x78] sm:$0xff] }
 0x93c   :  { %3259 = vmatprep.subr.mxu1 %v5704_v53  ;;  %2972 = vmatprep.subr.mxu0 %v6641_v14  ;;  %v4699_v53 = vld [vmem:[#allocation6 + $0x70] sm:$0xff] }
 0x93d   :  { %3260 = vmatpush1.msra.mxu1 %v5708_v21  ;;  %2973 = vmatpush1.msra.mxu0 %v5934_v16  ;;  %v4700_v21 = vld [vmem:[#allocation6 + $0x68] sm:$0xff] }
 0x93e   :  { %3261 = vmatprep.subr.mxu1 %v5712_v15  ;;  %v4509_v2 = vpop.eup %4508  ;;  %2974 = vmatprep.subr.mxu0 %v5938_v58  ;;  %v4701_v15 = vld [vmem:[#allocation6 + $0x60] sm:$0xff] }
 0x93f   :  { %3262 = vmatpush1.msra.mxu1 %v5718_v55  ;;  %2975 = vmatpush1.msra.mxu0 %v5942_v9  ;;  %v2645_v63 = vmul.f32 %v4509_v2, %v4507_v35  ;;  %v4702_v55 = vld [vmem:[#allocation6 + $0x58] sm:$0xff]  ;;  %v4708_v35 = vld [vmem:[#allocation6 + $0x28] sm:$0xff] }
 0x940   :  { %3263 = vmatprep.subr.mxu1 %v5722_v22  ;;  %3157 = vmatprep.subr.mxu0 %v4698_v61  ;;  %v4703_v22 = vld [vmem:[#allocation6 + $0x50] sm:$0xff]  ;;  %v4710_v2 = vld [vmem:[#allocation6 + $0x18] sm:$0xff]  ;;  %v2649_v61 = vld [vmem:[#allocation2 + $0x16] ss:$8 sm:$0x3] }
 0x941   :  { %3264 = vmatpush1.msra.mxu1 %v5726_v5  ;;  %4257 = vmatmul.mubr.msk.f32.vlgmr.msra.gmra.mxu0 %vm338_vm3, %v2645_v63  ;;  %v4704_v5 = vld [vmem:[#allocation6 + $0x48] sm:$0xff] }
 0x942   :  { %3265 = vmatprep.subr.mxu1 %v5730_v54  ;;  %3158 = vmatpush1.msra.mxu0 %v4699_v53  ;;  %v4705_v54 = vld [vmem:[#allocation6 + $0x40] sm:$0xff]  ;;  %v4712_v63 = vld [vmem:[#allocation6 + $0x8] sm:$0xff]  ;;  %v2647_v53 = vld [vmem:[#allocation2 + $0x6] ss:$8 sm:$0x3] }
 0x943   :  { %3205 = vmatprep.mubr.f32.mxu0 %v6475_v57  ;;  %3159 = vmatprep.subr.mxu0 %v4700_v21  ;;  %v2654_v21 = vrot.slane %v2647_v53, %v6578_v52 }
 0x944   :  { %3266 = vmatpush1.msra.mxu1 %v5734_v24  ;;  %3160 = vmatpush1.msra.mxu0 %v4701_v15  ;;  %v4706_v24 = vld [vmem:[#allocation6 + $0x38] sm:$0xff] }
 0x945   :  { %3267 = vmatprep.subr.mxu1 %v5738_v59  ;;  %3161 = vmatprep.subr.mxu0 %v4702_v55  ;;  %v4707_v59 = vld [vmem:[#allocation6 + $0x30] sm:$0xff] }
 0x946   :  { %3268 = vmatpush1.msra.mxu1 %v5742_v41  ;;  %3162 = vmatpush1.msra.mxu0 %v4703_v22  ;;  %v4709_v41 = vld [vmem:[#allocation6 + $0x20] sm:$0xff] }
 0x947   :  { %3269 = vmatprep.subr.mxu1 %v5746_v60  ;;  %3163 = vmatprep.subr.mxu0 %v4704_v5  ;;  %v4711_v60 = vld [vmem:[#allocation6 + $0x10] sm:$0xff] }
 0x948   :  { %3270 = vmatpush1.msra.mxu1 %v5750_v40  ;;  %3164 = vmatpush1.msra.mxu0 %v4705_v54  ;;  %v4713_v40 = vld [vmem:[#allocation6] sm:$0xff]  ;;  %v2669_v54 = vrot.slane %v2649_v61, %v6579_v13 }
 0x949   :  { %3303 = vmatprep.mubr.f32.mxu1 %v6475_v57  ;;  %3165 = vmatprep.subr.mxu0 %v4706_v24  ;;  %v2658_v24 = vrot.slane %v2647_v53, %v6579_v13 }
 0x94a   :  { %3424 = vmatprep.subr.mxu1 %v5756_v39  ;;  %3166 = vmatpush1.msra.mxu0 %v4707_v59  ;;  %v2665_v39 = vrot.slane %v2649_v61, %v6578_v52 }
 0x94b   :  { %3167 = vmatprep.subr.mxu0 %v4708_v35  ;;  %v2673_v35 = vsel %vm319_vm2, %v2658_v24, %v2669_v54 }
 0x94c   :  { %3168 = vmatpush1.msra.mxu0 %v4709_v41  ;;  %v2672_v15 = vsel %vm319_vm2, %v2654_v21, %v2665_v39  ;;  %v6642_v39 = vld [vmem:[#allocation29_spill] sm:$0xff] }
 0x94d   :  { %3169 = vmatprep.subr.mxu0 %v4710_v2 }
 0x94e   :  { %3170 = vmatpush1.msra.mxu0 %v4711_v60 }
 0x94f   :  { %3171 = vmatprep.subr.mxu0 %v4712_v63 }
 0x950   :  { %3172 = vmatpush1.msra.mxu0 %v4713_v40 }
 0x951   :  { %3326 = vmatprep.subr.mxu0 %v5762_v45 }
 0x9d6   :  { %v2743_v55 = vpop.f32.mrf.mxu1 }
 0x9d7   :  { %v2748_v22 = vadd.f32 %v2743_v55, %v2672_v15 }
 0x9d8   :  { %v2745_v59 = vpop.f32.mrf.mxu1 }
 0x9d9   :  { %v4251_v5 = vmul.f32 -1.442695, %v2748_v22  ;;  %v2749_v41 = vadd.f32 %v2745_v59, %v2673_v35 }
 0x9db   :  { %4510 = vpow2.f32 %v4251_v5 }
 0x9dc   :  { %4512 = vtanh.f32 %v2749_v41 }
 0x9e6   :  { %v2912_v63 = vpop.f32.mrf.mxu1 }
 0x9e8   :  { %v4511_v2 = vpop.eup %4510  ;;  %v2914_v5 = vpop.f32.mrf.mxu1 }
 0x9e9   :  { %v2756_v60 = vadd.f32 1.0, %v4511_v2  ;;  %v4513_v55 = vpop.eup %4512 }
 0x9eb   :  { %4514 = vrcp.f32 %v2756_v60 }
 0x9f0   :  { %v2841_v40 = vpop.f32.mrf.mxu0 }
 0x9f1   :  { %v2913_v52 = vadd.f32 %v2912_v63, %v2841_v40 }
 0x9f2   :  { %v2843_v53 = vpop.f32.mrf.mxu0 }
 0x9f3   :  { %v2917_v21 = vadd.f32 %v2913_v52, %v6642_v39  ;;  %v2915_v54 = vadd.f32 %v2914_v5, %v2843_v53 }
 0x9f5   :  { %v4255_v15 = vmul.f32 -1.442695, %v2917_v21  ;;  %v2918_v35 = vadd.f32 %v2915_v54, %v6550_v27 }
 0x9f6   :  { %v3081_v24 = vpop.f32.mrf.mxu1 }
 0x9f7   :  { %4516 = vpow2.f32 %v4255_v15 }
 0x9f8   :  { %v4515_v22 = vpop.eup %4514  ;;  %4518 = vtanh.f32 %v2918_v35  ;;  %v3083_v15 = vpop.f32.mrf.mxu1 }
 0x9f9   :  { %v2764_v61 = vmul.f32 %v4515_v22, %v4513_v55 }
 0x9fb   :  { %2766 = vrot.lane.b32.xlu1 %v2764_v61, %s4923_s3 }
 0xa01   :  { %v3010_v59 = vpop.f32.mrf.mxu0 }
 0xa02   :  { %v3082_v2 = vadd.f32 %v3081_v24, %v3010_v59 }
 0xa03   :  { %v3012_v21 = vpop.f32.mrf.mxu0 }
 0xa04   :  { %v4517_v60 = vpop.eup %4516  ;;  %v3086_v63 = vadd.f32 %v3082_v2, %v5470_v37  ;;  %v3084_v55 = vadd.f32 %v3083_v15, %v3012_v21  ;;  %v4252_v2 = vmul.f32 -1.442695, %v2749_v41  ;;  %v4256_v15 = vmul.f32 -1.442695, %v2918_v35 }
 0xa05   :  { %v2925_v40 = vadd.f32 1.0, %v4517_v60  ;;  %v4519_v61 = vpop.eup %4518 }
 0xa06   :  { %v4259_v52 = vmul.f32 -1.442695, %v3086_v63  ;;  %v3087_v39 = vadd.f32 %v3084_v55, %v6551_v43 }
 0xa07   :  { %4520 = vrcp.f32 %v2925_v40  ;;  %v2763_v40 = vmul.f32 %v4515_v22, %v5990_v56 }
 0xa08   :  { %4522 = vpow2.f32 %v4259_v52  ;;  %v4260_v41 = vmul.f32 -1.442695, %v3087_v39 }
 0xa09   :  { %4524 = vtanh.f32 %v3087_v39  ;;  %v6644_v39 = vld [vmem:[#allocation50_spill] sm:$0xff] }
 0xa14   :  { %v4521_v53 = vpop.eup %4520 }
 0xa15   :  { %v4523_v5 = vpop.eup %4522  ;;  %v2933_v13 = vmul.f32 %v4521_v53, %v4519_v61  ;;  %v2932_v35 = vmul.f32 %v4521_v53, %v6004_v10  ;;  %v6643_v10 = vld [vmem:[#allocation49_spill] sm:$0xff] }
 0xa16   :  { %v3094_v9 = vadd.f32 1.0, %v4523_v5  ;;  %v4525_v54 = vpop.eup %4524 }
 0xa17   :  { %2935 = vrot.lane.b32.xlu0 %v2933_v13, %s4923_s3 }
 0xa18   :  { %4526 = vrcp.f32 %v3094_v9 }
 0xa19   :  { %4528 = vpow2.f32 %v4252_v2 }
 0xa25   :  { %v4527_v24 = vpop.eup %4526 }
 0xa26   :  { %v3102_v59 = vmul.f32 %v4527_v24, %v4525_v54  ;;  %v4529_v60 = vpop.eup %4528  ;;  %v6645_v54 = vld [vmem:[#allocation51_spill] sm:$0xff] }
 0xa27   :  { %v2757_v63 = vadd.f32 1.0, %v4529_v60 }
 0xa28   :  { %3104 = vrot.lane.b32.xlu1 %v3102_v59, %s4923_s3  ;;  %v6646_v59 = vld [vmem:[#allocation53_spill] sm:$0xff] }
 0xa29   :  { %4530 = vrcp.f32 %v2757_v63 }
 0xa36   :  { %v4531_v13 = vpop.eup %4530 }
 0xa6d   :  { %v2767_v52 = vpop.permute.xlu1 %2766 }
 0xa6e   :  { %v6089_v21 = vadd.f32 %v2767_v52, %v2763_v40 }
 0xa70   :  { %4532 = vtanh.f32 %v6089_v21 }
 0xa71   :  { %4534 = vpow2.f32 %v4256_v15 }
 0xa72   :  { %4536 = vpow2.f32 %v4260_v41 }
 0xa7d   :  { %v4533_v9 = vpop.eup %4532 }
 0xa7e   :  { %v2771_v55 = vmul.f32 %v4533_v9, %v4531_v13  ;;  %v4535_v56 = vpop.eup %4534 }
 0xa7f   :  { %v2926_v22 = vadd.f32 1.0, %v4535_v56  ;;  %v4537_v53 = vpop.eup %4536 }
 0xa80   :  { %4261 = vmatmul.mubr.msk.f32.vlgmr.msra.gmra.mxu0 %vm338_vm3, %v2771_v55  ;;  %v3095_v60 = vadd.f32 1.0, %v4537_v53 }
 0xa81   :  { %3327 = vmatpush1.msra.mxu0 %v5786_v19  ;;  %3374 = vmatprep.mubr.f32.mxu0 %v6475_v57  ;;  %4538 = vrcp.f32 %v2926_v22 }
 0xa82   :  { %3328 = vmatprep.subr.mxu0 %v5790_v30 }
 0xa83   :  { %3329 = vmatpush1.msra.mxu0 %v5793_v6 }
 0xa84   :  { %3330 = vmatprep.subr.mxu0 %v5796_v8 }
 0xa85   :  { %3331 = vmatpush1.msra.mxu0 %v5800_v12 }
 0xa86   :  { %3332 = vmatprep.subr.mxu0 %v5803_v23 }
 0xa87   :  { %3333 = vmatpush1.msra.mxu0 %v5808_v32 }
 0xa88   :  { %3334 = vmatprep.subr.mxu0 %v5811_v36 }
 0xa89   :  { %3335 = vmatpush1.msra.mxu0 %v6613_v11  ;;  %v2936_v61 = vpop.permute.xlu0 %2935 }
 0xa8a   :  { %3336 = vmatprep.subr.mxu0 %v6614_v31  ;;  %v6105_v5 = vadd.f32 %v2936_v61, %v2932_v35 }
 0xa8b   :  { %3337 = vmatpush1.msra.mxu0 %v6615_v49 }
 0xa8c   :  { %3338 = vmatprep.subr.mxu0 %v6616_v51  ;;  %4540 = vtanh.f32 %v6105_v5 }
 0xa8d   :  { %3339 = vmatpush1.msra.mxu0 %v6617_v18  ;;  %4542 = vrcp.f32 %v3095_v60 }
 0xa8e   :  { %3340 = vmatprep.subr.mxu0 %v6618_v26  ;;  %v4539_v2 = vpop.eup %4538 }
 0xa8f   :  { %3341 = vmatpush1.msra.mxu0 %v6619_v28 }
 0xa90   :  { %4265 = vmatmul.mubr.msk.f32.vlgmr.msra.gmra.mxu0 %vm338_vm3, %v2771_v55  ;;  %3495 = vmatprep.subr.mxu0 %v6620_v1 }
 0xa91   :  { %3496 = vmatpush1.msra.mxu0 %v6621_v4  ;;  %3543 = vmatprep.mubr.f32.mxu0 %v6475_v57 }
 0xa92   :  { %3497 = vmatprep.subr.mxu0 %v6622_v3  ;;  %v3101_v3 = vmul.f32 %v4527_v24, %v6027_v29  ;;  %v6650_v29 = vld [vmem:[#allocation38_spill] sm:$0xff] }
 0xa93   :  { %3498 = vmatpush1.msra.mxu0 %v6643_v10  ;;  %v6654_v24 = vld [vmem:[#allocation22_spill] sm:$0xff]  ;;  %v6655_v10 = vld [vmem:[#allocation29_spill] sm:$0xff] }
 0xa94   :  { %3499 = vmatprep.subr.mxu0 %v6644_v39 }
 0xa95   :  { %3500 = vmatpush1.msra.mxu0 %v5853_v34 }
 0xa96   :  { %3501 = vmatprep.subr.mxu0 %v6645_v54 }
 0xa97   :  { %3502 = vmatpush1.msra.mxu0 %v5861_v7  ;;  %v6647_v7 = vld [vmem:[#allocation37_spill] sm:$0xff] }
 0xa98   :  { %3503 = vmatprep.subr.mxu0 %v6646_v59 }
 0xa99   :  { %3504 = vmatpush1.msra.mxu0 %v5870_v17  ;;  %v4541_v4 = vpop.eup %4540  ;;  %v6648_v17 = vld [vmem:[#allocation32_spill] sm:$0xff] }
 0xa9a   :  { %3505 = vmatprep.subr.mxu0 %v6625_v42  ;;  %v3105_v63 = vpop.permute.xlu1 %3104  ;;  %v2940_v34 = vmul.f32 %v4541_v4, %v4539_v2  ;;  %v3113_v42 = vld [vmem:[#allocation2 + $0x17] ss:$8 sm:$0x3] }
 0xa9b   :  { %3506 = vmatpush1.msra.mxu0 %v6626_v46  ;;  %v6128_v40 = vadd.f32 %v3105_v63, %v3101_v3  ;;  %v6649_v46 = vld [vmem:[#allocation36_spill] sm:$0xff]  ;;  %v3133_v52 = vrot.slane %v3113_v42, %v6654_v24 }
 0xa9c   :  { %3507 = vmatprep.subr.mxu0 %v6628_v50  ;;  %4264 = vmatmul.mubr.msk.f32.vlgmr.msra.gmra.mxu1 %vm338_vm3, %v2940_v34  ;;  %v6653_v50 = vld [vmem:[#allocation21_spill] sm:$0xff] }
 0xa9d   :  { %3508 = vmatpush1.msra.mxu0 %v6630_v20  ;;  %4544 = vtanh.f32 %v6128_v40  ;;  %3425 = vmatpush1.msra.mxu1 %v6627_v62  ;;  %v6651_v20 = vld [vmem:[#allocation42_spill] sm:$0xff] }
 0xa9e   :  { %3509 = vmatprep.subr.mxu0 %v6647_v7  ;;  %3426 = vmatprep.subr.mxu1 %v6648_v17  ;;  %v3111_v62 = vld [vmem:[#allocation2 + $0x7] ss:$8 sm:$0x3] }
 0xa9f   :  { %3510 = vmatpush1.msra.mxu0 %v5907_v25  ;;  %3427 = vmatpush1.msra.mxu1 %v6649_v46  ;;  %v4722_v25 = vld [vmem:[#allocation9 + $0x38] sm:$0xff]  ;;  %v3122_v15 = vrot.slane %v3111_v62, %v6654_v24 }
 0xaa0   :  { %4269 = vmatmul.mubr.msk.f32.vlgmr.msra.gmra.mxu0 %vm338_vm3, %v2940_v34  ;;  %3428 = vmatprep.subr.mxu1 %v6650_v29 }
 0xaa1   :  { %3472 = vmatprep.mubr.f32.mxu1 %v6475_v57  ;;  %3429 = vmatpush1.msra.mxu1 %v6633_v44  ;;  %v3137_v9 = vsel %vm319_vm2, %v3122_v15, %v3133_v52  ;;  %v4737_v52 = vld [vmem:[#allocation11 + $0x40] sm:$0xff]  ;;  %v4738_v15 = vld [vmem:[#allocation11 + $0x38] sm:$0xff] }
 0xaa2   :  { %3667 = vmatprep.subr.mxu0 %v5762_v45  ;;  %3430 = vmatprep.subr.mxu1 %v6651_v20  ;;  %v4543_v45 = vpop.eup %4542 }
 0xaa3   :  { %3668 = vmatpush1.msra.mxu0 %v5786_v19  ;;  %3431 = vmatpush1.msra.mxu1 %v6635_v47 }
 0xaa4   :  { %3669 = vmatprep.subr.mxu0 %v5790_v30  ;;  %3432 = vmatprep.subr.mxu1 %v6636_v48  ;;  %v6652_v30 = vld [vmem:[#allocation24_spill] sm:$0xff]  ;;  %v3129_v48 = vrot.slane %v3113_v42, %v6653_v50 }
 0xaa5   :  { %3670 = vmatpush1.msra.mxu0 %v5793_v6  ;;  %3433 = vmatpush1.msra.mxu1 %v6638_v33  ;;  %v4721_v33 = vld [vmem:[#allocation9 + $0x40] sm:$0xff] }
 0xaa6   :  { %3671 = vmatprep.subr.mxu0 %v5796_v8  ;;  %3434 = vmatprep.subr.mxu1 %v6639_v38  ;;  %v4714_v8 = vld [vmem:[#allocation9 + $0x78] sm:$0xff]  ;;  %v3118_v38 = vrot.slane %v3111_v62, %v6653_v50 }
 0xaa7   :  { %3672 = vmatpush1.msra.mxu0 %v5800_v12  ;;  %3435 = vmatpush1.msra.mxu1 %v6640_v0  ;;  %v4716_v12 = vld [vmem:[#allocation9 + $0x68] sm:$0xff] }
 0xaa8   :  { %3673 = vmatprep.subr.mxu0 %v5803_v23  ;;  %3436 = vmatprep.subr.mxu1 %v6641_v14  ;;  %v4717_v23 = vld [vmem:[#allocation9 + $0x60] sm:$0xff]  ;;  %v3136_v44 = vsel %vm319_vm2, %v3118_v38, %v3129_v48  ;;  %v4731_v48 = vld [vmem:[#allocation11 + $0x70] sm:$0xff]  ;;  %v4732_v38 = vld [vmem:[#allocation11 + $0x68] sm:$0xff] }
 0xaa9   :  { %3674 = vmatpush1.msra.mxu0 %v5808_v32  ;;  %3437 = vmatpush1.msra.mxu1 %v5934_v16  ;;  %v4718_v32 = vld [vmem:[#allocation9 + $0x58] sm:$0xff]  ;;  %v4720_v16 = vld [vmem:[#allocation9 + $0x48] sm:$0xff] }
 0xaaa   :  { %3675 = vmatprep.subr.mxu0 %v5811_v36  ;;  %v4545_v19 = vpop.eup %4544  ;;  %3438 = vmatprep.subr.mxu1 %v5938_v58  ;;  %v4715_v58 = vld [vmem:[#allocation9 + $0x70] sm:$0xff] }
 0xaab   :  { %3676 = vmatpush1.msra.mxu0 %v6613_v11  ;;  %3439 = vmatpush1.msra.mxu1 %v6652_v30  ;;  %v3109_v6 = vmul.f32 %v4545_v19, %v4543_v45  ;;  %v4719_v36 = vld [vmem:[#allocation9 + $0x50] sm:$0xff] }
 0xaac   :  { %3677 = vmatprep.subr.mxu0 %v6614_v31  ;;  %3715 = vmatprep.mubr.f32.mxu0 %v6475_v57  ;;  %v4723_v11 = vld [vmem:[#allocation9 + $0x30] sm:$0xff]  ;;  %v4724_v31 = vld [vmem:[#allocation9 + $0x28] sm:$0xff] }
 0xaad   :  { %3678 = vmatpush1.msra.mxu0 %v6615_v49  ;;  %4268 = vmatmul.mubr.msk.f32.vlgmr.msra.gmra.mxu1 %vm338_vm3, %v3109_v6  ;;  %v4725_v49 = vld [vmem:[#allocation9 + $0x20] sm:$0xff] }
 0xaae   :  { %3679 = vmatprep.subr.mxu0 %v6616_v51  ;;  %3593 = vmatprep.subr.mxu1 %v4714_v8  ;;  %v4726_v51 = vld [vmem:[#allocation9 + $0x18] sm:$0xff] }
 0xaaf   :  { %3680 = vmatpush1.msra.mxu0 %v6617_v18  ;;  %3594 = vmatpush1.msra.mxu1 %v4715_v58  ;;  %v4727_v18 = vld [vmem:[#allocation9 + $0x10] sm:$0xff] }
 0xab0   :  { %3681 = vmatprep.subr.mxu0 %v6618_v26  ;;  %3595 = vmatprep.subr.mxu1 %v4716_v12  ;;  %v4728_v26 = vld [vmem:[#allocation9 + $0x8] sm:$0xff] }
 0xab1   :  { %3682 = vmatpush1.msra.mxu0 %v6619_v28  ;;  %3596 = vmatpush1.msra.mxu1 %v4717_v23  ;;  %v4729_v28 = vld [vmem:[#allocation9] sm:$0xff] }
 0xab2   :  { %3836 = vmatprep.subr.mxu0 %v6620_v1  ;;  %3597 = vmatprep.subr.mxu1 %v4718_v32  ;;  %v6173_v1 = vld [vmem:[#allocation12 + $0x78] sm:$0xff] }
 0xab3   :  { %3641 = vmatprep.mubr.f32.mxu1 %v6475_v57  ;;  %3598 = vmatpush1.msra.mxu1 %v4719_v36 }
 0xab4   :  { %3599 = vmatprep.subr.mxu1 %v4720_v16 }
 0xab5   :  { %3600 = vmatpush1.msra.mxu1 %v4721_v33 }
 0xab6   :  { %3601 = vmatprep.subr.mxu1 %v4722_v25 }
 0xab7   :  { %3602 = vmatpush1.msra.mxu1 %v4723_v11 }
 0xab8   :  { %3603 = vmatprep.subr.mxu1 %v4724_v31 }
 0xab9   :  { %3604 = vmatpush1.msra.mxu1 %v4725_v49 }
 0xaba   :  { %3605 = vmatprep.subr.mxu1 %v4726_v51 }
 0xabb   :  { %3606 = vmatpush1.msra.mxu1 %v4727_v18 }
 0xabc   :  { %3607 = vmatprep.subr.mxu1 %v4728_v26 }
 0xabd   :  { %3608 = vmatpush1.msra.mxu1 %v4729_v28 }
 0xabe   :  { %3765 = vmatprep.subr.mxu1 %v6173_v1 }
 0xb40   :  { %v3207_v14 = vpop.f32.mrf.mxu0 }
 0xb41   :  { %v3212_v47 = vadd.f32 %v3207_v14, %v3136_v44  ;;  %v4733_v44 = vld [vmem:[#allocation11 + $0x60] sm:$0xff]  ;;  %v4735_v14 = vld [vmem:[#allocation11 + $0x50] sm:$0xff] }
 0xb42   :  { %v3209_v13 = vpop.f32.mrf.mxu0 }
 0xb43   :  { %v4262_v0 = vmul.f32 -1.442695, %v3212_v47  ;;  %v3213_v55 = vadd.f32 %v3209_v13, %v3137_v9  ;;  %v4736_v47 = vld [vmem:[#allocation11 + $0x48] sm:$0xff]  ;;  %v6195_v13 = vld [vmem:[#allocation11 + $0x30] sm:$0xff] }
 0xb45   :  { %4546 = vpow2.f32 %v4262_v0  ;;  %v4263_v11 = vmul.f32 -1.442695, %v3213_v55 }
 0xb46   :  { %4548 = vtanh.f32 %v3213_v55  ;;  %v6198_v55 = vld [vmem:[#allocation11 + $0x28] sm:$0xff] }
 0xb50   :  { %v3376_v22 = vpop.f32.mrf.mxu0 }
 0xb52   :  { %v4547_v56 = vpop.eup %4546  ;;  %v3378_v4 = vpop.f32.mrf.mxu0 }
 0xb53   :  { %v3220_v41 = vadd.f32 1.0, %v4547_v56  ;;  %v4549_v53 = vpop.eup %4548 }
 0xb55   :  { %4550 = vrcp.f32 %v3220_v41  ;;  %v4741_v41 = vld [vmem:[#allocation11 + $0x20] sm:$0xff] }
 0xb5c   :  { %v3305_v35 = vpop.f32.mrf.mxu1 }
 0xb5d   :  { %v3377_v61 = vadd.f32 %v3376_v22, %v3305_v35  ;;  %v6202_v35 = vld [vmem:[#allocation11 + $0x18] sm:$0xff] }
 0xb5e   :  { %v3307_v60 = vpop.f32.mrf.mxu1 }
 0xb5f   :  { %v3381_v39 = vadd.f32 %v3377_v61, %v6655_v10  ;;  %v3379_v3 = vadd.f32 %v3378_v4, %v3307_v60 }
 0xb60   :  { %v3545_v63 = vpop.f32.mrf.mxu0 }
 0xb61   :  { %v4266_v59 = vmul.f32 -1.442695, %v3381_v39  ;;  %v3382_v7 = vadd.f32 %v3379_v3, %v6550_v27  ;;  %v6207_v39 = vld [vmem:[#allocation11 + $0x10] sm:$0xff] }
 0xb62   :  { %v4551_v54 = vpop.eup %4550  ;;  %v3547_v30 = vpop.f32.mrf.mxu0 }
 0xb63   :  { %v3228_v2 = vmul.f32 %v4551_v54, %v4549_v53  ;;  %4552 = vpow2.f32 %v4266_v59  ;;  %v3227_v51 = vmul.f32 %v4551_v54, %v6089_v21  ;;  %v4267_v28 = vmul.f32 -1.442695, %v3382_v7  ;;  %v4734_v21 = vld [vmem:[#allocation11 + $0x58] sm:$0xff]  ;;  %v6210_v53 = vld [vmem:[#allocation11 + $0x8] sm:$0xff] }
 0xb64   :  { %4554 = vtanh.f32 %v3382_v7  ;;  %v4746_v54 = vld [vmem:[#allocation11 + $0x78] sm:$0xff] }
 0xb65   :  { %3230 = vrot.lane.b32.xlu0 %v3228_v2, %s4923_s3 }
 0xb6d   :  { %v3474_v34 = vpop.f32.mrf.mxu1 }
 0xb6e   :  { %v3546_v17 = vadd.f32 %v3545_v63, %v3474_v34 }
 0xb6f   :  { %v3476_v19 = vpop.f32.mrf.mxu1 }
 0xb70   :  { %v4553_v46 = vpop.eup %4552  ;;  %v3550_v29 = vadd.f32 %v3546_v17, %v5470_v37  ;;  %v3548_v6 = vadd.f32 %v3547_v30, %v3476_v19  ;;  %v4747_v17 = vld [vmem:[#allocation12 + $0x70] sm:$0xff]  ;;  %v4753_v19 = vld [vmem:[#allocation12 + $0x40] sm:$0xff]  ;;  %v4754_v30 = vld [vmem:[#allocation12 + $0x38] sm:$0xff] }
 0xb71   :  { %v3389_v20 = vadd.f32 1.0, %v4553_v46  ;;  %v4555_v8 = vpop.eup %4554  ;;  %v4748_v46 = vld [vmem:[#allocation12 + $0x68] sm:$0xff] }
 0xb72   :  { %v4270_v45 = vmul.f32 -1.442695, %v3550_v29  ;;  %v3551_v58 = vadd.f32 %v3548_v6, %v6551_v43  ;;  %v4749_v29 = vld [vmem:[#allocation12 + $0x60] sm:$0xff]  ;;  %v4755_v6 = vld [vmem:[#allocation12 + $0x30] sm:$0xff] }
 0xb73   :  { %4556 = vrcp.f32 %v3389_v20  ;;  %v4751_v20 = vld [vmem:[#allocation12 + $0x50] sm:$0xff] }
 0xb74   :  { %4558 = vpow2.f32 %v4270_v45  ;;  %v4271_v24 = vmul.f32 -1.442695, %v3551_v58  ;;  %v4752_v45 = vld [vmem:[#allocation12 + $0x48] sm:$0xff] }
 0xb75   :  { %4560 = vtanh.f32 %v3551_v58  ;;  %v4757_v58 = vld [vmem:[#allocation12 + $0x20] sm:$0xff] }
 0xb80   :  { %v4557_v12 = vpop.eup %4556 }
 0xb81   :  { %v4559_v23 = vpop.eup %4558  ;;  %v3397_v32 = vmul.f32 %v4557_v12, %v4555_v8  ;;  %v3396_v56 = vmul.f32 %v4557_v12, %v6105_v5  ;;  %v6214_v5 = vld [vmem:[#allocation11] sm:$0xff]  ;;  %v4756_v8 = vld [vmem:[#allocation12 + $0x28] sm:$0xff]  ;;  %v4758_v12 = vld [vmem:[#allocation12 + $0x18] sm:$0xff] }
 0xb82   :  { %v3558_v36 = vadd.f32 1.0, %v4559_v23  ;;  %v4561_v16 = vpop.eup %4560 }
 0xb83   :  { %3399 = vrot.lane.b32.xlu1 %v3397_v32, %s4923_s3  ;;  %v4759_v32 = vld [vmem:[#allocation12 + $0x10] sm:$0xff] }
 0xb84   :  { %4562 = vrcp.f32 %v3558_v36 }
 0xb85   :  { %4564 = vpow2.f32 %v4263_v11 }
 0xb91   :  { %v6188_v33 = vpop.eup %4562 }
 0xb92   :  { %v3566_v25 = vmul.f32 %v6188_v33, %v4561_v16  ;;  %v4565_v31 = vpop.eup %4564  ;;  %v3565_v3 = vmul.f32 %v6188_v33, %v6128_v40  ;;  %v4750_v40 = vld [vmem:[#allocation12 + $0x58] sm:$0xff]  ;;  %v4760_v16 = vld [vmem:[#allocation12 + $0x8] sm:$0xff]  ;;  %v4761_v33 = vld [vmem:[#allocation12] sm:$0xff] }
 0xb93   :  { %v3221_v49 = vadd.f32 1.0, %v4565_v31 }
 0xb94   :  { %3568 = vrot.lane.b32.xlu0 %v3566_v25, %s4923_s3 }
 0xb95   :  { %4566 = vrcp.f32 %v3221_v49 }
 0xba2   :  { %v4567_v42 = vpop.eup %4566 }
 0xbd7   :  { %v3231_v18 = vpop.permute.xlu0 %3230 }
 0xbd8   :  { %v3233_v26 = vadd.f32 %v3231_v18, %v3227_v51 }
 0xbda   :  { %4568 = vtanh.f32 %v3233_v26 }
 0xbdb   :  { %4570 = vpow2.f32 %v4267_v28 }
 0xbdc   :  { %4572 = vpow2.f32 %v4271_v24 }
 0xbe7   :  { %v4569_v62 = vpop.eup %4568 }
 0xbe8   :  { %v3235_v50 = vmul.f32 %v4569_v62, %v4567_v42  ;;  %v4571_v0 = vpop.eup %4570 }
 0xbe9   :  { %v3390_v9 = vadd.f32 1.0, %v4571_v0  ;;  %v4573_v59 = vpop.eup %4572 }
 0xbea   :  { %4273 = vmatmul.mubr.msk.f32.vlgmr.msra.gmra.mxu0 %vm338_vm3, %v3235_v50  ;;  %v3559_v60 = vadd.f32 1.0, %v4573_v59 }
 0xbeb   :  { %3837 = vmatpush1.msra.mxu0 %v4731_v48  ;;  %3884 = vmatprep.mubr.f32.mxu0 %v6475_v57  ;;  %4574 = vrcp.f32 %v3390_v9 }
 0xbec   :  { %3838 = vmatprep.subr.mxu0 %v4732_v38 }
 0xbed   :  { %3839 = vmatpush1.msra.mxu0 %v4733_v44 }
 0xbee   :  { %3840 = vmatprep.subr.mxu0 %v4734_v21 }
 0xbef   :  { %3841 = vmatpush1.msra.mxu0 %v4735_v14 }
 0xbf0   :  { %3842 = vmatprep.subr.mxu0 %v4736_v47 }
 0xbf1   :  { %3843 = vmatpush1.msra.mxu0 %v4737_v52 }
 0xbf2   :  { %3844 = vmatprep.subr.mxu0 %v4738_v15 }
 0xbf3   :  { %3845 = vmatpush1.msra.mxu0 %v6195_v13 }
 0xbf4   :  { %3846 = vmatprep.subr.mxu0 %v6198_v55 }
 0xbf5   :  { %3847 = vmatpush1.msra.mxu0 %v4741_v41  ;;  %v3400_v22 = vpop.permute.xlu1 %3399 }
 0xbf6   :  { %3848 = vmatprep.subr.mxu0 %v6202_v35  ;;  %v6205_v61 = vadd.f32 %v3400_v22, %v3396_v56 }
 0xbf7   :  { %3849 = vmatpush1.msra.mxu0 %v6207_v39 }
 0xbf8   :  { %3850 = vmatprep.subr.mxu0 %v6210_v53  ;;  %4576 = vtanh.f32 %v6205_v61  ;;  %v4575_v2 = vpop.eup %4574 }
 0xbf9   :  { %3851 = vmatpush1.msra.mxu0 %v6214_v5  ;;  %4578 = vrcp.f32 %v3559_v60 }
 0xbfa   :  { %4008 = vmatprep.subr.mxu0 %v4746_v54 }
 0xc05   :  { %v4577_v4 = vpop.eup %4576 }
 0xc06   :  { %v3569_v63 = vpop.permute.xlu0 %3568  ;;  %v3404_v34 = vmul.f32 %v4577_v4, %v4575_v2  ;;  %v4579_v23 = vpop.eup %4578 }
 0xc07   :  { %v6219_v7 = vadd.f32 %v3569_v63, %v3565_v3 }
 0xc08   :  { %4272 = vmatmul.mubr.msk.f32.vlgmr.msra.gmra.mxu1 %vm338_vm3, %v3404_v34  ;;  %4277 = vmatmul.mubr.msk.f32.vlgmr.msra.gmra.mxu0 %vm338_vm3, %v3404_v34 }
 0xc09   :  { %4580 = vtanh.f32 %v6219_v7  ;;  %3766 = vmatpush1.msra.mxu1 %v4747_v17  ;;  %3813 = vmatprep.mubr.f32.mxu1 %v6475_v57 }
 0xc0a   :  { %3767 = vmatprep.subr.mxu1 %v4748_v46  ;;  %4009 = vmatpush1.msra.mxu0 %v4731_v48 }
 0xc0b   :  { %3768 = vmatpush1.msra.mxu1 %v4749_v29  ;;  %4010 = vmatprep.subr.mxu0 %v4732_v38 }
 0xc0c   :  { %3769 = vmatprep.subr.mxu1 %v4750_v40  ;;  %4011 = vmatpush1.msra.mxu0 %v4733_v44 }
 0xc0d   :  { %3770 = vmatpush1.msra.mxu1 %v4751_v20  ;;  %4012 = vmatprep.subr.mxu0 %v4734_v21 }
 0xc0e   :  { %3771 = vmatprep.subr.mxu1 %v4752_v45  ;;  %4013 = vmatpush1.msra.mxu0 %v4735_v14 }
 0xc0f   :  { %3772 = vmatpush1.msra.mxu1 %v4753_v19  ;;  %4014 = vmatprep.subr.mxu0 %v4736_v47 }
 0xc10   :  { %3773 = vmatprep.subr.mxu1 %v4754_v30  ;;  %4015 = vmatpush1.msra.mxu0 %v4737_v52 }
 0xc11   :  { %3774 = vmatpush1.msra.mxu1 %v4755_v6  ;;  %4016 = vmatprep.subr.mxu0 %v4738_v15 }
 0xc12   :  { %3775 = vmatprep.subr.mxu1 %v4756_v8  ;;  %4017 = vmatpush1.msra.mxu0 %v6195_v13 }
 0xc13   :  { %3776 = vmatpush1.msra.mxu1 %v4757_v58  ;;  %4018 = vmatprep.subr.mxu0 %v6198_v55 }
 0xc14   :  { %3777 = vmatprep.subr.mxu1 %v4758_v12  ;;  %4019 = vmatpush1.msra.mxu0 %v4741_v41 }
 0xc15   :  { %3778 = vmatpush1.msra.mxu1 %v4759_v32  ;;  %4020 = vmatprep.subr.mxu0 %v6202_v35 }
 0xc16   :  { %v4581_v36 = vpop.eup %4580  ;;  %3779 = vmatprep.subr.mxu1 %v4760_v16  ;;  %4021 = vmatpush1.msra.mxu0 %v6207_v39 }
 0xc17   :  { %3780 = vmatpush1.msra.mxu1 %v4761_v33  ;;  %v3573_v25 = vmul.f32 %v4581_v36, %v4579_v23  ;;  %4022 = vmatprep.subr.mxu0 %v6210_v53  ;;  %v4094_v36 = vld [vmem:[%s6298_s10 + $0x38] sm:$0xff] }
 0xc18   :  { %3934 = vmatprep.subr.mxu1 %v6173_v1  ;;  %4023 = vmatpush1.msra.mxu0 %v6214_v5 }
 0xc19   :  { %4276 = vmatmul.mubr.msk.f32.vlgmr.msra.gmra.mxu1 %vm338_vm3, %v3573_v25  ;;  %4056 = vmatprep.mubr.f32.mxu0 %v6475_v57 }
 0xc1a   :  { %3935 = vmatpush1.msra.mxu1 %v4747_v17  ;;  %3982 = vmatprep.mubr.f32.mxu1 %v6475_v57 }
 0xc1b   :  { %3936 = vmatprep.subr.mxu1 %v4748_v46 }
 0xc1c   :  { %3937 = vmatpush1.msra.mxu1 %v4749_v29 }
 0xc1d   :  { %3938 = vmatprep.subr.mxu1 %v4750_v40 }
 0xc1e   :  { %3939 = vmatpush1.msra.mxu1 %v4751_v20 }
 0xc1f   :  { %3940 = vmatprep.subr.mxu1 %v4752_v45 }
 0xc20   :  { %3941 = vmatpush1.msra.mxu1 %v4753_v19 }
 0xc21   :  { %3942 = vmatprep.subr.mxu1 %v4754_v30 }
 0xc22   :  { %3943 = vmatpush1.msra.mxu1 %v4755_v6 }
 0xc23   :  { %3944 = vmatprep.subr.mxu1 %v4756_v8 }
 0xc24   :  { %3945 = vmatpush1.msra.mxu1 %v4757_v58 }
 0xc25   :  { %3946 = vmatprep.subr.mxu1 %v4758_v12 }
 0xc26   :  { %3947 = vmatpush1.msra.mxu1 %v4759_v32 }
 0xc27   :  { %3948 = vmatprep.subr.mxu1 %v4760_v16  ;;  %v4093_v16 = vld [vmem:[%s6298_s10 + $0x30] sm:$0xff] }
 0xc28   :  { %3949 = vmatpush1.msra.mxu1 %v4761_v33  ;;  %v4090_v33 = vld [vmem:[%s6298_s10 + $0x18] sm:$0xff] }
 0xc29   :  { %4295 = vmatprep.subr.mxu1 %v6475_v57 }
 0xcaa   :  { %v3717_v1 = vpop.f32.mrf.mxu0 }
 0xcac   :  { %v3719_v26 = vpop.f32.mrf.mxu0 }
 0xcc8   :  { %v3643_v11 = vpop.f32.mrf.mxu1  ;;  %v3886_v42 = vpop.f32.mrf.mxu0 }
 0xcc9   :  { %v3718_v31 = vadd.f32 %v3717_v1, %v3643_v11  ;;  %v4089_v11 = vld [vmem:[%s6298_s10 + $0x10] sm:$0xff] }
 0xcca   :  { %v3645_v18 = vpop.f32.mrf.mxu1 }
 0xccb   :  { %v3722_v49 = vadd.f32 %v3718_v31, %v6655_v10  ;;  %v3720_v28 = vadd.f32 %v3719_v26, %v3645_v18  ;;  %v3888_v10 = vpop.f32.mrf.mxu0 }
 0xccd   :  { %v4274_v51 = vmul.f32 -1.442695, %v3722_v49  ;;  %v3723_v50 = vadd.f32 %v3720_v28, %v6550_v27  ;;  %v4088_v49 = vld [vmem:[%s6298_s10 + $0x8] sm:$0xff] }
 0xccf   :  { %4582 = vpow2.f32 %v4274_v51  ;;  %v4275_v22 = vmul.f32 -1.442695, %v3723_v50  ;;  %v4087_v51 = vld [vmem:[%s6298_s10] sm:$0xff] }
 0xcd0   :  { %4584 = vtanh.f32 %v3723_v50 }
 0xcd9   :  { %v3815_v62 = vpop.f32.mrf.mxu1 }
 0xcda   :  { %v3887_v48 = vadd.f32 %v3886_v42, %v3815_v62 }
 0xcdb   :  { %v3817_v47 = vpop.f32.mrf.mxu1 }
 0xcdc   :  { %v4583_v38 = vpop.eup %4582  ;;  %v3891_v44 = vadd.f32 %v3887_v48, %v5470_v37  ;;  %v3889_v0 = vadd.f32 %v3888_v10, %v3817_v47 }
 0xcdd   :  { %v3730_v21 = vadd.f32 1.0, %v4583_v38  ;;  %v4585_v24 = vpop.eup %4584 }
 0xcde   :  { %v4278_v14 = vmul.f32 -1.442695, %v3891_v44  ;;  %v3892_v52 = vadd.f32 %v3889_v0, %v6551_v43 }
 0xcdf   :  { %4586 = vrcp.f32 %v3730_v21  ;;  %v4284_v21 = vld [vmem:[%s6299_s11] ss:$0 sm:$0xff] }
 0xce0   :  { %4588 = vpow2.f32 %v4278_v14  ;;  %v4279_v39 = vmul.f32 -1.442695, %v3892_v52 }
 0xce1   :  { %4590 = vtanh.f32 %v3892_v52 }
 0xcec   :  { %v4587_v15 = vpop.eup %4586 }
 0xced   :  { %v4589_v13 = vpop.eup %4588  ;;  %v3738_v9 = vmul.f32 %v4587_v15, %v4585_v24  ;;  %v3737_v5 = vmul.f32 %v4587_v15, %v6205_v61 }
 0xcee   :  { %v3899_v55 = vadd.f32 1.0, %v4589_v13  ;;  %v4591_v27 = vpop.eup %4590 }
 0xcef   :  { %3740 = vrot.lane.b32.xlu1 %v3738_v9, %s4923_s3 }
 0xcf0   :  { %4592 = vrcp.f32 %v3899_v55 }
 0xcf1   :  { %4594 = vpow2.f32 %v4275_v22 }
 0xcf2   :  { %4596 = vpow2.f32 %v4279_v39 }
 0xcfd   :  { %v4593_v56 = vpop.eup %4592 }
 0xcfe   :  { %v3907_v41 = vmul.f32 %v4593_v56, %v4591_v27  ;;  %v4595_v35 = vpop.eup %4594  ;;  %v3906_v63 = vmul.f32 %v4593_v56, %v6219_v7 }
 0xcff   :  { %v3731_v53 = vadd.f32 1.0, %v4595_v35  ;;  %v4597_v2 = vpop.eup %4596 }
 0xd00   :  { %3909 = vrot.lane.b32.xlu0 %v3907_v41, %s4923_s3  ;;  %v3900_v4 = vadd.f32 1.0, %v4597_v2 }
 0xd01   :  { %4598 = vrcp.f32 %v3731_v53 }
 0xd0e   :  { %v4599_v60 = vpop.eup %4598 }
 0xd61   :  { %v3741_v54 = vpop.permute.xlu1 %3740 }
 0xd62   :  { %v3743_v59 = vadd.f32 %v3741_v54, %v3737_v5 }
 0xd64   :  { %4600 = vtanh.f32 %v3743_v59 }
 0xd65   :  { %4602 = vrcp.f32 %v3900_v4 }
 0xd71   :  { %v4601_v3 = vpop.eup %4600 }
 0xd72   :  { %v3910_v34 = vpop.permute.xlu0 %3909  ;;  %v3745_v17 = vmul.f32 %v4601_v3, %v4599_v60  ;;  %v4603_v29 = vpop.eup %4602 }
 0xd73   :  { %v3912_v46 = vadd.f32 %v3910_v34, %v3906_v63 }
 0xd74   :  { %4281 = vmatmul.mubr.msk.f32.vlgmr.msra.gmra.mxu0 %vm338_vm3, %v3745_v17 }
 0xd75   :  { %4604 = vtanh.f32 %v3912_v46 }
 0xd82   :  { %v4605_v40 = vpop.eup %4604 }
 0xd83   :  { %v3914_v61 = vmul.f32 %v4605_v40, %v4603_v29 }
 0xd85   :  { %4280 = vmatmul.mubr.msk.f32.vlgmr.msra.gmra.mxu1 %vm338_vm3, %v3914_v61 }
 0xd86   :  { %4296 = vmatpush3.msra.mxu1 %v4094_v36  ;;  %4311 = vmatprep.mubr.msk.f32.mxu1 %vm4924_vm4, %v6475_v57 }
 0xd87   :  { %4297 = vmatprep.subr.mxu1 %v6475_v57 }
 0xd88   :  { %4298 = vmatpush3.msra.mxu1 %v4093_v16 }
 0xd89   :  { %4299 = vmatprep.subr.mxu1 %v6475_v57 }
 0xe34   :  { %v4058_v20 = vpop.f32.mrf.mxu0 }
 0xe36   :  { %v4060_v8 = vpop.f32.mrf.mxu0 }
 0xe45   :  { %v3984_v45 = vpop.f32.mrf.mxu1 }
 0xe46   :  { %v4059_v19 = vadd.f32 %v4058_v20, %v3984_v45 }
 0xe47   :  { %v3986_v7 = vpop.f32.mrf.mxu1 }
 0xe48   :  { %v4063_v30 = vadd.f32 %v4059_v19, %v5470_v37  ;;  %v4061_v58 = vadd.f32 %v4060_v8, %v3986_v7  ;;  %v4092_v37 = vld [vmem:[%s6298_s10 + $0x28] sm:$0xff] }
 0xe49   :  { %4300 = vmatpush3.msra.mxu1 %v4092_v37 }
 0xe4a   :  { %v4282_v6 = vmul.f32 -1.442695, %v4063_v30  ;;  %v4064_v12 = vadd.f32 %v4061_v58, %v6551_v43  ;;  %v4091_v43 = vld [vmem:[%s6298_s10 + $0x20] sm:$0xff]  ;;  %4301 = vmatprep.subr.mxu1 %v6475_v57 }
 0xe4b   :  { %4302 = vmatpush3.msra.mxu1 %v4091_v43 }
 0xe4c   :  { %4606 = vpow2.f32 %v4282_v6  ;;  %4303 = vmatprep.subr.mxu1 %v6475_v57  ;;  %v4283_v18 = vmul.f32 -1.442695, %v4064_v12 }
 0xe4d   :  { %4608 = vtanh.f32 %v4064_v12  ;;  %4304 = vmatpush3.msra.mxu1 %v4090_v33 }
 0xe4e   :  { %4305 = vmatprep.subr.mxu1 %v6475_v57 }
 0xe4f   :  { %4306 = vmatpush3.msra.mxu1 %v4089_v11 }
 0xe50   :  { %4307 = vmatprep.subr.mxu1 %v6475_v57 }
 0xe51   :  { %4308 = vmatpush3.msra.mxu1 %v4088_v49 }
 0xe52   :  { %4309 = vmatprep.subr.mxu1 %v6475_v57 }
 0xe53   :  { %4310 = vmatpush3.msra.mxu1 %v4087_v51 }
 0xe59   :  { %v4607_v23 = vpop.eup %4606 }
 0xe5a   :  { %v4071_v32 = vadd.f32 1.0, %v4607_v23  ;;  %v4609_v25 = vpop.eup %4608 }
 0xe5c   :  { %4610 = vrcp.f32 %v4071_v32 }
 0xe5d   :  { %4612 = vpow2.f32 %v4283_v18 }
 0xe69   :  { %v4611_v1 = vpop.eup %4610 }
 0xe6a   :  { %v4079_v31 = vmul.f32 %v4611_v1, %v4609_v25  ;;  %v4613_v26 = vpop.eup %4612  ;;  %v4078_v42 = vmul.f32 %v4611_v1, %v3912_v46 }
 0xe6b   :  { %v4072_v28 = vadd.f32 1.0, %v4613_v26 }
 0xe6c   :  { %4081 = vrot.lane.b32.xlu1 %v4079_v31, %s4923_s3 }
 0xe6d   :  { %4614 = vrcp.f32 %v4072_v28 }
 0xe7a   :  { %v4615_v48 = vpop.eup %4614 }
 0xede   :  { %v4082_v62 = vpop.permute.xlu1 %4081 }
 0xedf   :  { %v4084_v50 = vadd.f32 %v4082_v62, %v4078_v42 }
 0xee1   :  { %4616 = vtanh.f32 %v4084_v50 }
 0xeee   :  { %v4617_v38 = vpop.eup %4616 }
 0xeef   :  { %v4086_v44 = vmul.f32 %v4617_v38, %v4615_v48 }
 0xef1   :  { %4312 = vmatmul.mubr.msk.f32.vlgmr.msra.gmra.mxu1 %vm338_vm3, %v4086_v44 }
 0xfb1   :  { %v4171_v57 = vpop.f32.mrf.mxu1 }
 0xfb2   :  { %v4172_v14 = vadd.f32 %v4284_v21, %v4171_v57 }
 0xfb3   :  { %v4313_v47 = vpop.f32.mrf.mxu1 }
 0xfb4   :  { %4176 = vst.msk [vmem:[#allocation14] sm:$0x3] %vm4175_vm5, %v4172_v14 }
 0xfb5   :  { %4893 = shalt.err (!%p4890_p6)
}
 0xfb6   :  { %4186 = dma.vmem_to_hbm [thread:$0]  %s4184_s5, 32, %s6300_s12, [#allocation5]  }
 0xfb7   :  { %4910 = dma.done.wait [#allocation5], 32  }
 0xfb8   :  { %4911 = vsyncadd [#allocation5], 4294967264 }
 0xfb9   :  { %4190 = vsyncpa [#allocation4], 1 }
 0xfba   :  { %4191 = vsyncpa [#allocation7], 1 }
 0xfbb   :  { %4192 = vsyncpa [#allocation10], 1 }
 0xfbc   :  { %4193 = vsyncpa [#allocation13], 1 }
 0xfbd   :  { %4194 = vsyncpa [#allocation5], 1 }

</bundles_post_ra>
